<compile_context>
chip_gen: v5e
topology: v5e:2x2
jax: 0.10.0
libtpu: 0.0.40
codegen_flags: <defaults>
</compile_context>

<pallas_src>
import functools

import jax
import jax.numpy as jnp
import numpy as np
from jax.experimental import pallas as pl
from jax.experimental.pallas import tpu as pltpu


def transformer_block_kernel(x_ref, gains_ref, wqkv_ref, wo_ref,
                             win_ref, wgate_ref, whid_ref,
                             out_ref, scores_ref, attn_scratch,
                             *, num_heads, eps, block_batch):
    bf = jnp.bfloat16
    H = num_heads

    # Hoisted (1, E) gain rows -- broadcast once, reused for every batch row in the block.
    g_attn = gains_ref[0:1, :]
    g_ffn = gains_ref[1:2, :]

    for bi in range(block_batch):                       # static loop over rows in block
        x = x_ref[bi]                                   # (L, E) f32
        L, E = x.shape
        D = E // H
        scale = 1.0 / float(D) ** 0.5

        # ---- RMSNorm (attention) ----------------------------------------
        inv_rms = jax.lax.rsqrt(jnp.mean(x * x, axis=-1, keepdims=True) + eps)
        xn = x * inv_rms * g_attn                       # (L, E) f32
        xb = xn.astype(bf)                              # MXU operand only

        # ---- fused QKV projection: one N=3E MXU matmul --------------------
        qkv = jnp.dot(xb, wqkv_ref[...],
                      preferred_element_type=jnp.float32)        # (L, 3E) f32

        # ---- per-head attention (no (L,H,D) relayouts) ---------------------
        for h in range(H):                              # static loop, static lane slices
            qh = qkv[:, h * D:(h + 1) * D]              # (L, D) f32
            kh = qkv[:, E + h * D:E + (h + 1) * D]
            vh = qkv[:, 2 * E + h * D:2 * E + (h + 1) * D]

            # q @ k^T without an explicit transpose: contract last dims of both.
            logits = jax.lax.dot_general(
                qh.astype(bf), kh.astype(bf),
                dimension_numbers=(((1,), (1,)), ((), ())),
                preferred_element_type=jnp.float32)      # (L, L) f32
            logits = logits * scale                      # PyTorch scales f32 logits

            m = jnp.max(logits, axis=-1, keepdims=True)
            e = jnp.exp(logits - m)
            denom = jnp.sum(e, axis=-1, keepdims=True)
            probs = e * (1.0 / denom)                    # exact: rows sum to 1

            # store this head's scores immediately (overlaps with remaining heads)
            scores_ref[bi, h] = probs.astype(scores_ref.dtype)

            attn_h = jnp.dot(probs.astype(bf), vh.astype(bf),
                             preferred_element_type=jnp.float32)  # (L, D) f32
            attn_scratch[:, h * D:(h + 1) * D] = attn_h

        # ---- out projection (single K=E matmul over the assembled context) --
        attn_out = jnp.dot(attn_scratch[...].astype(bf), wo_ref[...],
                           preferred_element_type=jnp.float32)    # (L, E) f32

        # residual 1
        h1 = x + attn_out

        # ---- RMSNorm (feed-forward) ---------------------------------------
        inv_rms2 = jax.lax.rsqrt(jnp.mean(h1 * h1, axis=-1, keepdims=True) + eps)
        hn = (h1 * inv_rms2 * g_ffn).astype(bf)

        # ---- FeedForward (dropout = identity) -------------------------------
        hidden = jnp.maximum(
            jnp.dot(hn, win_ref[...], preferred_element_type=jnp.float32), 0.0)  # (L, F) f32
        gate = jnp.dot(hidden.astype(bf), wgate_ref[...],
                       preferred_element_type=jnp.float32)                       # (L, F) f32
        ffn = jnp.dot((hidden * gate).astype(bf), whid_ref[...],
                      preferred_element_type=jnp.float32)                        # (L, E) f32

        # residual 2
        out_ref[bi] = (h1 + ffn).astype(out_ref.dtype)


def prepare_params(w_qkv, w_out, g_attn, g_ffn, w_in, w_gate, w_hid):
    """Pre-transpose + pre-cast (bf16) weights once, at trace time, in HBM."""
    bf = jnp.bfloat16
    return dict(
        w_qkv_t=w_qkv.T.astype(bf),                 # (E, 3E), columns ordered [Q | K | V]
        w_out_t=w_out.T.astype(bf),                 # (E, E)
        w_in_t=w_in.T.astype(bf),                   # (E, F)
        w_gate_t=w_gate.T.astype(bf),               # (F, F)  (requires F == E, see TODO)
        w_hid_t=w_hid.T.astype(bf),                 # (F, E)
        gains=jnp.stack([g_attn, g_ffn]).astype(jnp.float32),   # (2, E) packed slab
    )


def transformer_block_forward(x, params, num_heads, eps=1e-6,
                              block_batch=None, scores_dtype=jnp.float32):
    B, L, E = x.shape
    F = params['w_in_t'].shape[1]
    H = num_heads
    assert E % H == 0
    D = E // H
    assert params['w_gate_t'].shape == (F, F), "literal FeedForward gate needs hidden_dim == input_dim"

    # Amortize per-grid-step overhead while keeping >= 2 blocks for v7x's two TCs.
    if block_batch is None:
        block_batch = max(1, B // 2)
    assert B % block_batch == 0
    num_blocks = B // block_batch

    kernel = functools.partial(transformer_block_kernel,
                               num_heads=H, eps=eps, block_batch=block_batch)

    # ---- cost estimate -----------------------------------------------------
    flops = (2 * B * L * E * (3 * E)          # fused qkv projection
             + 2 * B * H * L * L * D * 2      # scores + probs@v
             + 2 * B * L * E * E              # out projection
             + 2 * B * L * E * F              # ffn in
             + 2 * B * L * F * F              # ffn gate
             + 2 * B * L * F * E)             # ffn hidden->out
    transcendentals = B * H * L * L + B * H * L + 2 * B * L
    bytes_accessed = (B * L * E * 4                                     # x
                      + (E * 3 * E + E * E + E * F + F * F + F * E) * 2  # bf16 weights
                      + 2 * E * 4                                        # packed gains
                      + B * L * E * 4                                    # out
                      + B * H * L * L * jnp.dtype(scores_dtype).itemsize)  # scores
    cost = pl.CostEstimate(flops=flops, transcendentals=transcendentals,
                           bytes_accessed=bytes_accessed)

    # ---- right-sized VMEM budget (per-step footprint, x2 headroom) ----------
    weight_bytes = (E * 3 * E + E * E + E * F + F * F + F * E) * 2 + 2 * E * 4
    block_bytes = 2 * (2 * block_batch * L * E * 4
                       + block_batch * H * L * L * jnp.dtype(scores_dtype).itemsize)
    scratch_bytes = L * E * 4
    interm_bytes = (L * 3 * E + 3 * L * L + 2 * L * F + 2 * L * E) * 4
    vmem_limit = int(min(max(2 * (2 * weight_bytes + block_bytes
                                  + scratch_bytes + interm_bytes),
                             16 * 1024 * 1024),
                         64 * 1024 * 1024))

    out, scores = pl.pallas_call(
        kernel,
        out_shape=(jax.ShapeDtypeStruct((B, L, E), x.dtype),
                   jax.ShapeDtypeStruct((B, H, L, L), scores_dtype)),
        grid=(num_blocks,),
        in_specs=[
            pl.BlockSpec((block_batch, L, E), lambda b: (b, 0, 0)),   # x
            pl.BlockSpec((2, E), lambda b: (0, 0)),                   # packed norm gains
            pl.BlockSpec((E, 3 * E), lambda b: (0, 0)),               # fused w_qkv_t
            pl.BlockSpec((E, E), lambda b: (0, 0)),                   # w_out_t
            pl.BlockSpec((E, F), lambda b: (0, 0)),                   # w_in_t
            pl.BlockSpec((F, F), lambda b: (0, 0)),                   # w_gate_t
            pl.BlockSpec((F, E), lambda b: (0, 0)),                   # w_hid_t
        ],
        out_specs=(
            pl.BlockSpec((block_batch, L, E), lambda b: (b, 0, 0)),
            pl.BlockSpec((block_batch, H, L, L), lambda b: (b, 0, 0, 0)),
        ),
        scratch_shapes=[pltpu.VMEM((L, E), jnp.float32)],             # per-row attn context
        compiler_params=pltpu.CompilerParams(
            dimension_semantics=("parallel",),       # shards batch blocks across TCs
            vmem_limit_bytes=vmem_limit),
        cost_estimate=cost,
    )(x, params['gains'], params['w_qkv_t'], params['w_out_t'],
      params['w_in_t'], params['w_gate_t'], params['w_hid_t'])
    return out, scores


def transformer_block_reference(x, params, num_heads, eps=1e-6):
    """Pure-JAX reference mirroring the kernel math (bf16 MXU operands, f32 accum)."""
    B, L, E = x.shape
    H = num_heads
    D = E // H
    bf = jnp.bfloat16
    scale = 1.0 / float(D) ** 0.5

    inv_rms = jax.lax.rsqrt(jnp.mean(x * x, axis=-1, keepdims=True) + eps)
    xn = x * inv_rms * params['gains'][0]
    xb = xn.astype(bf)

    qkv = jnp.einsum('ble,ef->blf', xb, params['w_qkv_t'],
                     preferred_element_type=jnp.float32)
    q, k, v = qkv[..., :E], qkv[..., E:2 * E], qkv[..., 2 * E:]

    qh = q.reshape(B, L, H, D).astype(bf)
    kh = k.reshape(B, L, H, D).astype(bf)
    vh = v.reshape(B, L, H, D).astype(bf)

    logits = jnp.einsum('blhd,bmhd->bhlm', qh, kh,
                        preferred_element_type=jnp.float32) * scale
    probs = jax.nn.softmax(logits, axis=-1)

    attn = jnp.einsum('bhlm,bmhd->blhd', probs.astype(bf), vh,
                      preferred_element_type=jnp.float32).reshape(B, L, E)
    attn_out = jnp.einsum('ble,ef->blf', attn.astype(bf), params['w_out_t'],
                          preferred_element_type=jnp.float32)

    h1 = x + attn_out

    inv_rms2 = jax.lax.rsqrt(jnp.mean(h1 * h1, axis=-1, keepdims=True) + eps)
    hn = (h1 * inv_rms2 * params['gains'][1]).astype(bf)

    hidden = jnp.maximum(
        jnp.einsum('ble,ef->blf', hn, params['w_in_t'],
                   preferred_element_type=jnp.float32), 0.0)
    gate = jnp.einsum('blf,fg->blg', hidden.astype(bf), params['w_gate_t'],
                      preferred_element_type=jnp.float32)
    ffn = jnp.einsum('blf,fe->ble', (hidden * gate).astype(bf), params['w_hid_t'],
                     preferred_element_type=jnp.float32)

    return h1 + ffn, probs


if __name__ == "__main__":
    batch = 2
    seq = 128            # lane-dense (multiple of 128) so scores/output store unmasked
    embedding_dim = 128  # lane-dense; heads=4 -> head_dim=32
    num_heads = 4
    hidden_dim = embedding_dim  # required by the literal FeedForward gate (see TODO)
    eps = 1e-6

    key = jax.random.PRNGKey(0)
    kx, kq, ko, ki, kg, kh, ka, kf = jax.random.split(key, 8)

    x = jax.random.normal(kx, (batch, seq, embedding_dim), dtype=jnp.float32)
    # nn.Linear(E, 3E, bias=False).weight -> (3E, E)
    w_qkv = jax.random.normal(kq, (3 * embedding_dim, embedding_dim), jnp.float32) * 0.05
    # nn.Linear(E, E, bias=False).weight -> (E, E)
    w_out = jax.random.normal(ko, (embedding_dim, embedding_dim), jnp.float32) * 0.05
    # FeedForward weights
    w_in = jax.random.normal(ki, (hidden_dim, embedding_dim), jnp.float32) * 0.05
    w_gate = jax.random.normal(kg, (hidden_dim, embedding_dim), jnp.float32) * 0.05
    w_hid = jax.random.normal(kh, (embedding_dim, hidden_dim), jnp.float32) * 0.05
    # RMSNorm gains (init to ones in PyTorch; perturb so the gain path is exercised)
    g_attn = 1.0 + 0.1 * jax.random.normal(ka, (embedding_dim,), jnp.float32)
    g_ffn = 1.0 + 0.1 * jax.random.normal(kf, (embedding_dim,), jnp.float32)

    params = prepare_params(w_qkv, w_out, g_attn, g_ffn, w_in, w_gate, w_hid)

    out, scores = transformer_block_forward(x, params, num_heads, eps)
    out = jax.block_until_ready(out)
    scores = jax.block_until_ready(scores)

    ref_out, ref_scores = transformer_block_reference(x, params, num_heads, eps)

    np.testing.assert_allclose(np.asarray(out), np.asarray(ref_out),
                               rtol=1e-2, atol=1e-2)
    np.testing.assert_allclose(np.asarray(scores), np.asarray(ref_scores),
                               rtol=1e-2, atol=1e-2)

    print("KERNEL_OK")
</pallas_src>

<mosaic_0001>
module attributes {stable_mosaic.version = 11 : i64} {
  func.func @transformer_block_kernel(%arg0: i32, %arg1: memref<1x128x128xf32, #tpu.memory_space<vmem>>, %arg2: memref<2x128xf32, #tpu.memory_space<vmem>>, %arg3: memref<128x384xbf16, #tpu.memory_space<vmem>>, %arg4: memref<128x128xbf16, #tpu.memory_space<vmem>>, %arg5: memref<128x128xbf16, #tpu.memory_space<vmem>>, %arg6: memref<128x128xbf16, #tpu.memory_space<vmem>>, %arg7: memref<128x128xbf16, #tpu.memory_space<vmem>>, %arg8: memref<1x128x128xf32, #tpu.memory_space<vmem>>, %arg9: memref<1x4x128x128xf32, #tpu.memory_space<vmem>>, %arg10: memref<128x128xf32, #tpu.memory_space<vmem>>) attributes {dimension_semantics = [#tpu.dimension_semantics<parallel>], iteration_bounds = array<i64: 2>, scalar_prefetch = 0 : i64, scratch_operands = 1 : i64, tpu.core_type = #tpu.core_type<tc>, window_params = [{transform_indices = @transform_0, window_bounds = array<i64: 1, 128, 128>}, {pipeline_mode = #tpu.pipeline_mode<synchronous>, transform_indices = @transform_1, window_bounds = array<i64: 2, 128>}, {pipeline_mode = #tpu.pipeline_mode<synchronous>, transform_indices = @transform_2, window_bounds = array<i64: 128, 384>}, {pipeline_mode = #tpu.pipeline_mode<synchronous>, transform_indices = @transform_3, window_bounds = array<i64: 128, 128>}, {pipeline_mode = #tpu.pipeline_mode<synchronous>, transform_indices = @transform_4, window_bounds = array<i64: 128, 128>}, {pipeline_mode = #tpu.pipeline_mode<synchronous>, transform_indices = @transform_5, window_bounds = array<i64: 128, 128>}, {pipeline_mode = #tpu.pipeline_mode<synchronous>, transform_indices = @transform_6, window_bounds = array<i64: 128, 128>}, {transform_indices = @transform_7, window_bounds = array<i64: 1, 128, 128>}, {transform_indices = @transform_8, window_bounds = array<i64: 1, 4, 128, 128>}]} {
    %c0 = arith.constant 0 : index
    %c0_0 = arith.constant 0 : index
    %0 = vector.load %arg2[%c0, %c0_0] : memref<2x128xf32, #tpu.memory_space<vmem>>, vector<1x128xf32>
    %c1 = arith.constant 1 : index
    %c0_1 = arith.constant 0 : index
    %1 = vector.load %arg2[%c1, %c0_1] : memref<2x128xf32, #tpu.memory_space<vmem>>, vector<1x128xf32>
    %c0_2 = arith.constant 0 : index
    %c0_3 = arith.constant 0 : index
    %c0_4 = arith.constant 0 : index
    %2 = vector.load %arg1[%c0_2, %c0_3, %c0_4] : memref<1x128x128xf32, #tpu.memory_space<vmem>>, vector<1x128x128xf32>
    %3 = vector.shape_cast %2 : vector<1x128x128xf32> to vector<128x128xf32>
    %4 = arith.mulf %3, %3 : vector<128x128xf32>
    %cst = arith.constant dense<0.000000e+00> : vector<128xf32>
    %5 = vector.multi_reduction <add>, %4, %cst [1] : vector<128x128xf32> to vector<128xf32>
    %6 = vector.shape_cast %5 : vector<128xf32> to vector<128x1xf32>
    %cst_5 = arith.constant 1.280000e+02 : f32
    %7 = vector.broadcast %cst_5 : f32 to vector<128x1xf32>
    %8 = arith.divf %6, %7 : vector<128x1xf32>
    %cst_6 = arith.constant 9.99999997E-7 : f32
    %9 = vector.broadcast %cst_6 : f32 to vector<128x1xf32>
    %10 = arith.addf %8, %9 : vector<128x1xf32>
    %11 = math.rsqrt %10 : vector<128x1xf32>
    %12 = vector.broadcast %11 : vector<128x1xf32> to vector<128x128xf32>
    %13 = arith.mulf %3, %12 : vector<128x128xf32>
    %14 = vector.broadcast %0 : vector<1x128xf32> to vector<128x128xf32>
    %15 = arith.mulf %13, %14 : vector<128x128xf32>
    %16 = arith.truncf %15 : vector<128x128xf32> to vector<128x128xbf16>
    %c0_7 = arith.constant 0 : index
    %c0_8 = arith.constant 0 : index
    %17 = vector.load %arg3[%c0_7, %c0_8] : memref<128x384xbf16, #tpu.memory_space<vmem>>, vector<128x384xbf16>
    %cst_9 = arith.constant dense<0.000000e+00> : vector<128x384xf32>
    %18 = tpu.matmul %16, %17, %cst_9 {dimension_numbers = #tpu.dot_dimension_numbers<[1], [0], [0], [1], [0, 0, 1, 1], [], []>} : vector<128x128xbf16>, vector<128x384xbf16>, vector<128x384xf32> -> vector<128x384xf32>
    %19 = vector.extract_strided_slice %18 {offsets = [0, 0], sizes = [128, 32], strides = [1, 1]} : vector<128x384xf32> to vector<128x32xf32>
    %20 = vector.extract_strided_slice %18 {offsets = [0, 128], sizes = [128, 32], strides = [1, 1]} : vector<128x384xf32> to vector<128x32xf32>
    %21 = vector.extract_strided_slice %18 {offsets = [0, 256], sizes = [128, 32], strides = [1, 1]} : vector<128x384xf32> to vector<128x32xf32>
    %22 = arith.truncf %19 : vector<128x32xf32> to vector<128x32xbf16>
    %23 = arith.truncf %20 : vector<128x32xf32> to vector<128x32xbf16>
    %cst_10 = arith.constant dense<0.000000e+00> : vector<128x128xf32>
    %24 = tpu.matmul %22, %23, %cst_10 {dimension_numbers = #tpu.dot_dimension_numbers<[1], [1], [0], [0], [0, 0, 1, 0], [], []>} : vector<128x32xbf16>, vector<128x32xbf16>, vector<128x128xf32> -> vector<128x128xf32>
    %cst_11 = arith.constant 0.176776692 : f32
    %25 = vector.broadcast %cst_11 : f32 to vector<128x128xf32>
    %26 = arith.mulf %24, %25 : vector<128x128xf32>
    %cst_12 = arith.constant dense<0xFF800000> : vector<128xf32>
    %27 = vector.multi_reduction <maximumf>, %26, %cst_12 [1] : vector<128x128xf32> to vector<128xf32>
    %28 = vector.shape_cast %27 : vector<128xf32> to vector<128x1xf32>
    %29 = vector.broadcast %28 : vector<128x1xf32> to vector<128x128xf32>
    %30 = arith.subf %26, %29 : vector<128x128xf32>
    %31 = math.exp %30 : vector<128x128xf32>
    %cst_13 = arith.constant dense<0.000000e+00> : vector<128xf32>
    %32 = vector.multi_reduction <add>, %31, %cst_13 [1] : vector<128x128xf32> to vector<128xf32>
    %33 = vector.shape_cast %32 : vector<128xf32> to vector<128x1xf32>
    %cst_14 = arith.constant 1.000000e+00 : f32
    %34 = vector.broadcast %cst_14 : f32 to vector<128x1xf32>
    %35 = arith.divf %34, %33 : vector<128x1xf32>
    %36 = vector.broadcast %35 : vector<128x1xf32> to vector<128x128xf32>
    %37 = arith.mulf %31, %36 : vector<128x128xf32>
    %c0_15 = arith.constant 0 : index
    %c0_16 = arith.constant 0 : index
    %c0_17 = arith.constant 0 : index
    %c0_18 = arith.constant 0 : index
    %38 = vector.load %arg9[%c0_15, %c0_16, %c0_17, %c0_18] : memref<1x4x128x128xf32, #tpu.memory_space<vmem>>, vector<1x1x128x128xf32>
    %39 = vector.shape_cast %38 : vector<1x1x128x128xf32> to vector<128x128xf32>
    %40 = vector.shape_cast %37 : vector<128x128xf32> to vector<1x1x128x128xf32>
    tpu.vector_store %arg9[%c0_15, %c0_16, %c0_17, %c0_18], %40 {strides = array<i32>} : memref<1x4x128x128xf32, #tpu.memory_space<vmem>>, vector<1x1x128x128xf32>,
    %41 = arith.truncf %37 : vector<128x128xf32> to vector<128x128xbf16>
    %42 = arith.truncf %21 : vector<128x32xf32> to vector<128x32xbf16>
    %cst_19 = arith.constant dense<0.000000e+00> : vector<128x32xf32>
    %43 = tpu.matmul %41, %42, %cst_19 {dimension_numbers = #tpu.dot_dimension_numbers<[1], [0], [0], [1], [0, 0, 1, 1], [], []>} : vector<128x128xbf16>, vector<128x32xbf16>, vector<128x32xf32> -> vector<128x32xf32>
    %c0_20 = arith.constant 0 : index
    %c0_21 = arith.constant 0 : index
    %44 = vector.load %arg10[%c0_20, %c0_21] : memref<128x128xf32, #tpu.memory_space<vmem>>, vector<128x32xf32>
    tpu.vector_store %arg10[%c0_20, %c0_21], %43 {strides = array<i32>} : memref<128x128xf32, #tpu.memory_space<vmem>>, vector<128x32xf32>,
    %45 = vector.extract_strided_slice %18 {offsets = [0, 32], sizes = [128, 32], strides = [1, 1]} : vector<128x384xf32> to vector<128x32xf32>
    %46 = vector.extract_strided_slice %18 {offsets = [0, 160], sizes = [128, 32], strides = [1, 1]} : vector<128x384xf32> to vector<128x32xf32>
    %47 = vector.extract_strided_slice %18 {offsets = [0, 288], sizes = [128, 32], strides = [1, 1]} : vector<128x384xf32> to vector<128x32xf32>
    %48 = arith.truncf %45 : vector<128x32xf32> to vector<128x32xbf16>
    %49 = arith.truncf %46 : vector<128x32xf32> to vector<128x32xbf16>
    %cst_22 = arith.constant dense<0.000000e+00> : vector<128x128xf32>
    %50 = tpu.matmul %48, %49, %cst_22 {dimension_numbers = #tpu.dot_dimension_numbers<[1], [1], [0], [0], [0, 0, 1, 0], [], []>} : vector<128x32xbf16>, vector<128x32xbf16>, vector<128x128xf32> -> vector<128x128xf32>
    %cst_23 = arith.constant 0.176776692 : f32
    %51 = vector.broadcast %cst_23 : f32 to vector<128x128xf32>
    %52 = arith.mulf %50, %51 : vector<128x128xf32>
    %cst_24 = arith.constant dense<0xFF800000> : vector<128xf32>
    %53 = vector.multi_reduction <maximumf>, %52, %cst_24 [1] : vector<128x128xf32> to vector<128xf32>
    %54 = vector.shape_cast %53 : vector<128xf32> to vector<128x1xf32>
    %55 = vector.broadcast %54 : vector<128x1xf32> to vector<128x128xf32>
    %56 = arith.subf %52, %55 : vector<128x128xf32>
    %57 = math.exp %56 : vector<128x128xf32>
    %cst_25 = arith.constant dense<0.000000e+00> : vector<128xf32>
    %58 = vector.multi_reduction <add>, %57, %cst_25 [1] : vector<128x128xf32> to vector<128xf32>
    %59 = vector.shape_cast %58 : vector<128xf32> to vector<128x1xf32>
    %cst_26 = arith.constant 1.000000e+00 : f32
    %60 = vector.broadcast %cst_26 : f32 to vector<128x1xf32>
    %61 = arith.divf %60, %59 : vector<128x1xf32>
    %62 = vector.broadcast %61 : vector<128x1xf32> to vector<128x128xf32>
    %63 = arith.mulf %57, %62 : vector<128x128xf32>
    %c0_27 = arith.constant 0 : index
    %c1_28 = arith.constant 1 : index
    %c0_29 = arith.constant 0 : index
    %c0_30 = arith.constant 0 : index
    %64 = vector.load %arg9[%c0_27, %c1_28, %c0_29, %c0_30] : memref<1x4x128x128xf32, #tpu.memory_space<vmem>>, vector<1x1x128x128xf32>
    %65 = vector.shape_cast %64 : vector<1x1x128x128xf32> to vector<128x128xf32>
    %66 = vector.shape_cast %63 : vector<128x128xf32> to vector<1x1x128x128xf32>
    tpu.vector_store %arg9[%c0_27, %c1_28, %c0_29, %c0_30], %66 {strides = array<i32>} : memref<1x4x128x128xf32, #tpu.memory_space<vmem>>, vector<1x1x128x128xf32>,
    %67 = arith.truncf %63 : vector<128x128xf32> to vector<128x128xbf16>
    %68 = arith.truncf %47 : vector<128x32xf32> to vector<128x32xbf16>
    %cst_31 = arith.constant dense<0.000000e+00> : vector<128x32xf32>
    %69 = tpu.matmul %67, %68, %cst_31 {dimension_numbers = #tpu.dot_dimension_numbers<[1], [0], [0], [1], [0, 0, 1, 1], [], []>} : vector<128x128xbf16>, vector<128x32xbf16>, vector<128x32xf32> -> vector<128x32xf32>
    %c0_32 = arith.constant 0 : index
    %c32 = arith.constant 32 : index
    %70 = vector.load %arg10[%c0_32, %c32] : memref<128x128xf32, #tpu.memory_space<vmem>>, vector<128x32xf32>
    tpu.vector_store %arg10[%c0_32, %c32], %69 {strides = array<i32>} : memref<128x128xf32, #tpu.memory_space<vmem>>, vector<128x32xf32>,
    %71 = vector.extract_strided_slice %18 {offsets = [0, 64], sizes = [128, 32], strides = [1, 1]} : vector<128x384xf32> to vector<128x32xf32>
    %72 = vector.extract_strided_slice %18 {offsets = [0, 192], sizes = [128, 32], strides = [1, 1]} : vector<128x384xf32> to vector<128x32xf32>
    %73 = vector.extract_strided_slice %18 {offsets = [0, 320], sizes = [128, 32], strides = [1, 1]} : vector<128x384xf32> to vector<128x32xf32>
    %74 = arith.truncf %71 : vector<128x32xf32> to vector<128x32xbf16>
    %75 = arith.truncf %72 : vector<128x32xf32> to vector<128x32xbf16>
    %cst_33 = arith.constant dense<0.000000e+00> : vector<128x128xf32>
    %76 = tpu.matmul %74, %75, %cst_33 {dimension_numbers = #tpu.dot_dimension_numbers<[1], [1], [0], [0], [0, 0, 1, 0], [], []>} : vector<128x32xbf16>, vector<128x32xbf16>, vector<128x128xf32> -> vector<128x128xf32>
    %cst_34 = arith.constant 0.176776692 : f32
    %77 = vector.broadcast %cst_34 : f32 to vector<128x128xf32>
    %78 = arith.mulf %76, %77 : vector<128x128xf32>
    %cst_35 = arith.constant dense<0xFF800000> : vector<128xf32>
    %79 = vector.multi_reduction <maximumf>, %78, %cst_35 [1] : vector<128x128xf32> to vector<128xf32>
    %80 = vector.shape_cast %79 : vector<128xf32> to vector<128x1xf32>
    %81 = vector.broadcast %80 : vector<128x1xf32> to vector<128x128xf32>
    %82 = arith.subf %78, %81 : vector<128x128xf32>
    %83 = math.exp %82 : vector<128x128xf32>
    %cst_36 = arith.constant dense<0.000000e+00> : vector<128xf32>
    %84 = vector.multi_reduction <add>, %83, %cst_36 [1] : vector<128x128xf32> to vector<128xf32>
    %85 = vector.shape_cast %84 : vector<128xf32> to vector<128x1xf32>
    %cst_37 = arith.constant 1.000000e+00 : f32
    %86 = vector.broadcast %cst_37 : f32 to vector<128x1xf32>
    %87 = arith.divf %86, %85 : vector<128x1xf32>
    %88 = vector.broadcast %87 : vector<128x1xf32> to vector<128x128xf32>
    %89 = arith.mulf %83, %88 : vector<128x128xf32>
    %c0_38 = arith.constant 0 : index
    %c2 = arith.constant 2 : index
    %c0_39 = arith.constant 0 : index
    %c0_40 = arith.constant 0 : index
    %90 = vector.load %arg9[%c0_38, %c2, %c0_39, %c0_40] : memref<1x4x128x128xf32, #tpu.memory_space<vmem>>, vector<1x1x128x128xf32>
    %91 = vector.shape_cast %90 : vector<1x1x128x128xf32> to vector<128x128xf32>
    %92 = vector.shape_cast %89 : vector<128x128xf32> to vector<1x1x128x128xf32>
    tpu.vector_store %arg9[%c0_38, %c2, %c0_39, %c0_40], %92 {strides = array<i32>} : memref<1x4x128x128xf32, #tpu.memory_space<vmem>>, vector<1x1x128x128xf32>,
    %93 = arith.truncf %89 : vector<128x128xf32> to vector<128x128xbf16>
    %94 = arith.truncf %73 : vector<128x32xf32> to vector<128x32xbf16>
    %cst_41 = arith.constant dense<0.000000e+00> : vector<128x32xf32>
    %95 = tpu.matmul %93, %94, %cst_41 {dimension_numbers = #tpu.dot_dimension_numbers<[1], [0], [0], [1], [0, 0, 1, 1], [], []>} : vector<128x128xbf16>, vector<128x32xbf16>, vector<128x32xf32> -> vector<128x32xf32>
    %c0_42 = arith.constant 0 : index
    %c64 = arith.constant 64 : index
    %96 = vector.load %arg10[%c0_42, %c64] : memref<128x128xf32, #tpu.memory_space<vmem>>, vector<128x32xf32>
    tpu.vector_store %arg10[%c0_42, %c64], %95 {strides = array<i32>} : memref<128x128xf32, #tpu.memory_space<vmem>>, vector<128x32xf32>,
    %97 = vector.extract_strided_slice %18 {offsets = [0, 96], sizes = [128, 32], strides = [1, 1]} : vector<128x384xf32> to vector<128x32xf32>
    %98 = vector.extract_strided_slice %18 {offsets = [0, 224], sizes = [128, 32], strides = [1, 1]} : vector<128x384xf32> to vector<128x32xf32>
    %99 = vector.extract_strided_slice %18 {offsets = [0, 352], sizes = [128, 32], strides = [1, 1]} : vector<128x384xf32> to vector<128x32xf32>
    %100 = arith.truncf %97 : vector<128x32xf32> to vector<128x32xbf16>
    %101 = arith.truncf %98 : vector<128x32xf32> to vector<128x32xbf16>
    %cst_43 = arith.constant dense<0.000000e+00> : vector<128x128xf32>
    %102 = tpu.matmul %100, %101, %cst_43 {dimension_numbers = #tpu.dot_dimension_numbers<[1], [1], [0], [0], [0, 0, 1, 0], [], []>} : vector<128x32xbf16>, vector<128x32xbf16>, vector<128x128xf32> -> vector<128x128xf32>
    %cst_44 = arith.constant 0.176776692 : f32
    %103 = vector.broadcast %cst_44 : f32 to vector<128x128xf32>
    %104 = arith.mulf %102, %103 : vector<128x128xf32>
    %cst_45 = arith.constant dense<0xFF800000> : vector<128xf32>
    %105 = vector.multi_reduction <maximumf>, %104, %cst_45 [1] : vector<128x128xf32> to vector<128xf32>
    %106 = vector.shape_cast %105 : vector<128xf32> to vector<128x1xf32>
    %107 = vector.broadcast %106 : vector<128x1xf32> to vector<128x128xf32>
    %108 = arith.subf %104, %107 : vector<128x128xf32>
    %109 = math.exp %108 : vector<128x128xf32>
    %cst_46 = arith.constant dense<0.000000e+00> : vector<128xf32>
    %110 = vector.multi_reduction <add>, %109, %cst_46 [1] : vector<128x128xf32> to vector<128xf32>
    %111 = vector.shape_cast %110 : vector<128xf32> to vector<128x1xf32>
    %cst_47 = arith.constant 1.000000e+00 : f32
    %112 = vector.broadcast %cst_47 : f32 to vector<128x1xf32>
    %113 = arith.divf %112, %111 : vector<128x1xf32>
    %114 = vector.broadcast %113 : vector<128x1xf32> to vector<128x128xf32>
    %115 = arith.mulf %109, %114 : vector<128x128xf32>
    %c0_48 = arith.constant 0 : index
    %c3 = arith.constant 3 : index
    %c0_49 = arith.constant 0 : index
    %c0_50 = arith.constant 0 : index
    %116 = vector.load %arg9[%c0_48, %c3, %c0_49, %c0_50] : memref<1x4x128x128xf32, #tpu.memory_space<vmem>>, vector<1x1x128x128xf32>
    %117 = vector.shape_cast %116 : vector<1x1x128x128xf32> to vector<128x128xf32>
    %118 = vector.shape_cast %115 : vector<128x128xf32> to vector<1x1x128x128xf32>
    tpu.vector_store %arg9[%c0_48, %c3, %c0_49, %c0_50], %118 {strides = array<i32>} : memref<1x4x128x128xf32, #tpu.memory_space<vmem>>, vector<1x1x128x128xf32>,
    %119 = arith.truncf %115 : vector<128x128xf32> to vector<128x128xbf16>
    %120 = arith.truncf %99 : vector<128x32xf32> to vector<128x32xbf16>
    %cst_51 = arith.constant dense<0.000000e+00> : vector<128x32xf32>
    %121 = tpu.matmul %119, %120, %cst_51 {dimension_numbers = #tpu.dot_dimension_numbers<[1], [0], [0], [1], [0, 0, 1, 1], [], []>} : vector<128x128xbf16>, vector<128x32xbf16>, vector<128x32xf32> -> vector<128x32xf32>
    %c0_52 = arith.constant 0 : index
    %c96 = arith.constant 96 : index
    %122 = vector.load %arg10[%c0_52, %c96] : memref<128x128xf32, #tpu.memory_space<vmem>>, vector<128x32xf32>
    tpu.vector_store %arg10[%c0_52, %c96], %121 {strides = array<i32>} : memref<128x128xf32, #tpu.memory_space<vmem>>, vector<128x32xf32>,
    %c0_53 = arith.constant 0 : index
    %c0_54 = arith.constant 0 : index
    %123 = vector.load %arg10[%c0_53, %c0_54] : memref<128x128xf32, #tpu.memory_space<vmem>>, vector<128x128xf32>
    %124 = arith.truncf %123 : vector<128x128xf32> to vector<128x128xbf16>
    %c0_55 = arith.constant 0 : index
    %c0_56 = arith.constant 0 : index
    %125 = vector.load %arg4[%c0_55, %c0_56] : memref<128x128xbf16, #tpu.memory_space<vmem>>, vector<128x128xbf16>
    %cst_57 = arith.constant dense<0.000000e+00> : vector<128x128xf32>
    %126 = tpu.matmul %124, %125, %cst_57 {dimension_numbers = #tpu.dot_dimension_numbers<[1], [0], [0], [1], [0, 0, 1, 1], [], []>} : vector<128x128xbf16>, vector<128x128xbf16>, vector<128x128xf32> -> vector<128x128xf32>
    %127 = arith.addf %3, %126 : vector<128x128xf32>
    %128 = arith.mulf %127, %127 : vector<128x128xf32>
    %cst_58 = arith.constant dense<0.000000e+00> : vector<128xf32>
    %129 = vector.multi_reduction <add>, %128, %cst_58 [1] : vector<128x128xf32> to vector<128xf32>
    %130 = vector.shape_cast %129 : vector<128xf32> to vector<128x1xf32>
    %cst_59 = arith.constant 1.280000e+02 : f32
    %131 = vector.broadcast %cst_59 : f32 to vector<128x1xf32>
    %132 = arith.divf %130, %131 : vector<128x1xf32>
    %cst_60 = arith.constant 9.99999997E-7 : f32
    %133 = vector.broadcast %cst_60 : f32 to vector<128x1xf32>
    %134 = arith.addf %132, %133 : vector<128x1xf32>
    %135 = math.rsqrt %134 : vector<128x1xf32>
    %136 = vector.broadcast %135 : vector<128x1xf32> to vector<128x128xf32>
    %137 = arith.mulf %127, %136 : vector<128x128xf32>
    %138 = vector.broadcast %1 : vector<1x128xf32> to vector<128x128xf32>
    %139 = arith.mulf %137, %138 : vector<128x128xf32>
    %140 = arith.truncf %139 : vector<128x128xf32> to vector<128x128xbf16>
    %c0_61 = arith.constant 0 : index
    %c0_62 = arith.constant 0 : index
    %141 = vector.load %arg5[%c0_61, %c0_62] : memref<128x128xbf16, #tpu.memory_space<vmem>>, vector<128x128xbf16>
    %cst_63 = arith.constant dense<0.000000e+00> : vector<128x128xf32>
    %142 = tpu.matmul %140, %141, %cst_63 {dimension_numbers = #tpu.dot_dimension_numbers<[1], [0], [0], [1], [0, 0, 1, 1], [], []>} : vector<128x128xbf16>, vector<128x128xbf16>, vector<128x128xf32> -> vector<128x128xf32>
    %cst_64 = arith.constant 0.000000e+00 : f32
    %143 = vector.broadcast %cst_64 : f32 to vector<128x128xf32>
    %144 = arith.maximumf %142, %143 : vector<128x128xf32>
    %145 = arith.truncf %144 : vector<128x128xf32> to vector<128x128xbf16>
    %c0_65 = arith.constant 0 : index
    %c0_66 = arith.constant 0 : index
    %146 = vector.load %arg6[%c0_65, %c0_66] : memref<128x128xbf16, #tpu.memory_space<vmem>>, vector<128x128xbf16>
    %cst_67 = arith.constant dense<0.000000e+00> : vector<128x128xf32>
    %147 = tpu.matmul %145, %146, %cst_67 {dimension_numbers = #tpu.dot_dimension_numbers<[1], [0], [0], [1], [0, 0, 1, 1], [], []>} : vector<128x128xbf16>, vector<128x128xbf16>, vector<128x128xf32> -> vector<128x128xf32>
    %148 = arith.mulf %144, %147 : vector<128x128xf32>
    %149 = arith.truncf %148 : vector<128x128xf32> to vector<128x128xbf16>
    %c0_68 = arith.constant 0 : index
    %c0_69 = arith.constant 0 : index
    %150 = vector.load %arg7[%c0_68, %c0_69] : memref<128x128xbf16, #tpu.memory_space<vmem>>, vector<128x128xbf16>
    %cst_70 = arith.constant dense<0.000000e+00> : vector<128x128xf32>
    %151 = tpu.matmul %149, %150, %cst_70 {dimension_numbers = #tpu.dot_dimension_numbers<[1], [0], [0], [1], [0, 0, 1, 1], [], []>} : vector<128x128xbf16>, vector<128x128xbf16>, vector<128x128xf32> -> vector<128x128xf32>
    %152 = arith.addf %127, %151 : vector<128x128xf32>
    %c0_71 = arith.constant 0 : index
    %c0_72 = arith.constant 0 : index
    %c0_73 = arith.constant 0 : index
    %153 = vector.load %arg8[%c0_71, %c0_72, %c0_73] : memref<1x128x128xf32, #tpu.memory_space<vmem>>, vector<1x128x128xf32>
    %154 = vector.shape_cast %153 : vector<1x128x128xf32> to vector<128x128xf32>
    %155 = vector.shape_cast %152 : vector<128x128xf32> to vector<1x128x128xf32>
    tpu.vector_store %arg8[%c0_71, %c0_72, %c0_73], %155 {strides = array<i32>} : memref<1x128x128xf32, #tpu.memory_space<vmem>>, vector<1x128x128xf32>,
    return
  }
  func.func @transform_0(%arg0: i32) -> (i32, i32, i32) {
    %c0_i32 = arith.constant 0 : i32
    %c0_i32_0 = arith.constant 0 : i32
    %c0_i32_1 = arith.constant 0 : i32
    return %arg0, %c0_i32, %c0_i32_0 : i32, i32, i32
  }
  func.func @transform_1(%arg0: i32) -> (i32, i32) {
    %c0_i32 = arith.constant 0 : i32
    %c0_i32_0 = arith.constant 0 : i32
    %c0_i32_1 = arith.constant 0 : i32
    return %c0_i32, %c0_i32_0 : i32, i32
  }
  func.func @transform_2(%arg0: i32) -> (i32, i32) {
    %c0_i32 = arith.constant 0 : i32
    %c0_i32_0 = arith.constant 0 : i32
    %c0_i32_1 = arith.constant 0 : i32
    return %c0_i32, %c0_i32_0 : i32, i32
  }
  func.func @transform_3(%arg0: i32) -> (i32, i32) {
    %c0_i32 = arith.constant 0 : i32
    %c0_i32_0 = arith.constant 0 : i32
    %c0_i32_1 = arith.constant 0 : i32
    return %c0_i32, %c0_i32_0 : i32, i32
  }
  func.func @transform_4(%arg0: i32) -> (i32, i32) {
    %c0_i32 = arith.constant 0 : i32
    %c0_i32_0 = arith.constant 0 : i32
    %c0_i32_1 = arith.constant 0 : i32
    return %c0_i32, %c0_i32_0 : i32, i32
  }
  func.func @transform_5(%arg0: i32) -> (i32, i32) {
    %c0_i32 = arith.constant 0 : i32
    %c0_i32_0 = arith.constant 0 : i32
    %c0_i32_1 = arith.constant 0 : i32
    return %c0_i32, %c0_i32_0 : i32, i32
  }
  func.func @transform_6(%arg0: i32) -> (i32, i32) {
    %c0_i32 = arith.constant 0 : i32
    %c0_i32_0 = arith.constant 0 : i32
    %c0_i32_1 = arith.constant 0 : i32
    return %c0_i32, %c0_i32_0 : i32, i32
  }
  func.func @transform_7(%arg0: i32) -> (i32, i32, i32) {
    %c0_i32 = arith.constant 0 : i32
    %c0_i32_0 = arith.constant 0 : i32
    %c0_i32_1 = arith.constant 0 : i32
    return %arg0, %c0_i32, %c0_i32_0 : i32, i32, i32
  }
  func.func @transform_8(%arg0: i32) -> (i32, i32, i32, i32) {
    %c0_i32 = arith.constant 0 : i32
    %c0_i32_0 = arith.constant 0 : i32
    %c0_i32_1 = arith.constant 0 : i32
    %c0_i32_2 = arith.constant 0 : i32
    return %arg0, %c0_i32, %c0_i32_0, %c0_i32_1 : i32, i32, i32, i32
  }
}

</mosaic_0001>

<bundles_post_ra>
// kernel: tpu_custom_call.1
= control target key start
LH: loop header
LB: loop body
LE: loop exit
PB: predicated region body
PF: predicated region fallthrough
CT: control target
= control target key end

     0   :  { %s8852_s0 = inlined_call_operand.hbm [shape: f32[2,128,128], index: 0, kind: input, shape index: {}]   ;;  %s8853_s1 = inlined_call_operand.hbm [shape: f32[2,128], index: 1, kind: input, shape index: {}]   ;;  %s8854_s2 = inlined_call_operand.hbm [shape: bf16[128,384], index: 2, kind: input, shape index: {}]   ;;  %s8855_s3 = inlined_call_operand.hbm [shape: bf16[128,128], index: 3, kind: input, shape index: {}]   ;;  %s8856_s4 = inlined_call_operand.hbm [shape: bf16[128,128], index: 4, kind: input, shape index: {}]   ;;  %s8857_s5 = inlined_call_operand.hbm [shape: bf16[128,128], index: 5, kind: input, shape index: {}]   ;;  %s8858_s6 = inlined_call_operand.hbm [shape: bf16[128,128], index: 6, kind: input, shape index: {}]   ;;  %s8859_s7 = inlined_call_operand.hbm [shape: f32[2,128,128], index: 7, kind: output, shape index: {0}]   ;;  %s8860_s8 = inlined_call_operand.hbm [shape: f32[2,4,128,128], index: 8, kind: output, shape index: {1}]  }
   0x1   :  { %8875 = sst [smem:[#allocation40_spill]] %s8853_s1 }
   0x2   :  { %8876 = sst [smem:[#allocation41_spill]] %s8854_s2 }
   0x3   :  { %8877 = sst [smem:[#allocation42_spill]] %s8855_s3 }
   0x4   :  { %14 = vsyncpa [#allocation4], 0 }
   0x5   :  { %16 = vsyncpa [#allocation4 + $0x1], 0 }
   0x6   :  { %17 = vsyncpa [#allocation7], 0 }
   0x7   :  { %18 = vsyncpa [#allocation10], 0 }
   0x8   :  { %19 = vsyncpa [#allocation13], 0 }
   0x9   :  { %20 = vsyncpa [#allocation5], 0 }
   0xa   :  { %22 = vsyncpa [#allocation5 + $0x1], 0 }
   0xb   :  { %23 = vsyncpa [#allocation17], 0 }
   0xc   :  { %25 = vsyncpa [#allocation17 + $0x1], 0  ;;  %s6062_s27 = smov 0   ;;  %s6064_s28 = smov 0  }
   0xd   :  { %s6066_s29 = smov 0   ;;  %s6068_s30 = smov 0  }
   0xe LB: > { %s8878_s1 = sld [smem:[#allocation40_spill]]  ;;  %s6086_s12 = sadd.s32 4294967295, %s5997_s30   ;;  %s5997_s30 = sphi %s6068_s30, %s9006_s30   ;;  %s5993_s29 = sphi %s6066_s29, %s9005_s29   ;;  %s5989_s28 = sphi %s6064_s28, %s9004_s28   ;;  %s5985_s27 = sphi %s6062_s27, %s9003_s27  }
   0xf   : > { %p4797_p0 = scmp.ge.s32.totalorder %s5997_s30, 1  ;;  %p52_p1 = scmp.eq.s32.totalorder %s6086_s12, 0 }
  0x10   : > { %p240_p2 = scmp.lt.s32.totalorder %s5997_s30, 3  ;;  %s5999_s14 = smov [#allocation6]  }
  0x11   : > { %s254_s15 = sshll.u32 %s5999_s14, 4  ;;  %s8880_s3 = sld [smem:[#allocation42_spill]]  ;;  %s255_s15 = int_to_ptr.vmem [resolvable:$true] %s254_s15 }
  0x12   : > { %p6091_p3 = pnand %p4797_p0, %p240_p2  ;;  %s6000_s20 = smov [#allocation9]  }
  0x13   : > { %s279_s21 = sshll.u32 %s6000_s20, 4  ;;  %s6001_s22 = smov 64   ;;  %s280_s21 = int_to_ptr.vmem [resolvable:$true] %s279_s21 }
  0x14   : > { %s252_s11 = sshll.u32 %s8878_s1, 4  ;;  %p5243_p5 = pneg %p6091_p3  ;;  %s253_s11 = int_to_ptr.hbm [resolvable:$true] %s252_s11 }
  0x15   : > { %s6002_s23 = smov 4   ;;  %s305_s26 = sshll.u32 %s8857_s5, 4  ;;  %s306_s26 = int_to_ptr.hbm [resolvable:$true] %s305_s26 }
  0x16   : > { %p6103_p6 = pnand %p5243_p5, %p52_p1  ;;  %s6003_s9 = smov [#allocation12]  }
  0x17   : > { %s277_s18 = sshll.u32 %s8880_s3, 4  ;;  %s307_s10 = sshll.u32 %s6003_s9, 4  ;;  %s278_s18 = int_to_ptr.hbm [resolvable:$true] %s277_s18  ;;  %s308_s10 = int_to_ptr.vmem [resolvable:$true] %s307_s10 }
  0x18   : > { %5246 = dma.hbm_to_vmem [thread:$0]  (!%p6103_p6), %s253_s11, 32, %s255_s15, [#allocation7]  }
  0x19   : > { %5252 = dma.hbm_to_vmem [thread:$0]  (!%p6103_p6), %s278_s18, 1024, %s280_s21, [#allocation10], %s6001_s22, %s6001_s22, %s6002_s23  }
  0x1a   : > { %s8882_s2 = sld [smem:[#allocation41_spill]]  ;;  %s6004_s15 = smov [#allocation8]  }
  0x1b   : > { %5258 = dma.hbm_to_vmem [thread:$0]  (!%p6103_p6), %s306_s26, 1024, %s308_s10, [#allocation13], %s6001_s22, %s6001_s22, %s6002_s23  }
  0x1c   : > { %s265_s17 = sshll.u32 %s6004_s15, 4  ;;  %s6005_s18 = smov 192   ;;  %s266_s17 = int_to_ptr.vmem [resolvable:$true] %s265_s17 }
  0x1d   : > { %s6006_s20 = smov 12   ;;  %s291_s25 = sshll.u32 %s8856_s4, 4  ;;  %s292_s25 = int_to_ptr.hbm [resolvable:$true] %s291_s25 }
  0x1e   : > { %s6007_s26 = smov [#allocation11]   ;;  %s319_s16 = sshll.u32 %s8858_s6, 4  ;;  %s320_s16 = int_to_ptr.hbm [resolvable:$true] %s319_s16 }
  0x1f   : > { %s293_s9 = sshll.u32 %s6007_s26, 4  ;;  %s38_s21 = sadd.s32 1, %s5993_s29  ;;  %s294_s9 = int_to_ptr.vmem [resolvable:$true] %s293_s9 }
  0x20   : > { %s263_s11 = sshll.u32 %s8882_s2, 4  ;;  %p45_p8 = scmp.ne.s32.totalorder %s5993_s29, %s5989_s28  ;;  %s264_s11 = int_to_ptr.hbm [resolvable:$true] %s263_s11 }
  0x21   : > { %5249 = dma.hbm_to_vmem [thread:$0]  (!%p6103_p6), %s264_s11, 3072, %s266_s17, [#allocation7], %s6005_s18, %s6005_s18, %s6006_s20  }
  0x22   : > { %5255 = dma.hbm_to_vmem [thread:$0]  (!%p6103_p6), %s292_s25, 1024, %s294_s9, [#allocation10], %s6001_s22, %s6001_s22, %s6002_s23  }
  0x23   : > { %s6008_s11 = smov [#allocation14]   ;;  %s4796_s17 = sadd.s32 4294967294, %s5997_s30  }
  0x24   : > { %s321_s15 = sshll.u32 %s6008_s11, 4  ;;  %s6145_s18 = sadd.s32 1, %s5997_s30   ;;  %s322_s15 = int_to_ptr.vmem [resolvable:$true] %s321_s15 }
  0x25   : > { %5261 = dma.hbm_to_vmem [thread:$0]  (!%p6103_p6), %s320_s16, 1024, %s322_s15, [#allocation13], %s6001_s22, %s6001_s22, %s6002_s23  }
  0x26   : > { %s35_s20 = ssub.s32 %s5997_s30, %s6145_s18  ;;  %p46_p9 = scmp.eq.s32.totalorder %s5997_s30, 0 }
  0x27   : > { %p36_p7 = scmp.eq.s32.totalorder %s35_s20, 0  ;;  %p51_p10 = scmp.ne.s32.totalorder %s5989_s28, %s5985_s27 }
  0x28   : > { %p6158_p11 = por %p46_p9, %p45_p8  ;;  %p201_p13 = scmp.eq.s32.totalorder %s6086_s12, 1 }
  0x29   : > { %s6156_s24 = scalar_select %p36_p7, %s5993_s29, %s38_s21  }
  0x2a   : > { %p6164_p12 = por %p52_p1, %p51_p10  ;;  %p207_p0 = scmp.eq.s32.totalorder %s4796_s17, 1 }
  0x2b   : > { %p5279_p2 = scmp.lt.s32.totalorder %s5997_s30, 2  ;;  %s335_s23 = sand.u32 1, %s5993_s29  }
  0x2c   : > { %p6171_p5 = por %p201_p13, %p45_p8  ;;  %p6175_p6 = por %p207_p0, %p51_p10 }
  0x2d   : > { %s4805_s9 = sshll.u32 %s335_s23, 7  ;;  %s5130_s10 = sshll.u32 %s5997_s30, 7 }
  0x2e   : > { %s344_s11 = scalar_lea.hbm %s8852_s0, %s5130_s10  ;;  %s339_s15 = scalar_lea.vmem [#allocation3], %s4805_s9 }
  0x2f   : > { %s347_s20 = sshll.u32 %s339_s15, 4  ;;  %s345_s21 = sshll.u32 %s344_s11, 4  ;;  %s348_s20 = int_to_ptr.vmem [resolvable:$true] %s347_s20  ;;  %s346_s21 = int_to_ptr.hbm [resolvable:$true] %s345_s21 }
  0x30   : > { %p6185_p7 = pnand %p5279_p2, %p6158_p11  ;;  %s336_s1 = scalar_lea.sflag [#allocation4], %s335_s23 }
  0x31   : > { %s5857_s2 = sshra.s32 %s346_s21, 4  ;;  %s5864_s14 = scalar_lea.hbm %s8852_s0, 256  ;;  %s5858_s2 = int_to_ptr.hbm [resolvable:$true] %s5857_s2 }
  0x32   : > { %s5859_s3 = scalar_lea.hbm %s5858_s2, 128  ;;  %p5861_p9 = pneg %p6185_p7 }
  0x33   : > { %p5860_p8 = scmp.ne.s32.totalorder %s5858_s2, %s5859_s3  ;;  %p5865_p11 = scmp.lt.s32.totalorder %s5858_s2, %s8852_s0 }
  0x34   : > { %p5866_p0 = scmp.lt.s32.totalorder %s5864_s14, %s5859_s3 }
  0x35   : > { %p5862_p10 = pnand %p5861_p9, %p5860_p8 }
  0x36   : > { %p5867_p2 = por %p5866_p0, %p5865_p11 }
  0x37   : > { %p5863_p13 = pneg %p5862_p10 }
  0x39   : > { %p5868_p4 = pnand %p5867_p2, %p5863_p13 }
  0x3b   : > { %5871 = shalt.err (!%p5868_p4)
}
  0x3c   : > { %s6009_s23 = smov 128   ;;  %s6010_s11 = smov 8  }
  0x3d   : > { %5265 = dma.hbm_to_vmem [thread:$0]  (!%p6185_p7), %s346_s21, 2048, %s348_s20, %s336_s1, %s6009_s23, %s6009_s23, %s6010_s11  }
  0x3e   : > { %359 = sbr.rel (%p6091_p3) target bundleno = 2378 (0x94a), region = 48 }
  0x43   : > { %s6202_s15 = sand.u32 1, %s5989_s28  }
  0x44   : > { %s4809_s2 = sshll.u32 %s6202_s15, 7  ;;  %s362_s3 = scalar_lea.sflag [#allocation4], %s6202_s15 }
  0x45   : > { %s6208_s9 = scalar_lea.vmem [#allocation3], %s4809_s2 }
  0x46   : > { %5960 = dma.done.wait (%p6164_p12), %s362_s3, 2048  }
  0x47   : > { %5962 = vsyncadd (%p6164_p12), %s362_s3, 4294965248 }
  0x48   : > { %5964 = dma.done.wait (%p52_p1), [#allocation7], 3104  }
  0x49   : > { %5966 = vsyncadd (%p52_p1), [#allocation7], 4294964192 }
  0x4a   : > { %5968 = dma.done.wait (%p52_p1), [#allocation10], 2048  }
  0x4b   : > { %5970 = vsyncadd (%p52_p1), [#allocation10], 4294965248 }
  0x4c   : > { %5972 = dma.done.wait (%p52_p1), [#allocation13], 2048  }
  0x4d   : > { %5974 = vsyncadd (%p52_p1), [#allocation13], 4294965248  ;;  %v6227_v0 = vld [vmem:[%s6208_s9 + $0x40] sm:$0xff]  ;;  %v6230_v1 = vld [vmem:[%s6208_s9 + $0x10] sm:$0xff]  ;;  %v6011_v32 = vmov 128.0   ;;  %s6012_s1 = smov 96  }
  0x4e   : > { %v6233_v2 = vld [vmem:[%s6208_s9] sm:$0xff]  ;;  %v460_v3 = vmul.f32 %v6227_v0, %v6227_v0  ;;  %v454_v4 = vmul.f32 %v6230_v1, %v6230_v1  ;;  %v6242_v6 = vld [vmem:[%s6208_s9 + $0x48] sm:$0xff]  ;;  %v6245_v7 = vld [vmem:[%s6208_s9 + $0x18] sm:$0xff]  ;;  %5339 = vrcp.f32 %v6011_v32  ;;  %s6013_s13 = smov 64   ;;  %s6014_s22 = smov 32  }
  0x4f   : > { %v452_v5 = vmul.f32 %v6233_v2, %v6233_v2  ;;  %v6248_v8 = vld [vmem:[%s6208_s9 + $0x8] sm:$0xff]  ;;  %v461_v9 = vmul.f32 %v6242_v6, %v6242_v6  ;;  %v455_v10 = vmul.f32 %v6245_v7, %v6245_v7  ;;  %v6257_v12 = vld [vmem:[%s6208_s9 + $0x58] sm:$0xff]  ;;  %v6260_v13 = vld [vmem:[%s6208_s9 + $0x60] sm:$0xff]  ;;  %s4817_s20 = sshll.u32 %s6202_s15, 9  ;;  %s8763_s17 = scalar_lea.vmem [#allocation15], %s4809_s2 }
  0x50   : > { %484 = vadd.xlane.f32.xlu1 %v460_v3  ;;  %472 = vadd.xlane.f32.xlu2 %v454_v4  ;;  %v453_v11 = vmul.f32 %v6248_v8, %v6248_v8  ;;  %v6263_v14 = vld [vmem:[%s6208_s9 + $0x50] sm:$0xff]  ;;  %v463_v15 = vmul.f32 %v6257_v12, %v6257_v12  ;;  %v464_v16 = vmul.f32 %v6260_v13, %v6260_v13  ;;  %v6275_v19 = vld [vmem:[%s6208_s9 + $0x78] sm:$0xff]  ;;  %v6278_v20 = vld [vmem:[%s6208_s9 + $0x68] sm:$0xff]  ;;  %s7303_s21 = scalar_lea.vmem [#allocation16], %s4817_s20  ;;  %s5188_s10 = sshll.u32 %s6086_s12, 9 }
  0x51   : > { %468 = vadd.xlane.f32.xlu0 %v452_v5  ;;  %v462_v17 = vmul.f32 %v6263_v14, %v6263_v14  ;;  %v6272_v18 = vld [vmem:[%s6208_s9 + $0x70] sm:$0xff]  ;;  %v467_v22 = vmul.f32 %v6275_v19, %v6275_v19  ;;  %v465_v23 = vmul.f32 %v6278_v20, %v6278_v20  ;;  %v6287_v24 = vld [vmem:[%s6208_s9 + $0x28] sm:$0xff]  ;;  %v6293_v26 = vld [vmem:[%s6208_s9 + $0x20] sm:$0xff]  ;;  %s4630_s14 = sshll.u32 %s7303_s21, 4  ;;  %s4629_s23 = scalar_lea.hbm %s8860_s8, %s5188_s10  ;;  %s4631_s14 = int_to_ptr.vmem [resolvable:$true] %s4630_s14 }
  0x52   : > { %v466_v21 = vmul.f32 %v6272_v18, %v6272_v18  ;;  %v6290_v25 = vld [vmem:[%s6208_s9 + $0x30] sm:$0xff]  ;;  %v457_v27 = vmul.f32 %v6287_v24, %v6287_v24  ;;  %v456_v29 = vmul.f32 %v6293_v26, %v6293_v26  ;;  %v6302_v30 = vld [vmem:[%s6208_s9 + $0x38] sm:$0xff]  ;;  %v4904_v33 = vld [vmem:[#allocation8 + $0xa8] sm:$0xf]  ;;  %s4632_s11 = sshll.u32 %s4629_s23, 4  ;;  %s4601_s2 = scalar_lea.sflag [#allocation17], %s6202_s15  ;;  %s4633_s11 = int_to_ptr.hbm [resolvable:$true] %s4632_s11 }
  0x53   : > { %v458_v28 = vmul.f32 %v6290_v25, %v6290_v25  ;;  %v459_v31 = vmul.f32 %v6302_v30, %v6302_v30  ;;  %v5153_v34 = vld [vmem:[#allocation8 + $0xb0] sm:$0xf0]  ;;  %v5152_v35 = vld [vmem:[#allocation8 + $0xac] sm:$0xf]  ;;  %v4906_v37 = vld [vmem:[#allocation8 + $0xb4] sm:$0xf0] }
  0x54   : > { %v4905_v36 = vor.u32 %v5153_v34, %v4904_v33  ;;  %v4912_v38 = vld [vmem:[#allocation8 + $0xb0] sm:$0xf]  ;;  %v5154_v39 = vld [vmem:[#allocation8 + $0xb8] sm:$0xf0]  ;;  %v6306_v40 = vor.u32 %v5152_v35, %v4906_v37  ;;  %v6308_v42 = vpop.eup %5339  ;;  %v5149_v45 = vld [vmem:[#allocation8 + $0x94] sm:$0xf] }
  0x55   : > { %v4913_v41 = vor.u32 %v5154_v39, %v4912_v38  ;;  %v4892_v43 = vld [vmem:[#allocation8 + $0x90] sm:$0xf]  ;;  %v5150_v44 = vld [vmem:[#allocation8 + $0x98] sm:$0xf0]  ;;  %v4894_v47 = vld [vmem:[#allocation8 + $0x9c] sm:$0xf0]  ;;  %vm505_vm0 = vweird.f32 %v6308_v42 }
  0x56   : > { %900 = vmatpush.bf16.msra.mxu0 %v4905_v36  ;;  %5189 = vmatpush.bf16.msra.mxu3 %v4905_v36  ;;  %v4893_v46 = vor.u32 %v5150_v44, %v4892_v43  ;;  %v4900_v48 = vld [vmem:[#allocation8 + $0x98] sm:$0xf]  ;;  %v5151_v49 = vld [vmem:[#allocation8 + $0xa0] sm:$0xf0]  ;;  %v6311_v50 = vor.u32 %v5149_v45, %v4894_v47  ;;  %v501_v52 = vmul.f32 128.0, %v6308_v42  ;;  %s5901_s3 = sshra.s32 %s4633_s11, 4  ;;  %s5902_s3 = int_to_ptr.hbm [resolvable:$true] %s5901_s3 }
  0x57   : > { %5197 = vmatpush.bf16.msra.mxu1 %v6306_v40  ;;  %998 = vmatpush.bf16.msra.mxu2 %v4913_v41  ;;  %v4901_v51 = vor.u32 %v5151_v49, %v4900_v48  ;;  %v4880_v53 = vld [vmem:[#allocation8 + $0x78] sm:$0xf]  ;;  %v5147_v54 = vld [vmem:[#allocation8 + $0x80] sm:$0xf0]  ;;  %v5146_v55 = vld [vmem:[#allocation8 + $0x7c] sm:$0xf]  ;;  %p5908_p12 = scmp.lt.s32.totalorder %s5902_s3, %s8860_s8 }
  0x58   : > { %486 = vadd.xlane.f32.xlu1 %v461_v9  ;;  %474 = vadd.xlane.f32.xlu2 %v455_v10  ;;  %v4881_v56 = vor.u32 %v5147_v54, %v4880_v53  ;;  %v4882_v57 = vld [vmem:[#allocation8 + $0x84] sm:$0xf0]  ;;  %v4888_v58 = vld [vmem:[#allocation8 + $0x80] sm:$0xf]  ;;  %v5148_v59 = vld [vmem:[#allocation8 + $0x88] sm:$0xf0] }
  0x59   : > { %470 = vadd.xlane.f32.xlu0 %v453_v11  ;;  %v6315_v60 = vor.u32 %v5146_v55, %v4882_v57  ;;  %v4889_v61 = vor.u32 %v5148_v59, %v4888_v58  ;;  %v502_v62 = vsub.f32 1.0, %v501_v52  ;;  %v4868_v63 = vld [vmem:[#allocation8 + $0x60] sm:$0xf]  ;;  %v5144_v3 = vld [vmem:[#allocation8 + $0x68] sm:$0xf0] }
  0x5a   : > { %901 = vmatpush.bf16.msra.mxu0 %v4893_v46  ;;  %5190 = vmatpush.bf16.msra.mxu3 %v4893_v46  ;;  %v5143_v4 = vld [vmem:[#allocation8 + $0x64] sm:$0xf]  ;;  %v4869_v5 = vor.u32 %v5144_v3, %v4868_v63  ;;  %v4870_v9 = vld [vmem:[#allocation8 + $0x6c] sm:$0xf0]  ;;  %v4876_v10 = vld [vmem:[#allocation8 + $0x68] sm:$0xf] }
  0x5b   : > { %5198 = vmatpush.bf16.msra.mxu1 %v6311_v50  ;;  %999 = vmatpush.bf16.msra.mxu2 %v4901_v51  ;;  %v5145_v11 = vld [vmem:[#allocation8 + $0x70] sm:$0xf0]  ;;  %v4844_v35 = vld [vmem:[#allocation8 + $0x30] sm:$0xf]  ;;  %v5138_v36 = vld [vmem:[#allocation8 + $0x38] sm:$0xf0] }
  0x5c   : > { %v5137_v37 = vld [vmem:[#allocation8 + $0x34] sm:$0xf]  ;;  %v4845_v38 = vor.u32 %v5138_v36, %v4844_v35  ;;  %v4846_v39 = vld [vmem:[#allocation8 + $0x3c] sm:$0xf0]  ;;  %v4852_v41 = vld [vmem:[#allocation8 + $0x38] sm:$0xf] }
  0x5d   : > { %v5139_v43 = vld [vmem:[#allocation8 + $0x40] sm:$0xf0]  ;;  %v6330_v45 = vor.u32 %v5137_v37, %v4846_v39  ;;  %v4832_v49 = vld [vmem:[#allocation8 + $0x18] sm:$0xf]  ;;  %v5134_v52 = vld [vmem:[#allocation8 + $0x1c] sm:$0xf] }
  0x5e   : > { %902 = vmatpush.bf16.msra.mxu0 %v4881_v56  ;;  %5191 = vmatpush.bf16.msra.mxu3 %v4881_v56  ;;  %v4853_v46 = vor.u32 %v5139_v43, %v4852_v41  ;;  %v5135_v51 = vld [vmem:[#allocation8 + $0x20] sm:$0xf0]  ;;  %v4834_v56 = vld [vmem:[#allocation8 + $0x24] sm:$0xf0]  ;;  %v5136_v57 = vld [vmem:[#allocation8 + $0x28] sm:$0xf0] }
  0x5f   : > { %5199 = vmatpush.bf16.msra.mxu1 %v6315_v60  ;;  %1000 = vmatpush.bf16.msra.mxu2 %v4889_v61  ;;  %v4833_v55 = vor.u32 %v5135_v51, %v4832_v49  ;;  %v6335_v59 = vor.u32 %v5134_v52, %v4834_v56  ;;  %v4820_v3 = vld [vmem:[#allocation8] sm:$0xf] }
  0x60   : > { %490 = vadd.xlane.f32.xlu1 %v463_v15  ;;  %492 = vadd.xlane.f32.xlu2 %v464_v16  ;;  %v503_v15 = vmul.f32 %v6308_v42, %v502_v62  ;;  %v6319_v16 = vor.u32 %v5143_v4, %v4870_v9  ;;  %v5132_v4 = vld [vmem:[#allocation8 + $0x8] sm:$0xf0]  ;;  %v5131_v9 = vld [vmem:[#allocation8 + $0x4] sm:$0xf] }
  0x61   : > { %488 = vadd.xlane.f32.xlu0 %v462_v17  ;;  %v4877_v17 = vor.u32 %v5145_v11, %v4876_v10  ;;  %v4822_v10 = vld [vmem:[#allocation8 + $0xc] sm:$0xf0]  ;;  %v4828_v11 = vld [vmem:[#allocation8 + $0x8] sm:$0xf] }
  0x62   : > { %903 = vmatpush.bf16.msra.mxu0 %v4869_v5  ;;  %5192 = vmatpush.bf16.msra.mxu3 %v4869_v5  ;;  %v504_v32 = vadd.f32 %v6308_v42, %v503_v15  ;;  %v4821_v5 = vor.u32 %v5132_v4, %v4820_v3 }
  0x63   : > { %5200 = vmatpush.bf16.msra.mxu1 %v6319_v16  ;;  %1001 = vmatpush.bf16.msra.mxu2 %v4877_v17  ;;  %v6344_v17 = vor.u32 %v5131_v9, %v4822_v10 }
  0x64   : > { %v6328_v44 = vsel %vm505_vm0, %v6308_v42, %v504_v32  ;;  %v4840_v42 = vld [vmem:[#allocation8 + $0x20] sm:$0xf] }
  0x65   : > { %8888 = vst [vmem:[#allocation24_spill] sm:$0xff] %v6328_v44  ;;  %v4841_v61 = vor.u32 %v5136_v57, %v4840_v42 }
  0x68   : > { %496 = vadd.xlane.f32.xlu1 %v466_v21  ;;  %498 = vadd.xlane.f32.xlu2 %v467_v22  ;;  %v4856_v21 = vld [vmem:[#allocation8 + $0x48] sm:$0xf]  ;;  %v5141_v22 = vld [vmem:[#allocation8 + $0x50] sm:$0xf0] }
  0x69   : > { %494 = vadd.xlane.f32.xlu0 %v465_v23  ;;  %v5140_v23 = vld [vmem:[#allocation8 + $0x4c] sm:$0xf] }
  0x70   : > { %478 = vadd.xlane.f32.xlu1 %v457_v27  ;;  %480 = vadd.xlane.f32.xlu2 %v458_v28  ;;  %v4857_v27 = vor.u32 %v5141_v22, %v4856_v21  ;;  %v4858_v28 = vld [vmem:[#allocation8 + $0x54] sm:$0xf0]  ;;  %v5133_v21 = vld [vmem:[#allocation8 + $0x10] sm:$0xf0] }
  0x71   : > { %476 = vadd.xlane.f32.xlu0 %v456_v29  ;;  %v4864_v29 = vld [vmem:[#allocation8 + $0x50] sm:$0xf]  ;;  %v6323_v33 = vor.u32 %v5140_v23, %v4858_v28  ;;  %v4829_v22 = vor.u32 %v5133_v21, %v4828_v11 }
  0x72   : > { %904 = vmatpush.bf16.msra.mxu0 %v4857_v27  ;;  %5193 = vmatpush.bf16.msra.mxu3 %v4857_v27 }
  0x73   : > { %5201 = vmatpush.bf16.msra.mxu1 %v6323_v33 }
  0x76   : > { %905 = vmatpush.bf16.msra.mxu0 %v4845_v38  ;;  %5194 = vmatpush.bf16.msra.mxu3 %v4845_v38 }
  0x77   : > { %5202 = vmatpush.bf16.msra.mxu1 %v6330_v45 }
  0x79   : > { %482 = vadd.xlane.f32.xlu0 %v459_v31  ;;  %v5142_v31 = vld [vmem:[#allocation8 + $0x58] sm:$0xf0] }
  0x7a   : > { %v4865_v34 = vor.u32 %v5142_v31, %v4864_v29  ;;  %906 = vmatpush.bf16.msra.mxu0 %v4833_v55  ;;  %5195 = vmatpush.bf16.msra.mxu3 %v4833_v55 }
  0x7b   : > { %5203 = vmatpush.bf16.msra.mxu1 %v6335_v59 }
  0x7c   : > { %1002 = vmatpush.bf16.msra.mxu2 %v4865_v34 }
  0x7e   : > { %907 = vmatpush.bf16.msra.mxu0 %v4821_v5  ;;  %5196 = vmatpush.bf16.msra.mxu3 %v4821_v5 }
  0x7f   : > { %5204 = vmatpush.bf16.msra.mxu1 %v6344_v17 }
  0x80   : > { %1003 = vmatpush.bf16.msra.mxu2 %v4853_v46 }
  0x82   : > { %949 = vmatpush.bf16.msrb.mxu0 %v6306_v40 }
  0x84   : > { %1004 = vmatpush.bf16.msra.mxu2 %v4841_v61 }
  0x86   : > { %950 = vmatpush.bf16.msrb.mxu0 %v6311_v50 }
  0x88   : > { %1005 = vmatpush.bf16.msra.mxu2 %v4829_v22 }
  0x8a   : > { %951 = vmatpush.bf16.msrb.mxu0 %v6315_v60 }
  0x8e   : > { %952 = vmatpush.bf16.msrb.mxu0 %v6319_v16 }
  0x92   : > { %953 = vmatpush.bf16.msrb.mxu0 %v6323_v33 }
  0x96   : > { %954 = vmatpush.bf16.msrb.mxu0 %v6330_v45 }
  0x9a   : > { %955 = vmatpush.bf16.msrb.mxu0 %v6335_v59 }
  0x9e   : > { %956 = vmatpush.bf16.msrb.mxu0 %v6344_v17 }
  0xc3   : > { %v485_v47 = vpop.xlane.xlu1 %484  ;;  %v473_v48 = vpop.xlane.xlu2 %472 }
  0xc4   : > { %v515_v53 = vmul.f32 %v6328_v44, %v485_v47  ;;  %v469_v54 = vpop.xlane.xlu0 %468  ;;  %v509_v15 = vmul.f32 %v6328_v44, %v473_v48 }
  0xc5   : > { %v507_v58 = vmul.f32 %v6328_v44, %v469_v54 }
  0xc6   : > { %v6337_v62 = vadd.f32 1e-06, %v515_v53  ;;  %v6351_v32 = vadd.f32 1e-06, %v509_v15 }
  0xc7   : > { %v6339_v63 = vadd.f32 1e-06, %v507_v58 }
  0xc8   : > { %5341 = vrsqrt.f32 %v6337_v62  ;;  %vm625_vm9 = vweird.f32 %v6337_v62  ;;  %vm565_vm13 = vweird.f32 %v6351_v32 }
  0xc9   : > { %5343 = vrsqrt.f32 %v6339_v63  ;;  %vm545_vm2 = vweird.f32 %v6339_v63 }
  0xcb   : > { %v487_v23 = vpop.xlane.xlu1 %486  ;;  %v475_v27 = vpop.xlane.xlu2 %474 }
  0xcc   : > { %v516_v28 = vmul.f32 %v6328_v44, %v487_v23  ;;  %v510_v29 = vmul.f32 %v6328_v44, %v475_v27  ;;  %v471_v31 = vpop.xlane.xlu0 %470 }
  0xcd   : > { %v508_v34 = vmul.f32 %v6328_v44, %v471_v31 }
  0xce   : > { %v6354_v35 = vpop.eup %5341  ;;  %v6356_v36 = vadd.f32 1e-06, %v516_v28  ;;  %v6358_v37 = vadd.f32 1e-06, %v510_v29 }
  0xcf   : > { %v6360_v38 = vadd.f32 1e-06, %v508_v34  ;;  %v6363_v40 = vpop.eup %5343  ;;  %v620_v39 = vmul.f32 %v6354_v35, %v6337_v62  ;;  %vm626_vm4 = vweird.f32 %v6354_v35 }
  0xd0   : > { %5345 = vrsqrt.f32 %v6356_v36  ;;  %v540_v41 = vmul.f32 %v6363_v40, %v6339_v63  ;;  %vm546_vm1 = vweird.f32 %v6363_v40  ;;  %vm635_vm10 = vweird.f32 %v6356_v36  ;;  %vm6451_vm11 = vmor %vm625_vm9, %vm626_vm4 }
  0xd1   : > { %5347 = vrsqrt.f32 %v6351_v32  ;;  %v621_v50 = vmul.f32 %v6354_v35, %v620_v39  ;;  %vm6420_vm5 = vmor %vm545_vm2, %vm546_vm1  ;;  %vm555_vm6 = vweird.f32 %v6360_v38  ;;  %vm575_vm15 = vweird.f32 %v6358_v37 }
  0xd2   : > { %5349 = vrsqrt.f32 %v6360_v38  ;;  %v541_v43 = vmul.f32 %v6363_v40, %v540_v41 }
  0xd3   : > { %5351 = vrsqrt.f32 %v6358_v37  ;;  %v491_v46 = vpop.xlane.xlu1 %490  ;;  %v622_v56 = vmul.f32 0.5, %v621_v50  ;;  %v493_v42 = vpop.xlane.xlu2 %492 }
  0xd4   : > { %v518_v47 = vmul.f32 %v6328_v44, %v491_v46  ;;  %v489_v48 = vpop.xlane.xlu0 %488  ;;  %v542_v49 = vmul.f32 0.5, %v541_v43  ;;  %v519_v4 = vmul.f32 %v6328_v44, %v493_v42 }
  0xd5   : > { %v517_v55 = vmul.f32 %v6328_v44, %v489_v48  ;;  %v623_v15 = vsub.f32 1.5, %v622_v56 }
  0xd6   : > { %v6377_v51 = vpop.eup %5345  ;;  %v6379_v52 = vadd.f32 1e-06, %v518_v47  ;;  %v543_v58 = vsub.f32 1.5, %v542_v49  ;;  %v6406_v28 = vadd.f32 1e-06, %v519_v4 }
  0xd7   : > { %v6381_v53 = vpop.eup %5347  ;;  %v630_v54 = vmul.f32 %v6377_v51, %v6356_v36  ;;  %v6399_v10 = vadd.f32 1e-06, %v517_v55  ;;  %v624_v41 = vmul.f32 %v6354_v35, %v623_v15  ;;  %vm636_vm7 = vweird.f32 %v6377_v51 }
  0xd8   : > { %v6387_v60 = vpop.eup %5349  ;;  %5353 = vrsqrt.f32 %v6379_v52  ;;  %v560_v5 = vmul.f32 %v6381_v53, %v6351_v32  ;;  %v544_v23 = vmul.f32 %v6363_v40, %v543_v58  ;;  %vm6461_vm12 = vmor %vm635_vm10, %vm636_vm7  ;;  %vm566_vm14 = vweird.f32 %v6381_v53 }
  0xd9   : > { %v6390_v57 = vpop.eup %5351  ;;  %v631_v61 = vmul.f32 %v6377_v51, %v630_v54  ;;  %v550_v3 = vmul.f32 %v6387_v60, %v6360_v38  ;;  %5355 = vrsqrt.f32 %v6399_v10  ;;  %vm556_vm3 = vweird.f32 %v6387_v60  ;;  %vm6509_vm1 = vmor %vm565_vm13, %vm566_vm14 }
  0xda   : > { %v570_v21 = vmul.f32 %v6390_v57, %v6358_v37  ;;  %v561_v33 = vmul.f32 %v6381_v53, %v560_v5  ;;  %5357 = vrsqrt.f32 %v6406_v28  ;;  %v548_v45 = vsel %vm6420_vm5, %v6363_v40, %v544_v23  ;;  %vm6435_vm8 = vmor %vm555_vm6, %vm556_vm3 }
  0xdb   : > { %v632_v16 = vmul.f32 0.5, %v631_v61  ;;  %v551_v9 = vmul.f32 %v6387_v60, %v550_v3  ;;  %v497_v11 = vpop.xlane.xlu1 %496  ;;  %v499_v55 = vpop.xlane.xlu2 %498  ;;  %v699_v3 = vmul.f32 %v548_v45, %v6233_v2  ;;  %vm576_vm0 = vweird.f32 %v6390_v57 }
  0xdc   : > { %v495_v22 = vpop.xlane.xlu0 %494  ;;  %v571_v46 = vmul.f32 %v6390_v57, %v570_v21  ;;  %v562_v54 = vmul.f32 0.5, %v561_v33  ;;  %v521_v36 = vmul.f32 %v6328_v44, %v497_v11  ;;  %v6474_v11 = vld [vmem:[#allocation6] ss:$0 sm:$0xff]  ;;  %vm6516_vm2 = vmor %vm575_vm15, %vm576_vm0  ;;  %vm655_vm5 = vweird.f32 %v6379_v52 }
  0xdd   : > { %v552_v27 = vmul.f32 0.5, %v551_v9  ;;  %v633_v31 = vsub.f32 1.5, %v632_v16  ;;  %v520_v34 = vmul.f32 %v6328_v44, %v495_v22  ;;  %v628_v16 = vsel %vm6451_vm11, %v6354_v35, %v624_v41 }
  0xde   : > { %v6409_v29 = vpop.eup %5353  ;;  %v572_v58 = vmul.f32 0.5, %v571_v46  ;;  %v563_v22 = vsub.f32 1.5, %v562_v54  ;;  %v6493_v41 = vadd.f32 1e-06, %v521_v36  ;;  %v716_v17 = vmul.f32 %v6474_v11, %v699_v3 }
  0xdf   : > { %v553_v39 = vsub.f32 1.5, %v552_v27  ;;  %v650_v50 = vmul.f32 %v6409_v29, %v6379_v52  ;;  %v634_v47 = vmul.f32 %v6377_v51, %v633_v31  ;;  %v6439_v38 = vadd.f32 1e-06, %v520_v34  ;;  %v6441_v49 = vpop.eup %5355 }
  0xe0   : > { %v640_v62 = vmul.f32 %v6441_v49, %v6399_v10  ;;  %v6479_v21 = vpop.eup %5357  ;;  %v573_v31 = vsub.f32 1.5, %v572_v58  ;;  %vm656_vm3 = vweird.f32 %v6409_v29  ;;  %v522_v58 = vmul.f32 %v6328_v44, %v499_v55 }
  0xe1   : > { %v554_v63 = vmul.f32 %v6387_v60, %v553_v39  ;;  %v651_v59 = vmul.f32 %v6409_v29, %v650_v50  ;;  %5359 = vrsqrt.f32 %v6439_v38  ;;  %v638_v15 = vsel %vm6461_vm12, %v6377_v51, %v634_v47 }
  0xe2   : > { %v641_v9 = vmul.f32 %v6441_v49, %v640_v62  ;;  %v707_v51 = vmul.f32 %v628_v16, %v6227_v0  ;;  %v708_v33 = vmul.f32 %v638_v15, %v6242_v6  ;;  %v660_v39 = vmul.f32 %v6479_v21, %v6406_v28 }
  0xe3   : > { %v479_v56 = vpop.xlane.xlu1 %478  ;;  %v558_v40 = vsel %vm6435_vm8, %v6387_v60, %v554_v63  ;;  %v652_v34 = vmul.f32 0.5, %v651_v59  ;;  %v481_v43 = vpop.xlane.xlu2 %480  ;;  %v564_v0 = vmul.f32 %v6381_v53, %v563_v22  ;;  %v574_v37 = vmul.f32 %v6390_v57, %v573_v31  ;;  %vm657_vm8 = vmor %vm655_vm5, %vm656_vm3 }
  0xe4   : > { %v477_v61 = vpop.xlane.xlu0 %476  ;;  %v512_v4 = vmul.f32 %v6328_v44, %v479_v56  ;;  %v700_v2 = vmul.f32 %v558_v40, %v6248_v8  ;;  %v642_v35 = vmul.f32 0.5, %v641_v9  ;;  %v724_v48 = vmul.f32 %v6474_v11, %v707_v51 }
  0xe5   : > { %v511_v5 = vmul.f32 %v6328_v44, %v477_v61  ;;  %v653_v47 = vsub.f32 1.5, %v652_v34  ;;  %v725_v54 = vmul.f32 %v6474_v11, %v708_v33  ;;  %v661_v40 = vmul.f32 %v6479_v21, %v660_v39 }
  0xe6   : > { %v6484_v23 = vadd.f32 1e-06, %v512_v4  ;;  %v717_v8 = vmul.f32 %v6474_v11, %v700_v2  ;;  %v643_v63 = vsub.f32 1.5, %v642_v35  ;;  %v513_v32 = vmul.f32 %v6328_v44, %v481_v43 }
  0xe7   : > { %v6486_v27 = vadd.f32 1e-06, %v511_v5  ;;  %v6499_v46 = vpop.eup %5359  ;;  %v6530_v36 = vpack.c.bf16 %v725_v54, %v724_v48  ;;  %vm646_vm4 = vweird.f32 %v6441_v49  ;;  %v654_v4 = vmul.f32 %v6409_v29, %v653_v47 }
  0xe8   : > { %5361 = vrsqrt.f32 %v6484_v23  ;;  %v6503_v6 = vpack.c.bf16 %v717_v8, %v716_v17  ;;  %v670_v62 = vmul.f32 %v6499_v46, %v6439_v38  ;;  %v644_v3 = vmul.f32 %v6441_v49, %v643_v63 }
  0xe9   : > { %5363 = vrsqrt.f32 %v6486_v27  ;;  %v6536_v60 = vadd.f32 1e-06, %v513_v32  ;;  %977 = vmatmul.bf16.vlgmr.msra.gmra.mxu1 %v6530_v36  ;;  %v568_v5 = vsel %vm6509_vm1, %v6381_v53, %v564_v0  ;;  %v578_v16 = vsel %vm6516_vm2, %v6390_v57, %v574_v37 }
  0xea   : > { %5365 = vrsqrt.f32 %v6493_v41  ;;  %908 = vmatmul.bf16.vlgmr.msra.gmra.mxu0 %v6503_v6  ;;  %1006 = vmatmul.bf16.vlgmr.msra.gmra.mxu2 %v6503_v6  ;;  %v662_v2 = vmul.f32 0.5, %v661_v40  ;;  %vm645_vm6 = vweird.f32 %v6399_v10  ;;  %v6559_v22 = vadd.f32 1e-06, %v522_v58 }
  0xeb   : > { %5367 = vrsqrt.f32 %v6536_v60  ;;  %vm6555_vm7 = vmor %vm645_vm6, %vm646_vm4  ;;  %v671_v53 = vmul.f32 %v6499_v46, %v670_v62  ;;  %v701_v52 = vmul.f32 %v568_v5, %v6230_v1  ;;  %v702_v10 = vmul.f32 %v578_v16, %v6245_v7 }
  0xec   : > { %v483_v50 = vpop.xlane.xlu0 %482  ;;  %v648_v31 = vsel %vm6555_vm7, %v6441_v49, %v644_v3  ;;  %vm665_vm9 = vweird.f32 %v6406_v28  ;;  %v658_v33 = vsel %vm657_vm8, %v6409_v29, %v654_v4  ;;  %v663_v39 = vsub.f32 1.5, %v662_v2 }
  0xed   : > { %v514_v42 = vmul.f32 %v6328_v44, %v483_v50  ;;  %vm666_vm10 = vweird.f32 %v6479_v21  ;;  %v709_v17 = vmul.f32 %v648_v31, %v6263_v14  ;;  %v710_v1 = vmul.f32 %v658_v33, %v6257_v12 }
  0xee   : > { %v6532_v61 = vpop.eup %5361  ;;  %v672_v63 = vmul.f32 0.5, %v671_v53  ;;  %v718_v29 = vmul.f32 %v6474_v11, %v701_v52  ;;  %v719_v50 = vmul.f32 %v6474_v11, %v702_v10  ;;  %v664_v47 = vmul.f32 %v6479_v21, %v663_v39  ;;  %vm6621_vm5 = vmor %vm665_vm9, %vm666_vm10 }
  0xef   : > { %v6538_v59 = vadd.f32 1e-06, %v514_v42  ;;  %v590_v55 = vmul.f32 %v6532_v61, %v6484_v23  ;;  %v6550_v9 = vpop.eup %5363  ;;  %vm596_vm11 = vweird.f32 %v6532_v61  ;;  %vm595_vm13 = vweird.f32 %v6484_v23 }
  0xf0   : > { %v580_v57 = vmul.f32 %v6550_v9, %v6486_v27  ;;  %v6565_v8 = vpop.eup %5365  ;;  %vm586_vm12 = vweird.f32 %v6550_v9  ;;  %v726_v48 = vmul.f32 %v6474_v11, %v709_v17  ;;  %v727_v54 = vmul.f32 %v6474_v11, %v710_v1  ;;  %vm597_vm14 = vmor %vm595_vm13, %vm596_vm11 }
  0xf1   : > { %v591_v35 = vmul.f32 %v6532_v61, %v590_v55  ;;  %5369 = vrsqrt.f32 %v6538_v59  ;;  %v680_v7 = vmul.f32 %v6565_v8, %v6493_v41  ;;  %v6584_v0 = vpop.eup %5367  ;;  %vm585_vm15 = vweird.f32 %v6486_v27 }
  0xf2   : > { %v581_v51 = vmul.f32 %v6550_v9, %v580_v57  ;;  %5371 = vrsqrt.f32 %v6559_v22  ;;  %v600_v12 = vmul.f32 %v6584_v0, %v6536_v60  ;;  %v673_v42 = vsub.f32 1.5, %v672_v63  ;;  %vm587_vm0 = vmor %vm585_vm15, %vm586_vm12 }
  0xf3   : > { %v592_v34 = vmul.f32 0.5, %v591_v35  ;;  %vm605_vm1 = vweird.f32 %v6536_v60  ;;  %v6602_v58 = vpack.c.bf16 %v719_v50, %v718_v29  ;;  %vm606_vm2 = vweird.f32 %v6584_v0 }
  0xf4   : > { %v582_v43 = vmul.f32 0.5, %v581_v51  ;;  %v601_v40 = vmul.f32 %v6584_v0, %v600_v12  ;;  %vm615_vm3 = vweird.f32 %v6538_v59  ;;  %v6612_v5 = vpack.c.bf16 %v727_v54, %v726_v48  ;;  %vm6635_vm7 = vmor %vm605_vm1, %vm606_vm2 }
  0xf5   : > { %v593_v49 = vsub.f32 1.5, %v592_v34  ;;  %v674_v53 = vmul.f32 %v6499_v46, %v673_v42  ;;  %vm676_vm6 = vweird.f32 %v6499_v46  ;;  %vm675_vm8 = vweird.f32 %v6439_v38 }
  0xf6   : > { %v583_v45 = vsub.f32 1.5, %v582_v43  ;;  %v602_v3 = vmul.f32 0.5, %v601_v40  ;;  %vm677_vm10 = vmor %vm675_vm8, %vm676_vm6  ;;  %v681_v60 = vmul.f32 %v6565_v8, %v680_v7  ;;  %v668_v51 = vsel %vm6621_vm5, %v6479_v21, %v664_v47 }
  0xf7   : > { %v594_v14 = vmul.f32 %v6532_v61, %v593_v49  ;;  %v5370_v37 = vpop.eup %5369  ;;  %v678_v38 = vsel %vm677_vm10, %v6499_v46, %v674_v53  ;;  %v711_v39 = vmul.f32 %v668_v51, %v6260_v13  ;;  %vm695_vm11 = vweird.f32 %v6559_v22 }
  0xf8   : > { %v584_v56 = vmul.f32 %v6550_v9, %v583_v45  ;;  %v610_v32 = vmul.f32 %v5370_v37, %v6538_v59  ;;  %v6605_v62 = vpop.eup %5371  ;;  %v603_v16 = vsub.f32 1.5, %v602_v3  ;;  %vm616_vm4 = vweird.f32 %v5370_v37 }
  0xf9   : > { %v598_v23 = vsel %vm597_vm14, %v6532_v61, %v594_v14  ;;  %982 = vmatmul.bf16.gmra.mxu1 %v6612_v5  ;;  %vm6643_vm9 = vmor %vm615_vm3, %vm616_vm4  ;;  %v712_v17 = vmul.f32 %v678_v38, %v6278_v20  ;;  %v682_v1 = vmul.f32 0.5, %v681_v60  ;;  %v728_v21 = vmul.f32 %v6474_v11, %v711_v39 }
  0xfa   : > { %v611_v4 = vmul.f32 %v5370_v37, %v610_v32  ;;  %v588_v55 = vsel %vm587_vm0, %v6550_v9, %v584_v56  ;;  %v704_v27 = vmul.f32 %v598_v23, %v6287_v24  ;;  %913 = vmatmul.bf16.gmra.mxu0 %v6602_v58  ;;  %1011 = vmatmul.bf16.gmra.mxu2 %v6602_v58  ;;  %vm696_vm12 = vweird.f32 %v6605_v62 }
  0xfb   : > { %v703_v61 = vmul.f32 %v588_v55, %v6293_v26  ;;  %v690_v9 = vmul.f32 %v6605_v62, %v6559_v22  ;;  %v604_v35 = vmul.f32 %v6584_v0, %v603_v16  ;;  %v729_v46 = vmul.f32 %v6474_v11, %v712_v17  ;;  %vm697_vm14 = vmor %vm695_vm11, %vm696_vm12 }
  0xfc   : > { %v612_v2 = vmul.f32 0.5, %v611_v4  ;;  %v721_v15 = vmul.f32 %v6474_v11, %v704_v27  ;;  %v683_v63 = vsub.f32 1.5, %v682_v1  ;;  %vm686_vm13 = vweird.f32 %v6565_v8 }
  0xfd   : > { %v720_v26 = vmul.f32 %v6474_v11, %v703_v61  ;;  %v691_v34 = vmul.f32 %v6605_v62, %v690_v9  ;;  %v608_v59 = vsel %vm6635_vm7, %v6584_v0, %v604_v35  ;;  %v738_v13 = vpack.c.bf16 %v729_v46, %v728_v21 }
  0xfe   : > { %v613_v57 = vsub.f32 1.5, %v612_v2  ;;  %v705_v49 = vmul.f32 %v608_v59, %v6290_v25  ;;  %v684_v20 = vmul.f32 %v6565_v8, %v683_v63  ;;  %vm685_vm15 = vweird.f32 %v6493_v41 }
  0xff   : > { %v734_v10 = vpack.c.bf16 %v721_v15, %v720_v26  ;;  %v692_v7 = vmul.f32 0.5, %v691_v34  ;;  %vm687_vm0 = vmor %vm685_vm15, %vm686_vm13  ;;  %vm1063_vm1 = vcmask 261120  }
 0x100   : > { %v614_v31 = vmul.f32 %v5370_v37, %v613_v57  ;;  %v722_v0 = vmul.f32 %v6474_v11, %v705_v49  ;;  %v688_v22 = vsel %vm687_vm0, %v6565_v8, %v684_v20 }
 0x101   : > { %918 = vmatmul.bf16.vlgmr.msra.gmra.mxu3 %v734_v10  ;;  %v693_v29 = vsub.f32 1.5, %v692_v7 }
 0x102   : > { %v618_v33 = vsel %vm6643_vm9, %v5370_v37, %v614_v31 }
 0x103   : > { %v706_v43 = vmul.f32 %v618_v33, %v6302_v30  ;;  %v694_v25 = vmul.f32 %v6605_v62, %v693_v29 }
 0x105   : > { %v723_v50 = vmul.f32 %v6474_v11, %v706_v43  ;;  %v698_v14 = vsel %vm697_vm14, %v6605_v62, %v694_v25 }
 0x106   : > { %v714_v45 = vmul.f32 %v698_v14, %v6275_v19 }
 0x107   : > { %v735_v30 = vpack.c.bf16 %v723_v50, %v722_v0 }
 0x108   : > { %v731_v37 = vmul.f32 %v6474_v11, %v714_v45 }
 0x109   : > { %987 = vmatmul.bf16.gmra.mxu1 %v738_v13 }
 0x10a   : > { %957 = vmatmul.bf16.vlgmr.msrb.gmra.mxu0 %v6503_v6  ;;  %1016 = vmatmul.bf16.gmra.mxu2 %v734_v10  ;;  %v713_v6 = vmul.f32 %v688_v22, %v6272_v18 }
 0x10c   : > { %v730_v12 = vmul.f32 %v6474_v11, %v713_v6 }
 0x10e   : > { %v739_v47 = vpack.c.bf16 %v731_v37, %v730_v12 }
 0x111   : > { %923 = vmatmul.bf16.gmra.mxu3 %v735_v30 }
 0x119   : > { %992 = vmatmul.bf16.gmra.mxu1 %v739_v47 }
 0x11a   : > { %962 = vmatmul.bf16.gmra.mxu0 %v6602_v58  ;;  %1021 = vmatmul.bf16.gmra.mxu2 %v735_v30 }
 0x121   : > { %928 = vmatmul.bf16.gmra.mxu3 %v6530_v36 }
 0x12a   : > { %967 = vmatmul.bf16.gmra.mxu0 %v734_v10  ;;  %1026 = vmatmul.bf16.gmra.mxu2 %v6530_v36 }
 0x131   : > { %933 = vmatmul.bf16.gmra.mxu3 %v6612_v5 }
 0x13a   : > { %972 = vmatmul.bf16.gmra.mxu0 %v735_v30  ;;  %1031 = vmatmul.bf16.gmra.mxu2 %v6612_v5 }
 0x141   : > { %938 = vmatmul.bf16.gmra.mxu3 %v738_v13 }
 0x14a   : > { %1036 = vmatmul.bf16.gmra.mxu2 %v738_v13 }
 0x151   : > { %943 = vmatmul.bf16.gmra.mxu3 %v739_v47 }
 0x15a   : > { %1041 = vmatmul.bf16.gmra.mxu2 %v739_v47 }
 0x166   : > { %v978_v19 = vpop.f32.mrf.mxu1 }
 0x167   : > { %v909_v18 = vpop.f32.mrf.mxu0 }
 0x16d   : > { %v6684_v11 = vpop.f32.mrf.mxu2 }
 0x16e   : > { %v980_v48 = vpop.f32.mrf.mxu1 }
 0x16f   : > { %v911_v41 = vpop.f32.mrf.mxu0  ;;  %v6690_v36 = vpack.c.bf16 %v980_v48, %v978_v19 }
 0x170   : > { %v6686_v8 = vpack.c.bf16 %v911_v41, %v909_v18 }
 0x171   : > { %1682 = vrot.lane.b32.xlu2 %v6690_v36, %s6012_s1  ;;  %v1101_v50 = vsel %vm1063_vm1, %v6690_v36, 0 }
 0x172   : > { %1650 = vrot.lane.b32.xlu0 %v6686_v8, %s6012_s1 }
 0x175   : > { %v6694_v54 = vpop.f32.mrf.mxu2 }
 0x176   : > { %v983_v40 = vpop.f32.mrf.mxu1 }
 0x177   : > { %v914_v56 = vpop.f32.mrf.mxu0 }
 0x179   : > { %3074 = vrot.lane.b32.xlu2 %v6690_v36, %s6014_s22 }
 0x17a   : > { %2382 = vrot.lane.b32.xlu0 %v6690_v36, %s6013_s13 }
 0x17d   : > { %v6700_v32 = vpop.f32.mrf.mxu2 }
 0x17e   : > { %v985_v58 = vpop.f32.mrf.mxu1 }
 0x17f   : > { %v916_v42 = vpop.f32.mrf.mxu0  ;;  %v1060_v4 = vpack.c.bf16 %v985_v58, %v983_v40 }
 0x180   : > { %v6718_v24 = vpack.c.bf16 %v916_v42, %v914_v56 }
 0x181   : > { %3050 = vrot.lane.b32.xlu2 %v6686_v8, %s6014_s22  ;;  %v1104_v43 = vsel %vm1063_vm1, %v1060_v4, 0 }
 0x182   : > { %2358 = vrot.lane.b32.xlu0 %v6686_v8, %s6013_s13 }
 0x184   : > { %v919_v23 = vpop.f32.mrf.mxu3 }
 0x185   : > { %v6706_v62 = vpop.f32.mrf.mxu2 }
 0x186   : > { %v988_v55 = vpop.f32.mrf.mxu1 }
 0x187   : > { %v958_v3 = vpop.f32.mrf.mxu0 }
 0x18a   : > { %1684 = vrot.lane.b32.xlu0 %v1060_v4, %s6012_s1 }
 0x18c   : > { %v921_v27 = vpop.f32.mrf.mxu3 }
 0x18d   : > { %v6709_v5 = vpack.c.bf16 %v921_v27, %v919_v23  ;;  %v6711_v61 = vpop.f32.mrf.mxu2 }
 0x18e   : > { %v990_v2 = vpop.f32.mrf.mxu1 }
 0x18f   : > { %1654 = vrot.lane.b32.xlu1 %v6709_v5, %s6012_s1  ;;  %2362 = vrot.lane.b32.xlu2 %v6709_v5, %s6013_s13  ;;  %v960_v16 = vpop.f32.mrf.mxu0  ;;  %v1061_v28 = vpack.c.bf16 %v990_v2, %v988_v55  ;;  %v6813_v55 = vpack.c.bf16 %v6694_v54, %v6684_v11 }
 0x190   : > { %v1055_v51 = vpack.c.bf16 %v960_v16, %v958_v3 }
 0x191   : > { %v1107_v39 = vsel %vm1063_vm1, %v1061_v28, 0 }
 0x192   : > { %2384 = vrot.lane.b32.xlu0 %v1060_v4, %s6013_s13  ;;  %v1089_v56 = vsel %vm1063_vm1, %v1055_v51, 0 }
 0x194   : > { %v924_v15 = vpop.f32.mrf.mxu3 }
 0x195   : > { %v6720_v9 = vpop.f32.mrf.mxu2 }
 0x196   : > { %v993_v26 = vpop.f32.mrf.mxu1  ;;  %v1571_v42 = vpack.c.bf16 %v6720_v9, %v6711_v61 }
 0x197   : > { %3076 = vrot.lane.b32.xlu1 %v1060_v4, %s6014_s22  ;;  %1652 = vrot.lane.b32.xlu2 %v6718_v24, %s6012_s1  ;;  %v963_v53 = vpop.f32.mrf.mxu0 }
 0x19a   : > { %3052 = vrot.lane.b32.xlu0 %v6718_v24, %s6014_s22 }
 0x19c   : > { %v926_v35 = vpop.f32.mrf.mxu3 }
 0x19d   : > { %v6727_v57 = vpop.f32.mrf.mxu2  ;;  %v6732_v10 = vpack.c.bf16 %v926_v35, %v924_v15 }
 0x19e   : > { %v995_v31 = vpop.f32.mrf.mxu1 }
 0x19f   : > { %2360 = vrot.lane.b32.xlu1 %v6718_v24, %s6013_s13  ;;  %1686 = vrot.lane.b32.xlu2 %v1061_v28, %s6012_s1  ;;  %v965_v52 = vpop.f32.mrf.mxu0  ;;  %v1062_v60 = vpack.c.bf16 %v995_v31, %v993_v26  ;;  %v1570_v26 = vpack.c.bf16 %v6706_v62, %v6700_v32 }
 0x1a0   : > { %v1056_v49 = vpack.c.bf16 %v965_v52, %v963_v53 }
 0x1a1   : > { %v1110_v38 = vsel %vm1063_vm1, %v1062_v60, 0 }
 0x1a2   : > { %1656 = vrot.lane.b32.xlu0 %v6732_v10, %s6012_s1  ;;  %1112 = vmatpush.bf16.xpose.msrb.mxu3 %v1110_v38  ;;  %v1092_v19 = vsel %vm1063_vm1, %v1056_v49, 0 }
 0x1a4   : > { %v929_v34 = vpop.f32.mrf.mxu3 }
 0x1a5   : > { %v6737_v59 = vpop.f32.mrf.mxu2 }
 0x1a6   : > { %v1572_v2 = vpack.c.bf16 %v6737_v59, %v6727_v57 }
 0x1a7   : > { %2386 = vrot.lane.b32.xlu2 %v1061_v28, %s6013_s13  ;;  %v968_v33 = vpop.f32.mrf.mxu0  ;;  %1674 = vrot.lane.b32.xlu1 %v1055_v51, %s6012_s1 }
 0x1aa   : > { %3080 = vrot.lane.b32.xlu0 %v1062_v60, %s6014_s22  ;;  %1113 = vmatpush.bf16.xpose.msrb.mxu3 %v1107_v39 }
 0x1ac   : > { %v931_v17 = vpop.f32.mrf.mxu3 }
 0x1ad   : > { %v6743_v1 = vpop.f32.mrf.mxu2  ;;  %v6754_v0 = vpack.c.bf16 %v931_v17, %v929_v34 }
 0x1af   : > { %2374 = vrot.lane.b32.xlu2 %v1055_v51, %s6013_s13  ;;  %v970_v7 = vpop.f32.mrf.mxu0  ;;  %3078 = vrot.lane.b32.xlu1 %v1061_v28, %s6014_s22 }
 0x1b0   : > { %v1057_v29 = vpack.c.bf16 %v970_v7, %v968_v33 }
 0x1b2   : > { %3068 = vrot.lane.b32.xlu0 %v1056_v49, %s6014_s22  ;;  %1114 = vmatpush.bf16.xpose.msrb.mxu3 %v1104_v43  ;;  %v1095_v12 = vsel %vm1063_vm1, %v1057_v29, 0 }
 0x1b4   : > { %v934_v46 = vpop.f32.mrf.mxu3 }
 0x1b5   : > { %v6749_v21 = vpop.f32.mrf.mxu2 }
 0x1b6   : > { %v1573_v11 = vpack.c.bf16 %v6749_v21, %v6743_v1 }
 0x1b7   : > { %1676 = vrot.lane.b32.xlu2 %v1056_v49, %s6012_s1  ;;  %v973_v63 = vpop.f32.mrf.mxu0  ;;  %3066 = vrot.lane.b32.xlu1 %v1055_v51, %s6014_s22 }
 0x1ba   : > { %1678 = vrot.lane.b32.xlu0 %v1057_v29, %s6012_s1  ;;  %1115 = vmatpush.bf16.xpose.msrb.mxu3 %v1101_v50 }
 0x1bc   : > { %v936_v30 = vpop.f32.mrf.mxu3 }
 0x1bd   : > { %v1032_v13 = vpop.f32.mrf.mxu2  ;;  %v6769_v6 = vpack.c.bf16 %v936_v30, %v934_v46 }
 0x1bf   : > { %2388 = vrot.lane.b32.xlu2 %v1062_v60, %s6013_s13  ;;  %v975_v20 = vpop.f32.mrf.mxu0  ;;  %1658 = vrot.lane.b32.xlu1 %v6754_v0, %s6012_s1 }
 0x1c0   : > { %v6761_v25 = vpack.c.bf16 %v975_v20, %v973_v63 }
 0x1c2   : > { %2364 = vrot.lane.b32.xlu0 %v6732_v10, %s6013_s13  ;;  %v1098_v22 = vsel %vm1063_vm1, %v6761_v25, 0 }
 0x1c3   : > { %1116 = vmatpush.bf16.xpose.msrb.mxu3 %v1098_v22 }
 0x1c4   : > { %v939_v45 = vpop.f32.mrf.mxu3 }
 0x1c5   : > { %v1034_v14 = vpop.f32.mrf.mxu2 }
 0x1c6   : > { %v6825_v16 = vpack.c.bf16 %v1034_v14, %v1032_v13 }
 0x1c7   : > { %2376 = vrot.lane.b32.xlu2 %v1056_v49, %s6013_s13  ;;  %1688 = vrot.lane.b32.xlu1 %v1062_v60, %s6012_s1 }
 0x1ca   : > { %2368 = vrot.lane.b32.xlu0 %v6769_v6, %s6013_s13 }
 0x1cb   : > { %1117 = vmatpush.bf16.xpose.msrb.mxu3 %v1095_v12  ;;  %v6776_v47 = vpop.permute.xlu2 %1682 }
 0x1cc   : > { %v941_v18 = vpop.f32.mrf.mxu3 }
 0x1cd   : > { %v1037_v37 = vpop.f32.mrf.mxu2  ;;  %v6788_v36 = vpack.c.bf16 %v941_v18, %v939_v45 }
 0x1cf   : > { %1660 = vrot.lane.b32.xlu2 %v6769_v6, %s6012_s1  ;;  %3054 = vrot.lane.b32.xlu1 %v6709_v5, %s6014_s22 }
 0x1d2   : > { %3070 = vrot.lane.b32.xlu0 %v1057_v29, %s6014_s22 }
 0x1d3   : > { %1118 = vmatpush.bf16.xpose.msrb.mxu3 %v1092_v19  ;;  %v6784_v48 = vpop.permute.xlu2 %3074 }
 0x1d4   : > { %v944_v28 = vpop.f32.mrf.mxu3 }
 0x1d5   : > { %v1039_v41 = vpop.f32.mrf.mxu2 }
 0x1d6   : > { %v6818_v61 = vpack.c.bf16 %v1039_v41, %v1037_v37 }
 0x1d7   : > { %3056 = vrot.lane.b32.xlu2 %v6732_v10, %s6014_s22  ;;  %3060 = vrot.lane.b32.xlu1 %v6769_v6, %s6014_s22 }
 0x1da   : > { %1662 = vrot.lane.b32.xlu0 %v6788_v36, %s6012_s1 }
 0x1db   : > { %1119 = vmatpush.bf16.xpose.msrb.mxu3 %v1089_v56  ;;  %v6798_v58 = vpop.permute.xlu2 %3050  ;;  %v1727_v56 = vsel %vm1063_vm1, %v6776_v47, 0 }
 0x1dc   : > { %v946_v31 = vpop.f32.mrf.mxu3 }
 0x1dd   : > { %v1042_v40 = vpop.f32.mrf.mxu2  ;;  %v1054_v60 = vpack.c.bf16 %v946_v31, %v944_v28 }
 0x1df   : > { %2366 = vrot.lane.b32.xlu2 %v6754_v0, %s6013_s13  ;;  %2378 = vrot.lane.b32.xlu1 %v1057_v29, %s6013_s13 }
 0x1e2   : > { %2208 = vrot.lane.b32.xlu0 %v1571_v42, %s6012_s1  ;;  %4914 = vmatmul.msk.bf16.vlgmr.msrb.gmra.mxu3 %vm1063_vm1, %v6686_v8 }
 0x1e4   : > { %v6801_v23 = vpop.permute.xlu0 %1650 }
 0x1e5   : > { %v1044_v3 = vpop.f32.mrf.mxu2 }
 0x1e6   : > { %v6805_v4 = vpack.c.bf16 %v1044_v3, %v1042_v40 }
 0x1e7   : > { %3058 = vrot.lane.b32.xlu2 %v6754_v0, %s6014_s22  ;;  %1680 = vrot.lane.b32.xlu1 %v6761_v25, %s6012_s1 }
 0x1e8   : > { %1577 = vmatpush.bf16.msra.mxu0 %v6805_v4 }
 0x1e9   : > { %v6816_v27 = vpop.permute.xlu2 %2362 }
 0x1ea   : > { %2204 = vrot.lane.b32.xlu0 %v6813_v55, %s6012_s1 }
 0x1ec   : > { %1578 = vmatpush.bf16.msra.mxu0 %v6818_v61  ;;  %v6823_v8 = vpop.permute.xlu0 %2382 }
 0x1ef   : > { %3062 = vrot.lane.b32.xlu2 %v6788_v36, %s6014_s22  ;;  %2370 = vrot.lane.b32.xlu1 %v6788_v36, %s6013_s13 }
 0x1f0   : > { %1579 = vmatpush.bf16.msra.mxu0 %v6825_v16 }
 0x1f1   : > { %v6834_v54 = vpop.permute.xlu2 %1652 }
 0x1f2   : > { %3596 = vrot.lane.b32.xlu0 %v1573_v11, %s6014_s22  ;;  %4915 = vmatmul.msk.bf16.gmra.mxu3 %vm1063_vm1, %v6718_v24 }
 0x1f4   : > { %1580 = vmatpush.bf16.msra.mxu0 %v1573_v11  ;;  %v6839_v15 = vpop.permute.xlu0 %2358 }
 0x1f7   : > { %2210 = vrot.lane.b32.xlu2 %v1572_v2, %s6012_s1  ;;  %2212 = vrot.lane.b32.xlu1 %v1573_v11, %s6012_s1 }
 0x1f8   : > { %1581 = vmatpush.bf16.msra.mxu0 %v1572_v2 }
 0x1f9   : > { %v6845_v9 = vpop.permute.xlu2 %1686 }
 0x1fa   : > { %3592 = vrot.lane.b32.xlu0 %v1571_v42, %s6014_s22 }
 0x1fc   : > { %1582 = vmatpush.bf16.msra.mxu0 %v1571_v42  ;;  %v6848_v53 = vpop.permute.xlu0 %1684 }
 0x1fd   : > { %v1730_v37 = vsel %vm1063_vm1, %v6848_v53, 0 }
 0x1ff   : > { %2902 = vrot.lane.b32.xlu2 %v1572_v2, %s6013_s13  ;;  %2206 = vrot.lane.b32.xlu1 %v1570_v26, %s6012_s1 }
 0x200   : > { %1583 = vmatpush.bf16.msra.mxu0 %v1570_v26 }
 0x201   : > { %v6854_v24 = vpop.permute.xlu1 %1654  ;;  %v2387_v35 = vpop.permute.xlu2 %2386 }
 0x202   : > { %2898 = vrot.lane.b32.xlu0 %v1570_v26, %s6013_s13  ;;  %4916 = vmatmul.msk.bf16.gmra.mxu3 %vm1063_vm1, %v6709_v5  ;;  %v2433_v1 = vsel %vm1063_vm1, %v2387_v35, 0 }
 0x204   : > { %1584 = vmatpush.bf16.msra.mxu0 %v6813_v55  ;;  %v2385_v57 = vpop.permute.xlu0 %2384 }
 0x205   : > { %v2430_v21 = vsel %vm1063_vm1, %v2385_v57, 0 }
 0x207   : > { %2900 = vrot.lane.b32.xlu2 %v1571_v42, %s6013_s13  ;;  %2904 = vrot.lane.b32.xlu1 %v1573_v11, %s6013_s13 }
 0x209   : > { %v6862_v32 = vpop.permute.xlu1 %3076  ;;  %v6864_v62 = vpop.permute.xlu2 %2374 }
 0x20a   : > { %3590 = vrot.lane.b32.xlu0 %v1570_v26, %s6014_s22 }
 0x20c   : > { %v6867_v52 = vpop.permute.xlu0 %3052 }
 0x20f   : > { %3072 = vrot.lane.b32.xlu2 %v6761_v25, %s6014_s22  ;;  %3594 = vrot.lane.b32.xlu1 %v1572_v2, %s6014_s22 }
 0x211   : > { %v6872_v5 = vpop.permute.xlu1 %2360  ;;  %v6874_v34 = vpop.permute.xlu2 %1676 }
 0x212   : > { %2372 = vrot.lane.b32.xlu0 %v1054_v60, %s6013_s13  ;;  %4917 = vmatmul.msk.bf16.gmra.mxu3 %vm1063_vm1, %v6732_v10  ;;  %v1718_v26 = vsel %vm1063_vm1, %v6874_v34, 0 }
 0x214   : > { %v6877_v51 = vpop.permute.xlu0 %1656 }
 0x217   : > { %3598 = vrot.lane.b32.xlu2 %v6825_v16, %s6014_s22  ;;  %2380 = vrot.lane.b32.xlu1 %v6761_v25, %s6013_s13 }
 0x219   : > { %v2389_v38 = vpop.permute.xlu2 %2388  ;;  %v6885_v59 = vpop.permute.xlu1 %1674 }
 0x21a   : > { %v2436_v33 = vsel %vm1063_vm1, %v2389_v38, 0  ;;  %2906 = vrot.lane.b32.xlu0 %v6825_v16, %s6013_s13 }
 0x21b   : > { %2438 = vmatpush.bf16.xpose.msra.mxu3 %v2436_v33 }
 0x21c   : > { %v6890_v39 = vpop.permute.xlu0 %3080 }
 0x21d   : > { %v3128_v38 = vsel %vm1063_vm1, %v6890_v39, 0 }
 0x21f   : > { %2216 = vrot.lane.b32.xlu2 %v6818_v61, %s6012_s1  ;;  %1664 = vrot.lane.b32.xlu1 %v1054_v60, %s6012_s1 }
 0x221   : > { %v6895_v10 = vpop.permute.xlu2 %2376  ;;  %v6897_v17 = vpop.permute.xlu1 %3078 }
 0x222   : > { %3600 = vrot.lane.b32.xlu0 %v6818_v61, %s6014_s22  ;;  %4918 = vmatmul.msk.bf16.gmra.mxu3 %vm1063_vm1, %v6754_v0  ;;  %v2427_v0 = vsel %vm1063_vm1, %v6823_v8, 0 }
 0x223   : > { %2439 = vmatpush.bf16.xpose.msra.mxu3 %v2433_v1 }
 0x224   : > { %v6902_v7 = vpop.permute.xlu0 %3068 }
 0x227   : > { %2218 = vrot.lane.b32.xlu2 %v6805_v4, %s6012_s1  ;;  %3064 = vrot.lane.b32.xlu1 %v1054_v60, %s6014_s22 }
 0x229   : > { %v6909_v49 = vpop.permute.xlu2 %1660  ;;  %v6911_v43 = vpop.permute.xlu1 %3066 }
 0x22b   : > { %2440 = vmatpush.bf16.xpose.msra.mxu3 %v2430_v21 }
 0x22c   : > { %v1679_v46 = vpop.permute.xlu0 %1678 }
 0x22f   : > { %3602 = vrot.lane.b32.xlu2 %v6805_v4, %s6014_s22  ;;  %2214 = vrot.lane.b32.xlu1 %v6825_v16, %s6012_s1  ;;  %v1721_v16 = vsel %vm1063_vm1, %v1679_v46, 0 }
 0x231   : > { %v6918_v63 = vpop.permute.xlu2 %3056  ;;  %v6920_v29 = vpop.permute.xlu1 %1658 }
 0x232   : > { %4919 = vmatmul.msk.bf16.gmra.mxu3 %vm1063_vm1, %v6769_v6  ;;  %v1733_v6 = vsel %vm1063_vm1, %v6845_v9, 0 }
 0x233   : > { %2441 = vmatpush.bf16.xpose.msra.mxu3 %v2427_v0 }
 0x234   : > { %v6928_v50 = vpop.permute.xlu0 %2364 }
 0x237   : > { %2908 = vrot.lane.b32.xlu1 %v6818_v61, %s6013_s13 }
 0x239   : > { %v6930_v13 = vpop.permute.xlu2 %2366  ;;  %v1689_v20 = vpop.permute.xlu1 %1688 }
 0x23a   : > { %v1736_v25 = vsel %vm1063_vm1, %v1689_v20, 0 }
 0x23b   : > { %1738 = vmatpush.bf16.xpose.msrb.mxu1 %v1736_v25 }
 0x23c   : > { %v6939_v14 = vpop.permute.xlu0 %2368 }
 0x23f   : > { %2910 = vrot.lane.b32.xlu1 %v6805_v4, %s6013_s13 }
 0x241   : > { %v6935_v30 = vpop.permute.xlu2 %3058  ;;  %v6937_v22 = vpop.permute.xlu1 %3054 }
 0x242   : > { %4920 = vmatmul.msk.bf16.gmra.mxu3 %vm1063_vm1, %v6788_v36 }
 0x243   : > { %1739 = vmatpush.bf16.xpose.msrb.mxu1 %v1733_v6 }
 0x244   : > { %v6951_v18 = vpop.permute.xlu0 %3070 }
 0x249   : > { %v6945_v45 = vpop.permute.xlu2 %3062  ;;  %v6947_v12 = vpop.permute.xlu1 %3060 }
 0x24b   : > { %1740 = vmatpush.bf16.xpose.msrb.mxu1 %v1730_v37 }
 0x24c   : > { %v6960_v36 = vpop.permute.xlu0 %1662 }
 0x251   : > { %v6953_v19 = vpop.permute.xlu2 %2210  ;;  %v6955_v41 = vpop.permute.xlu1 %2378 }
 0x252   : > { %4921 = vmatmul.msk.bf16.gmra.mxu3 %vm1063_vm1, %v1054_v60  ;;  %v1715_v60 = vsel %vm1063_vm1, %v6885_v59, 0  ;;  %v3125_v59 = vsel %vm1063_vm1, %v6897_v17, 0 }
 0x253   : > { %1741 = vmatpush.bf16.xpose.msrb.mxu1 %v1727_v56 }
 0x254   : > { %v6965_v4 = vpop.permute.xlu0 %2208 }
 0x259   : > { %v6962_v40 = vpop.permute.xlu2 %2902  ;;  %v1681_v42 = vpop.permute.xlu1 %1680 }
 0x25a   : > { %v1724_v3 = vsel %vm1063_vm1, %v1681_v42, 0 }
 0x25b   : > { %1742 = vmatpush.bf16.xpose.msrb.mxu1 %v1724_v3 }
 0x25c   : > { %v6976_v53 = vpop.permute.xlu0 %2204 }
 0x261   : > { %v6967_v61 = vpop.permute.xlu2 %2900  ;;  %v6969_v8 = vpop.permute.xlu1 %2370 }
 0x263   : > { %1743 = vmatpush.bf16.xpose.msrb.mxu1 %v1721_v16  ;;  %v3119_v16 = vsel %vm1063_vm1, %v6784_v48, 0 }
 0x264   : > { %v6992_v34 = vpop.permute.xlu0 %3596 }
 0x265   : > { %v1121_v47 = vpop.f32.mrf.mxu3 }
 0x266   : > { %v6972_v2 = vmul.f32 0.17677669, %v1121_v47 }
 0x269   : > { %v3073_v11 = vpop.permute.xlu2 %3072  ;;  %v6974_v9 = vpop.permute.xlu1 %2212  ;;  %1177 = vmax.xlane.f32.xlu1 %v6972_v2 }
 0x26b   : > { %1744 = vmatpush.bf16.xpose.msrb.mxu1 %v1718_v26 }
 0x26c   : > { %v7003_v39 = vpop.permute.xlu0 %3592 }
 0x26d   : > { %v1123_v35 = vpop.f32.mrf.mxu3 }
 0x26e   : > { %v6983_v57 = vmul.f32 0.17677669, %v1123_v35 }
 0x270   : > { %1179 = vmax.xlane.f32.xlu0 %v6983_v57 }
 0x271   : > { %v6981_v28 = vpop.permute.xlu2 %3598  ;;  %v6985_v31 = vpop.permute.xlu1 %2206 }
 0x273   : > { %1745 = vmatpush.bf16.xpose.msrb.mxu1 %v1715_v60  ;;  %v2421_v60 = vsel %vm1063_vm1, %v6955_v41, 0  ;;  %v3113_v41 = vsel %vm1063_vm1, %v6951_v18, 0 }
 0x274   : > { %v7012_v37 = vpop.permute.xlu0 %2898 }
 0x275   : > { %v1126_v33 = vpop.f32.mrf.mxu3 }
 0x276   : > { %v6994_v21 = vmul.f32 0.17677669, %v1126_v33 }
 0x278   : > { %1181 = vmax.xlane.f32.xlu2 %v6994_v21 }
 0x279   : > { %v2217_v1 = vpop.permute.xlu2 %2216  ;;  %v6996_v46 = vpop.permute.xlu1 %2904 }
 0x27a   : > { %4922 = vmatmul.msk.bf16.vlgmr.msrb.gmra.mxu1 %vm1063_vm1, %v6801_v23  ;;  %v3122_v23 = vsel %vm1063_vm1, %v6862_v32, 0 }
 0x27b   : > { %3130 = vmatpush.bf16.xpose.msra.mxu1 %v3128_v38 }
 0x27c   : > { %v7026_v35 = vpop.permute.xlu0 %3590 }
 0x27d   : > { %v1128_v0 = vpop.f32.mrf.mxu3 }
 0x27e   : > { %v7005_v25 = vmul.f32 0.17677669, %v1128_v0 }
 0x280   : > { %1183 = vmax.xlane.f32.xlu1 %v7005_v25 }
 0x281   : > { %v2219_v20 = vpop.permute.xlu2 %2218  ;;  %v7007_v6 = vpop.permute.xlu1 %3594 }
 0x282   : > { %2228 = vmatpush.bf16.msrb.mxu2 %v2219_v20 }
 0x283   : > { %3131 = vmatpush.bf16.xpose.msra.mxu1 %v3125_v59 }
 0x284   : > { %v7043_v59 = vpop.permute.xlu0 %2372 }
 0x285   : > { %v1131_v17 = vpop.f32.mrf.mxu3 }
 0x286   : > { %2229 = vmatpush.bf16.msrb.mxu2 %v2217_v1  ;;  %v7014_v56 = vmul.f32 0.17677669, %v1131_v17  ;;  %v2418_v1 = vsel %vm1063_vm1, %v6895_v10, 0  ;;  %v3110_v10 = vsel %vm1063_vm1, %v6902_v7, 0 }
 0x288   : > { %1185 = vmax.xlane.f32.xlu2 %v7014_v56 }
 0x289   : > { %v2381_v42 = vpop.permute.xlu1 %2380  ;;  %v3603_v7 = vpop.permute.xlu2 %3602 }
 0x28a   : > { %4923 = vmatmul.msk.bf16.gmra.mxu1 %vm1063_vm1, %v6834_v54  ;;  %v2424_v3 = vsel %vm1063_vm1, %v2381_v42, 0  ;;  %v3116_v54 = vsel %vm1063_vm1, %v3073_v11, 0 }
 0x28b   : > { %3132 = vmatpush.bf16.xpose.msra.mxu1 %v3122_v23  ;;  %2442 = vmatpush.bf16.xpose.msra.mxu3 %v2424_v3 }
 0x28c   : > { %v2907_v23 = vpop.permute.xlu0 %2906 }
 0x28d   : > { %v1133_v32 = vpop.f32.mrf.mxu3 }
 0x28e   : > { %v7022_v47 = vmul.f32 0.17677669, %v1133_v32 }
 0x290   : > { %1187 = vmax.xlane.f32.xlu2 %v7022_v47 }
 0x291   : > { %v7024_v26 = vpop.permute.xlu1 %1664 }
 0x293   : > { %3133 = vmatpush.bf16.xpose.msra.mxu1 %v3119_v16  ;;  %2443 = vmatpush.bf16.xpose.msra.mxu3 %v2421_v60 }
 0x295   : > { %v1136_v38 = vpop.f32.mrf.mxu3 }
 0x296   : > { %v7032_v33 = vmul.f32 0.17677669, %v1136_v38 }
 0x298   : > { %1189 = vmax.xlane.f32.xlu1 %v7032_v33 }
 0x299   : > { %v7034_v48 = vpop.permute.xlu1 %3064 }
 0x29a   : > { %4924 = vmatmul.msk.bf16.gmra.mxu1 %vm1063_vm1, %v6854_v24  ;;  %v2415_v24 = vsel %vm1063_vm1, %v6864_v62, 0  ;;  %v3107_v62 = vsel %vm1063_vm1, %v6911_v43, 0 }
 0x29b   : > { %3134 = vmatpush.bf16.xpose.msra.mxu1 %v3116_v54  ;;  %2444 = vmatpush.bf16.xpose.msra.mxu3 %v2418_v1 }
 0x29d   : > { %v1138_v11 = vpop.f32.mrf.mxu3 }
 0x29e   : > { %v7045_v0 = vmul.f32 0.17677669, %v1138_v11 }
 0x2a0   : > { %1191 = vmax.xlane.f32.xlu2 %v7045_v0 }
 0x2a1   : > { %v2215_v20 = vpop.permute.xlu1 %2214 }
 0x2a2   : > { %2230 = vmatpush.bf16.msrb.mxu2 %v2215_v20 }
 0x2a3   : > { %3135 = vmatpush.bf16.xpose.msra.mxu1 %v3113_v41  ;;  %2445 = vmatpush.bf16.xpose.msra.mxu3 %v2415_v24 }
 0x2a5   : > { %v1141_v18 = vpop.f32.mrf.mxu3 }
 0x2a6   : > { %2231 = vmatpush.bf16.msrb.mxu2 %v6974_v9  ;;  %v7053_v17 = vmul.f32 0.17677669, %v1141_v18  ;;  %v3601_v9 = vpop.permute.xlu0 %3600 }
 0x2a8   : > { %1193 = vmax.xlane.f32.xlu2 %v7053_v17 }
 0x2a9   : > { %v2909_v42 = vpop.permute.xlu1 %2908 }
 0x2aa   : > { %4925 = vmatmul.msk.bf16.gmra.mxu1 %vm1063_vm1, %v6877_v51  ;;  %2232 = vmatpush.bf16.msrb.mxu2 %v6953_v19 }
 0x2ab   : > { %3136 = vmatpush.bf16.xpose.msra.mxu1 %v3110_v10  ;;  %4946 = vmatmul.msk.bf16.vlgmr.msra.gmra.mxu3 %vm1063_vm1, %v6839_v15 }
 0x2ad   : > { %v1143_v3 = vpop.f32.mrf.mxu3 }
 0x2ae   : > { %2233 = vmatpush.bf16.msrb.mxu2 %v6965_v4  ;;  %v7064_v16 = vmul.f32 0.17677669, %v1143_v3 }
 0x2b0   : > { %1195 = vmax.xlane.f32.xlu0 %v7064_v16 }
 0x2b1   : > { %v2911_v51 = vpop.permute.xlu1 %2910 }
 0x2b2   : > { %2234 = vmatpush.bf16.msrb.mxu2 %v6985_v31  ;;  %2920 = vmatpush.bf16.msrb.mxu0 %v2911_v51 }
 0x2b3   : > { %3137 = vmatpush.bf16.xpose.msra.mxu1 %v3107_v62 }
 0x2b5   : > { %v1146_v15 = vpop.f32.mrf.mxu3 }
 0x2b6   : > { %2235 = vmatpush.bf16.msrb.mxu2 %v6976_v53  ;;  %2921 = vmatpush.bf16.msrb.mxu0 %v2909_v42  ;;  %v7070_v43 = vmul.f32 0.17677669, %v1146_v15 }
 0x2b8   : > { %1197 = vmax.xlane.f32.xlu0 %v7070_v43 }
 0x2ba   : > { %5205 = vmatpush.bf16.msra.mxu2 %v3603_v7  ;;  %4926 = vmatmul.msk.bf16.gmra.mxu1 %vm1063_vm1, %v6920_v29 }
 0x2bb   : > { %3612 = vmatpush.bf16.msrb.mxu1 %v3603_v7  ;;  %2922 = vmatpush.bf16.msrb.mxu0 %v2907_v23 }
 0x2bc   : > { %4947 = vmatmul.msk.bf16.gmra.mxu3 %vm1063_vm1, %v6872_v5 }
 0x2bd   : > { %v1148_v19 = vpop.f32.mrf.mxu3 }
 0x2be   : > { %5206 = vmatpush.bf16.msra.mxu2 %v3601_v9  ;;  %v7081_v4 = vmul.f32 0.17677669, %v1148_v19 }
 0x2bf   : > { %3613 = vmatpush.bf16.msrb.mxu1 %v3601_v9  ;;  %2923 = vmatpush.bf16.msrb.mxu0 %v6996_v46 }
 0x2c0   : > { %1199 = vmax.xlane.f32.xlu0 %v7081_v4 }
 0x2c2   : > { %5207 = vmatpush.bf16.msra.mxu2 %v6981_v28 }
 0x2c3   : > { %3614 = vmatpush.bf16.msrb.mxu1 %v6981_v28  ;;  %2924 = vmatpush.bf16.msrb.mxu0 %v6962_v40 }
 0x2c5   : > { %v1151_v5 = vpop.f32.mrf.mxu3 }
 0x2c6   : > { %5208 = vmatpush.bf16.msra.mxu2 %v6992_v34  ;;  %v7090_v29 = vmul.f32 0.17677669, %v1151_v5 }
 0x2c7   : > { %3615 = vmatpush.bf16.msrb.mxu1 %v6992_v34  ;;  %2925 = vmatpush.bf16.msrb.mxu0 %v6967_v61 }
 0x2c8   : > { %1201 = vmax.xlane.f32.xlu0 %v7090_v29 }
 0x2ca   : > { %5209 = vmatpush.bf16.msra.mxu2 %v7007_v6  ;;  %4927 = vmatmul.msk.bf16.gmra.mxu1 %vm1063_vm1, %v6909_v49 }
 0x2cb   : > { %3616 = vmatpush.bf16.msrb.mxu1 %v7007_v6  ;;  %2926 = vmatpush.bf16.msrb.mxu0 %v7012_v37 }
 0x2cc   : > { %4948 = vmatmul.msk.bf16.gmra.mxu3 %vm1063_vm1, %v6816_v27 }
 0x2cd   : > { %v1153_v40 = vpop.f32.mrf.mxu3 }
 0x2ce   : > { %5210 = vmatpush.bf16.msra.mxu2 %v7003_v39  ;;  %v7100_v61 = vmul.f32 0.17677669, %v1153_v40 }
 0x2cf   : > { %3617 = vmatpush.bf16.msrb.mxu1 %v7003_v39 }
 0x2d0   : > { %1203 = vmax.xlane.f32.xlu2 %v7100_v61 }
 0x2d2   : > { %5211 = vmatpush.bf16.msra.mxu2 %v7026_v35 }
 0x2d3   : > { %3618 = vmatpush.bf16.msrb.mxu1 %v7026_v35 }
 0x2d5   : > { %v1156_v53 = vpop.f32.mrf.mxu3 }
 0x2d6   : > { %v7103_v28 = vmul.f32 0.17677669, %v1156_v53 }
 0x2d8   : > { %1205 = vmax.xlane.f32.xlu2 %v7103_v28 }
 0x2da   : > { %4928 = vmatmul.msk.bf16.gmra.mxu1 %vm1063_vm1, %v6960_v36 }
 0x2dc   : > { %4949 = vmatmul.msk.bf16.gmra.mxu3 %vm1063_vm1, %v6928_v50  ;;  %v1178_v31 = vpop.xlane.xlu1 %1177 }
 0x2dd   : > { %v1209_v34 = vsub.f32 %v6972_v2, %v1178_v31 }
 0x2df   : > { %v1225_v46 = vmul.f32 1.442695, %v1209_v34 }
 0x2e1   : > { %5373 = vpow2.f32 %v1225_v46 }
 0x2e3   : > { %v1180_v6 = vpop.xlane.xlu0 %1179 }
 0x2e7   : > { %v7138_v35 = vpop.eup %5373 }
 0x2ea   : > { %4929 = vmatmul.msk.bf16.gmra.mxu1 %vm1063_vm1, %v7024_v26 }
 0x2eb   : > { %v1182_v54 = vpop.xlane.xlu2 %1181 }
 0x2ec   : > { %4950 = vmatmul.msk.bf16.gmra.mxu3 %vm1063_vm1, %v6930_v13  ;;  %v1158_v13 = vpop.f32.mrf.mxu3  ;;  %v1211_v24 = vsub.f32 %v6994_v21, %v1182_v54 }
 0x2ee   : > { %v1229_v10 = vmul.f32 1.442695, %v1211_v24 }
 0x2f3   : > { %v1184_v11 = vpop.xlane.xlu1 %1183 }
 0x2f7   : > { %v1747_v27 = vpop.f32.mrf.mxu1 }
 0x2f8   : > { %v7114_v49 = vmul.f32 0.17677669, %v1747_v27 }
 0x2fa   : > { %4970 = vmatmul.msk.bf16.vlgmr.msra.gmra.mxu1 %vm1063_vm1, %v6798_v58  ;;  %1803 = vmax.xlane.f32.xlu0 %v7114_v49  ;;  %v7127_v58 = vmul.f32 0.17677669, %v1158_v13 }
 0x2fb   : > { %v1186_v1 = vpop.xlane.xlu2 %1185 }
 0x2fc   : > { %4951 = vmatmul.msk.bf16.gmra.mxu3 %vm1063_vm1, %v6939_v14  ;;  %v1210_v14 = vsub.f32 %v6983_v57, %v1180_v6 }
 0x2fe   : > { %v1227_v2 = vmul.f32 1.442695, %v1210_v14 }
 0x2ff   : > { %v1749_v36 = vpop.f32.mrf.mxu1 }
 0x300   : > { %v7121_v50 = vmul.f32 0.17677669, %v1749_v36  ;;  %5375 = vpow2.f32 %v1227_v2 }
 0x301   : > { %5377 = vpow2.f32 %v1229_v10 }
 0x302   : > { %1805 = vmax.xlane.f32.xlu1 %v7121_v50 }
 0x306   : > { %v7142_v60 = vpop.eup %5375 }
 0x307   : > { %v1752_v39 = vpop.f32.mrf.mxu1  ;;  %v7168_v9 = vpop.eup %5377 }
 0x308   : > { %v7125_v37 = vmul.f32 0.17677669, %v1752_v39 }
 0x30a   : > { %4971 = vmatmul.msk.bf16.gmra.mxu1 %vm1063_vm1, %v6867_v52  ;;  %1807 = vmax.xlane.f32.xlu0 %v7125_v37 }
 0x30b   : > { %1207 = vmax.xlane.f32.xlu1 %v7127_v58  ;;  %v1190_v36 = vpop.xlane.xlu1 %1189 }
 0x30c   : > { %4952 = vmatmul.msk.bf16.gmra.mxu3 %vm1063_vm1, %v6969_v8 }
 0x30f   : > { %v1754_v32 = vpop.f32.mrf.mxu1 }
 0x310   : > { %v7136_v26 = vmul.f32 0.17677669, %v1754_v32 }
 0x312   : > { %1257 = vadd.xlane.f32.xlu0 %v7138_v35  ;;  %1809 = vmax.xlane.f32.xlu2 %v7136_v26 }
 0x317   : > { %v1757_v52 = vpop.f32.mrf.mxu1 }
 0x318   : > { %v7149_v57 = vmul.f32 0.17677669, %v1757_v52 }
 0x31a   : > { %4972 = vmatmul.msk.bf16.gmra.mxu1 %vm1063_vm1, %v6937_v22  ;;  %1259 = vadd.xlane.f32.xlu0 %v7142_v60 }
 0x31c   : > { %4953 = vmatmul.msk.bf16.gmra.mxu3 %vm1063_vm1, %v7043_v59  ;;  %v1212_v59 = vsub.f32 %v7005_v25, %v1184_v11 }
 0x31e   : > { %v1231_v23 = vmul.f32 1.442695, %v1212_v59 }
 0x31f   : > { %v1759_v8 = vpop.f32.mrf.mxu1 }
 0x320   : > { %v7161_v7 = vmul.f32 0.17677669, %v1759_v8  ;;  %5379 = vpow2.f32 %v1231_v23 }
 0x322   : > { %1811 = vmax.xlane.f32.xlu0 %v7149_v57 }
 0x323   : > { %v1196_v34 = vpop.xlane.xlu0 %1195 }
 0x326   : > { %v7170_v15 = vpop.eup %5379 }
 0x327   : > { %v1762_v38 = vpop.f32.mrf.mxu1 }
 0x328   : > { %v7186_v13 = vmul.f32 0.17677669, %v1762_v38 }
 0x32a   : > { %4973 = vmatmul.msk.bf16.gmra.mxu1 %vm1063_vm1, %v6918_v63  ;;  %v1188_v63 = vpop.xlane.xlu2 %1187 }
 0x32b   : > { %v1214_v21 = vsub.f32 %v7022_v47, %v1188_v63  ;;  %v1213_v47 = vsub.f32 %v7014_v56, %v1186_v1  ;;  %v1215_v56 = vsub.f32 %v7032_v33, %v1190_v36  ;;  %v7201_v8 = vpop.xlane.xlu0 %1197 }
 0x32d   : > { %v1235_v3 = vmul.f32 1.442695, %v1214_v21  ;;  %v1233_v27 = vmul.f32 1.442695, %v1213_v47  ;;  %v1237_v6 = vmul.f32 1.442695, %v1215_v56 }
 0x32e   : > { %v2447_v41 = vpop.f32.mrf.mxu3 }
 0x32f   : > { %v7154_v20 = vmul.f32 0.17677669, %v2447_v41  ;;  %v1764_v22 = vpop.f32.mrf.mxu1  ;;  %5381 = vpow2.f32 %v1235_v3 }
 0x330   : > { %v7190_v39 = vmul.f32 0.17677669, %v1764_v22  ;;  %5383 = vpow2.f32 %v1233_v27 }
 0x331   : > { %2503 = vmax.xlane.f32.xlu1 %v7154_v20  ;;  %5385 = vpow2.f32 %v1237_v6 }
 0x336   : > { %v2449_v18 = vpop.f32.mrf.mxu3 }
 0x337   : > { %v1767_v42 = vpop.f32.mrf.mxu1  ;;  %v7159_v62 = vmul.f32 0.17677669, %v2449_v18 }
 0x338   : > { %v7195_v2 = vmul.f32 0.17677669, %v1767_v42  ;;  %v1218_v42 = vsub.f32 %v7064_v16, %v1196_v34 }
 0x339   : > { %2505 = vmax.xlane.f32.xlu2 %v7159_v62  ;;  %1813 = vmax.xlane.f32.xlu1 %v7161_v7 }
 0x33a   : > { %4974 = vmatmul.msk.bf16.gmra.mxu1 %vm1063_vm1, %v6935_v30  ;;  %v7178_v30 = vpop.eup %5381 }
 0x33b   : > { %v7199_v52 = vpop.eup %5383 }
 0x33c   : > { %v7215_v22 = vpop.eup %5385 }
 0x33f   : > { %v2452_v25 = vpop.f32.mrf.mxu3  ;;  %v1769_v51 = vpop.f32.mrf.mxu1 }
 0x340   : > { %v7174_v5 = vmul.f32 0.17677669, %v2452_v25 }
 0x341   : > { %1261 = vadd.xlane.f32.xlu2 %v7168_v9  ;;  %1263 = vadd.xlane.f32.xlu1 %v7170_v15 }
 0x347   : > { %v2454_v19 = vpop.f32.mrf.mxu3  ;;  %v1772_v40 = vpop.f32.mrf.mxu1 }
 0x348   : > { %v7176_v53 = vmul.f32 0.17677669, %v2454_v19  ;;  %v7231_v27 = vmul.f32 0.17677669, %v1772_v40 }
 0x349   : > { %2507 = vmax.xlane.f32.xlu2 %v7174_v5  ;;  %1267 = vadd.xlane.f32.xlu1 %v7178_v30 }
 0x34a   : > { %2509 = vmax.xlane.f32.xlu0 %v7176_v53  ;;  %4975 = vmatmul.msk.bf16.gmra.mxu1 %vm1063_vm1, %v6947_v12  ;;  %v1192_v12 = vpop.xlane.xlu2 %1191 }
 0x34b   : > { %v1216_v33 = vsub.f32 %v7045_v0, %v1192_v12  ;;  %v1200_v0 = vpop.xlane.xlu0 %1199 }
 0x34c   : > { %v1220_v63 = vsub.f32 %v7081_v4, %v1200_v0 }
 0x34d   : > { %v1239_v38 = vmul.f32 1.442695, %v1216_v33 }
 0x34e   : > { %v1247_v19 = vmul.f32 1.442695, %v1220_v63 }
 0x34f   : > { %v2457_v31 = vpop.f32.mrf.mxu3  ;;  %v7188_v46 = vpop.f32.mrf.mxu1  ;;  %5387 = vpow2.f32 %v1239_v38 }
 0x350   : > { %v7211_v41 = vmul.f32 0.17677669, %v2457_v31  ;;  %v7256_v33 = vmul.f32 0.17677669, %v7188_v46 }
 0x351   : > { %1817 = vmax.xlane.f32.xlu2 %v7190_v39 }
 0x352   : > { %1815 = vmax.xlane.f32.xlu0 %v7186_v13  ;;  %v1194_v59 = vpop.xlane.xlu2 %1193 }
 0x353   : > { %v1217_v18 = vsub.f32 %v7053_v17, %v1194_v59  ;;  %v1202_v25 = vpop.xlane.xlu0 %1201 }
 0x355   : > { %v7222_v23 = vpop.eup %5387  ;;  %v1241_v21 = vmul.f32 1.442695, %v1217_v18 }
 0x357   : > { %v2459_v14 = vpop.f32.mrf.mxu3  ;;  %v7203_v54 = vpop.f32.mrf.mxu1  ;;  %5389 = vpow2.f32 %v1241_v21 }
 0x358   : > { %v7197_v32 = vmul.f32 0.17677669, %v2459_v14  ;;  %5391 = vpow2.f32 %v1247_v19 }
 0x359   : > { %1819 = vmax.xlane.f32.xlu2 %v7195_v2 }
 0x35a   : > { %1265 = vadd.xlane.f32.xlu0 %v7199_v52  ;;  %2513 = vmax.xlane.f32.xlu1 %v7197_v32  ;;  %v1204_v59 = vpop.xlane.xlu2 %1203 }
 0x35b   : > { %4976 = vmatmul.msk.bf16.gmra.mxu1 %vm1063_vm1, %v6945_v45  ;;  %v7220_v45 = vmul.f32 0.17677669, %v1769_v51  ;;  %v1243_v51 = vmul.f32 1.442695, %v1218_v42  ;;  %v7268_v42 = vmul.f32 0.17677669, %v7203_v54 }
 0x35d   : > { %5393 = vpow2.f32 %v1243_v51  ;;  %v7241_v31 = vpop.eup %5389 }
 0x35e   : > { %v7245_v34 = vpop.eup %5391 }
 0x35f   : > { %v2462_v1 = vpop.f32.mrf.mxu3  ;;  %v1779_v24 = vpop.f32.mrf.mxu1 }
 0x360   : > { %v7213_v11 = vmul.f32 0.17677669, %v2462_v1  ;;  %v7272_v21 = vmul.f32 0.17677669, %v1779_v24 }
 0x361   : > { %1269 = vadd.xlane.f32.xlu2 %v7215_v22 }
 0x362   : > { %2511 = vmax.xlane.f32.xlu0 %v7211_v41  ;;  %2515 = vmax.xlane.f32.xlu1 %v7213_v11 }
 0x363   : > { %v7247_v56 = vpop.eup %5393 }
 0x367   : > { %v2464_v10 = vpop.f32.mrf.mxu3  ;;  %v1782_v3 = vpop.f32.mrf.mxu1 }
 0x368   : > { %v7235_v36 = vmul.f32 0.17677669, %v2464_v10 }
 0x369   : > { %1271 = vadd.xlane.f32.xlu2 %v7222_v23 }
 0x36a   : > { %1821 = vmax.xlane.f32.xlu0 %v7220_v45  ;;  %8910 = vst [vmem:[#allocation26_spill] sm:$0xff] %v7235_v36 }
 0x36b   : > { %4977 = vmatmul.msk.bf16.gmra.mxu1 %vm1063_vm1, %v7034_v48  ;;  %v1221_v48 = vsub.f32 %v7090_v29, %v1202_v25 }
 0x36d   : > { %v1804_v16 = vpop.xlane.xlu0 %1803  ;;  %v1249_v4 = vmul.f32 1.442695, %v1221_v48 }
 0x36e   : > { %v1835_v29 = vsub.f32 %v7114_v49, %v1804_v16  ;;  %v1219_v49 = vsub.f32 %v7070_v43, %v7201_v8  ;;  %v1222_v8 = vsub.f32 %v7100_v61, %v1204_v59 }
 0x36f   : > { %v2467_v47 = vpop.f32.mrf.mxu3  ;;  %v7243_v40 = vpop.f32.mrf.mxu1  ;;  %5395 = vpow2.f32 %v1249_v4 }
 0x370   : > { %v7233_v17 = vmul.f32 0.17677669, %v2467_v47  ;;  %v1851_v12 = vmul.f32 1.442695, %v1835_v29  ;;  %v1245_v46 = vmul.f32 1.442695, %v1219_v49  ;;  %v1206_v47 = vpop.xlane.xlu2 %1205 }
 0x371   : > { %2517 = vmax.xlane.f32.xlu2 %v7235_v36  ;;  %v1251_v24 = vmul.f32 1.442695, %v1222_v8  ;;  %v1223_v61 = vsub.f32 %v7103_v28, %v1206_v47 }
 0x372   : > { %8909 = vst [vmem:[#allocation25_spill] sm:$0xff] %v7233_v17  ;;  %1823 = vmax.xlane.f32.xlu0 %v7231_v27  ;;  %2519 = vmax.xlane.f32.xlu1 %v7233_v17  ;;  %5397 = vpow2.f32 %v1851_v12 }
 0x373   : > { %v1253_v28 = vmul.f32 1.442695, %v1223_v61 }
 0x375   : > { %v7258_v38 = vpop.eup %5395  ;;  %v1806_v10 = vpop.xlane.xlu1 %1805 }
 0x376   : > { %v1836_v43 = vsub.f32 %v7121_v50, %v1806_v10  ;;  %v7285_v50 = vmul.f32 0.17677669, %v1782_v3 }
 0x377   : > { %v2469_v6 = vpop.f32.mrf.mxu3  ;;  %v3139_v0 = vpop.f32.mrf.mxu1 }
 0x378   : > { %v7260_v1 = vmul.f32 0.17677669, %v2469_v6  ;;  %v7270_v63 = vpop.eup %5397  ;;  %v1853_v48 = vmul.f32 1.442695, %v1836_v43  ;;  %v7281_v16 = vmul.f32 0.17677669, %v3139_v0 }
 0x379   : > { %1273 = vadd.xlane.f32.xlu2 %v7241_v31 }
 0x37a   : > { %1279 = vadd.xlane.f32.xlu0 %v7245_v34  ;;  %1275 = vadd.xlane.f32.xlu1 %v7247_v56  ;;  %8911 = vst [vmem:[#allocation27_spill] sm:$0xff] %v7260_v1 }
 0x37d   : > { %v7253_v14 = vpop.xlane.xlu0 %1807 }
 0x37e   : > { %v1208_v4 = vpop.xlane.xlu1 %1207 }
 0x37f   : > { %v7279_v25 = vpop.f32.mrf.mxu1  ;;  %v1224_v0 = vsub.f32 %v7127_v58, %v1208_v4 }
 0x381   : > { %1825 = vmax.xlane.f32.xlu2 %v7256_v33  ;;  %v1255_v47 = vmul.f32 1.442695, %v1224_v0 }
 0x382   : > { %1281 = vadd.xlane.f32.xlu0 %v7258_v38  ;;  %2521 = vmax.xlane.f32.xlu1 %v7260_v1 }
 0x385   : > { %v1258_v18 = vpop.xlane.xlu0 %1257 }
 0x386   : > { %5399 = vrcp.f32 %v1258_v18  ;;  %v1300_v12 = vand.u32 2147483648, %v1258_v18  ;;  %v1298_v59 = vand.u32 2147483647, %v1258_v18  ;;  %vm1294_vm3 = vweird.f32 %v1258_v18 }
 0x387   : > { %5401 = vpow2.f32 %v1245_v46  ;;  %v3144_v43 = vpop.f32.mrf.mxu1 }
 0x388   : > { %v1301_v46 = vor.u32 1.1754944e-38, %v1300_v12  ;;  %vm1299_vm5 = vcmp.eq.f32.partialorder %v1298_v59, 8.507059e+37 }
 0x389   : > { %1827 = vmax.xlane.f32.xlu2 %v7268_v42 }
 0x38a   : > { %1883 = vadd.xlane.f32.xlu0 %v7270_v63  ;;  %1829 = vmax.xlane.f32.xlu1 %v7272_v21 }
 0x38c   : > { %v5400_v51 = vpop.eup %5399 }
 0x38d   : > { %v1290_v54 = vmul.f32 %v5400_v51, %v1258_v18  ;;  %v1260_v19 = vpop.xlane.xlu0 %1259  ;;  %v7283_v6 = vpop.eup %5401  ;;  %vm1295_vm2 = vweird.f32 %v5400_v51 }
 0x38e   : > { %5403 = vrcp.f32 %v1260_v19  ;;  %vm1296_vm4 = vmor %vm1294_vm3, %vm1295_vm2  ;;  %v1315_v18 = vand.u32 2147483648, %v1260_v19  ;;  %v1313_v61 = vand.u32 2147483647, %v1260_v19  ;;  %vm1309_vm7 = vweird.f32 %v1260_v19 }
 0x38f   : > { %v1291_v29 = vsub.f32 1.0, %v1290_v54  ;;  %5405 = vpow2.f32 %v1853_v48  ;;  %v7294_v48 = vmul.f32 0.17677669, %v7243_v40 }
 0x390   : > { %5407 = vpow2.f32 %v1251_v24  ;;  %vm1314_vm9 = vcmp.eq.f32.partialorder %v1313_v61, 8.507059e+37 }
 0x391   : > { %v1292_v49 = vmul.f32 %v5400_v51, %v1291_v29  ;;  %1277 = vadd.xlane.f32.xlu2 %v7283_v6  ;;  %5409 = vpow2.f32 %v1253_v28  ;;  %v3146_v28 = vpop.f32.mrf.mxu1 }
 0x392   : > { %3195 = vmax.xlane.f32.xlu0 %v7281_v16  ;;  %1831 = vmax.xlane.f32.xlu1 %v7285_v50  ;;  %5411 = vpow2.f32 %v1255_v47 }
 0x393   : > { %v1293_v10 = vadd.f32 %v5400_v51, %v1292_v49 }
 0x394   : > { %v5404_v3 = vpop.eup %5403 }
 0x395   : > { %v1305_v8 = vmul.f32 %v5404_v3, %v1260_v19  ;;  %v1297_v54 = vsel %vm1296_vm4, %v5400_v51, %v1293_v10  ;;  %v7297_v24 = vpop.eup %5405  ;;  %vm1310_vm6 = vweird.f32 %v5404_v3  ;;  %v1316_v51 = vor.u32 1.1754944e-38, %v1315_v18 }
 0x396   : > { %v1302_v29 = vsel %vm1299_vm5, %v1301_v46, %v1297_v54  ;;  %v7299_v49 = vpop.eup %5407  ;;  %vm1311_vm8 = vmor %vm1309_vm7, %vm1310_vm6 }
 0x397   : > { %v1306_v58 = vsub.f32 1.0, %v1305_v8  ;;  %v1529_v4 = vmul.f32 %v7138_v35, %v1302_v29  ;;  %v1837_v35 = vsub.f32 %v7125_v37, %v7253_v14  ;;  %v7309_v46 = vpop.eup %5409  ;;  %v1810_v37 = vpop.xlane.xlu2 %1809  ;;  %v7315_v14 = vmul.f32 0.17677669, %v7279_v25 }
 0x398   : > { %v7312_v54 = vpop.eup %5411 }
 0x399   : > { %v1307_v12 = vmul.f32 %v5404_v3, %v1306_v58  ;;  %1833 = vmax.xlane.f32.xlu2 %v7294_v48  ;;  %1545 = vst [vmem:[%s7303_s21] sm:$0xff] %v1529_v4  ;;  %v1855_v0 = vmul.f32 1.442695, %v1837_v35  ;;  %v1812_v58 = vpop.xlane.xlu0 %1811  ;;  %v3149_v61 = vpop.f32.mrf.mxu1 }
 0x39a   : > { %1885 = vadd.xlane.f32.xlu0 %v7297_v24  ;;  %1283 = vadd.xlane.f32.xlu1 %v7299_v49 }
 0x39b   : > { %v1308_v40 = vadd.f32 %v5404_v3, %v1307_v12  ;;  %5413 = vpow2.f32 %v1855_v0  ;;  %v7325_v12 = vmul.f32 0.17677669, %v3144_v43 }
 0x39d   : > { %v1312_v59 = vsel %vm1311_vm8, %v5404_v3, %v1308_v40  ;;  %v1838_v3 = vsub.f32 %v7136_v26, %v1810_v37 }
 0x39e   : > { %v1317_v10 = vsel %vm1314_vm9, %v1316_v51, %v1312_v59  ;;  %v7333_v59 = vmul.f32 0.17677669, %v3146_v28 }
 0x39f   : > { %v1530_v8 = vmul.f32 %v7142_v60, %v1317_v10  ;;  %v1857_v29 = vmul.f32 1.442695, %v1838_v3 }
 0x3a1   : > { %1285 = vadd.xlane.f32.xlu2 %v7309_v46  ;;  %1546 = vst [vmem:[%s7303_s21 + $0x8] sm:$0xff] %v1530_v8  ;;  %v1561_v19 = vpack.c.bf16 %v1530_v8, %v1529_v4  ;;  %v7323_v25 = vpop.eup %5413  ;;  %v1839_v4 = vsub.f32 %v7149_v57, %v1812_v58  ;;  %v3151_v57 = vpop.f32.mrf.mxu1 }
 0x3a2   : > { %1287 = vadd.xlane.f32.xlu0 %v7312_v54  ;;  %3197 = vmax.xlane.f32.xlu1 %v7315_v14  ;;  %v7341_v37 = vmul.f32 0.17677669, %v3151_v57 }
 0x3a3   : > { %1585 = vmatmul.bf16.vlgmr.msra.gmra.mxu0 %v1561_v19  ;;  %v1859_v40 = vmul.f32 1.442695, %v1839_v4 }
 0x3a4   : > { %v2504_v47 = vpop.xlane.xlu1 %2503  ;;  %8912 = vst [vmem:[#allocation28_spill] sm:$0xff] %v7341_v37 }
 0x3a5   : > { %v2535_v60 = vsub.f32 %v7154_v20, %v2504_v47 }
 0x3a7   : > { %v2551_v18 = vmul.f32 1.442695, %v2535_v60 }
 0x3a9   : > { %5415 = vpow2.f32 %v2551_v18  ;;  %1887 = vadd.xlane.f32.xlu2 %v7323_v25 }
 0x3aa   : > { %3199 = vmax.xlane.f32.xlu1 %v7325_v12  ;;  %5417 = vpow2.f32 %v1857_v29 }
 0x3ac   : > { %v2506_v26 = vpop.xlane.xlu2 %2505  ;;  %v1814_v35 = vpop.xlane.xlu1 %1813 }
 0x3ad   : > { %v2536_v20 = vsub.f32 %v7159_v62, %v2506_v26  ;;  %v1840_v10 = vsub.f32 %v7161_v7, %v1814_v35 }
 0x3af   : > { %v7331_v51 = vpop.eup %5415  ;;  %v2553_v43 = vmul.f32 1.442695, %v2536_v20  ;;  %v1861_v19 = vmul.f32 1.442695, %v1840_v10  ;;  %v7356_v20 = vmul.f32 0.17677669, %v3149_v61 }
 0x3b0   : > { %2583 = vadd.xlane.f32.xlu0 %v7331_v51  ;;  %v7336_v0 = vpop.eup %5417 }
 0x3b1   : > { %5419 = vpow2.f32 %v2553_v43  ;;  %3201 = vmax.xlane.f32.xlu2 %v7333_v59  ;;  %8913 = vst [vmem:[#allocation29_spill] sm:$0xff] %v7356_v20 }
 0x3b2   : > { %5421 = vpow2.f32 %v1859_v40  ;;  %1889 = vadd.xlane.f32.xlu1 %v7336_v0 }
 0x3b4   : > { %v1262_v62 = vpop.xlane.xlu2 %1261  ;;  %v1264_v8 = vpop.xlane.xlu1 %1263 }
 0x3b5   : > { %5423 = vrcp.f32 %v1262_v62  ;;  %v1330_v57 = vand.u32 2147483648, %v1262_v62  ;;  %v1345_v44 = vand.u32 2147483648, %v1264_v8  ;;  %vm1324_vm11 = vweird.f32 %v1262_v62 }
 0x3b6   : > { %5425 = vrcp.f32 %v1264_v8  ;;  %v1343_v61 = vand.u32 2147483647, %v1264_v8  ;;  %vm1339_vm15 = vweird.f32 %v1264_v8 }
 0x3b7   : > { %v7343_v28 = vpop.eup %5419  ;;  %5427 = vpow2.f32 %v1861_v19  ;;  %v1328_v19 = vand.u32 2147483647, %v1262_v62 }
 0x3b8   : > { %v7345_v3 = vpop.eup %5421  ;;  %3205 = vmax.xlane.f32.xlu0 %v7341_v37  ;;  %v1346_v37 = vor.u32 1.1754944e-38, %v1345_v44  ;;  %vm1344_vm2 = vcmp.eq.f32.partialorder %v1343_v61, 8.507059e+37 }
 0x3b9   : > { %1891 = vadd.xlane.f32.xlu2 %v7345_v3  ;;  %vm1329_vm14 = vcmp.eq.f32.partialorder %v1328_v19, 8.507059e+37 }
 0x3ba   : > { %2585 = vadd.xlane.f32.xlu1 %v7343_v28 }
 0x3bb   : > { %v5424_v47 = vpop.eup %5423 }
 0x3bc   : > { %v5426_v7 = vpop.eup %5425  ;;  %v1320_v60 = vmul.f32 %v5424_v47, %v1262_v62  ;;  %v2508_v29 = vpop.xlane.xlu2 %2507  ;;  %vm1325_vm10 = vweird.f32 %v5424_v47 }
 0x3bd   : > { %v7350_v58 = vpop.xlane.xlu0 %2509  ;;  %v1335_v18 = vmul.f32 %v5426_v7, %v1264_v8  ;;  %v2537_v4 = vsub.f32 %v7174_v5, %v2508_v29  ;;  %v7353_v26 = vpop.xlane.xlu1 %1267  ;;  %vm1340_vm12 = vweird.f32 %v5426_v7  ;;  %vm1326_vm13 = vmor %vm1324_vm11, %vm1325_vm10  ;;  %v1331_v29 = vor.u32 1.1754944e-38, %v1330_v57 }
 0x3be   : > { %v1321_v35 = vsub.f32 1.0, %v1320_v60  ;;  %5429 = vrcp.f32 %v7353_v26  ;;  %v7358_v17 = vpop.eup %5427  ;;  %vm1341_vm0 = vmor %vm1339_vm15, %vm1340_vm12  ;;  %vm1369_vm4 = vweird.f32 %v7353_v26 }
 0x3bf   : > { %v1336_v40 = vsub.f32 1.0, %v1335_v18  ;;  %v2555_v43 = vmul.f32 1.442695, %v2537_v4  ;;  %8914 = vst [vmem:[#allocation30_spill] sm:$0xff] %v7358_v17 }
 0x3c0   : > { %v1322_v10 = vmul.f32 %v5424_v47, %v1321_v35 }
 0x3c1   : > { %5431 = vpow2.f32 %v2555_v43  ;;  %3203 = vmax.xlane.f32.xlu2 %v7356_v20  ;;  %v1337_v5 = vmul.f32 %v5426_v7, %v1336_v40  ;;  %v3154_v43 = vpop.f32.mrf.mxu1 }
 0x3c2   : > { %1893 = vadd.xlane.f32.xlu1 %v7358_v17  ;;  %v1323_v60 = vadd.f32 %v5424_v47, %v1322_v10 }
 0x3c3   : > { %v1338_v18 = vadd.f32 %v5426_v7, %v1337_v5 }
 0x3c4   : > { %v5430_v4 = vpop.eup %5429  ;;  %v1818_v35 = vpop.xlane.xlu2 %1817  ;;  %v1327_v36 = vsel %vm1326_vm13, %v5424_v47, %v1323_v60 }
 0x3c5   : > { %v1816_v1 = vpop.xlane.xlu0 %1815  ;;  %v1365_v40 = vmul.f32 %v5430_v4, %v7353_v26  ;;  %v1842_v20 = vsub.f32 %v7190_v39, %v1818_v35  ;;  %v1332_v10 = vsel %vm1329_vm14, %v1331_v29, %v1327_v36  ;;  %v1342_v57 = vsel %vm1341_vm0, %v5426_v7, %v1338_v18 }
 0x3c6   : > { %v1841_v62 = vsub.f32 %v7186_v13, %v1816_v1  ;;  %v1531_v5 = vmul.f32 %v7168_v9, %v1332_v10  ;;  %v1347_v60 = vsel %vm1344_vm2, %v1346_v37, %v1342_v57  ;;  %v1375_v39 = vand.u32 2147483648, %v7353_v26 }
 0x3c7   : > { %v7367_v47 = vpop.eup %5431  ;;  %v1366_v8 = vsub.f32 1.0, %v1365_v40  ;;  %v1865_v44 = vmul.f32 1.442695, %v1842_v20  ;;  %v1532_v17 = vmul.f32 %v7170_v15, %v1347_v60  ;;  %vm1370_vm3 = vweird.f32 %v5430_v4 }
 0x3c8   : > { %v1863_v19 = vmul.f32 1.442695, %v1841_v62  ;;  %1547 = vst [vmem:[%s7303_s21 + $0x10] sm:$0xff] %v1531_v5  ;;  %v1373_v9 = vand.u32 2147483647, %v7353_v26  ;;  %vm1371_vm5 = vmor %vm1369_vm4, %vm1370_vm3  ;;  %v1376_v15 = vor.u32 1.1754944e-38, %v1375_v39 }
 0x3c9   : > { %5433 = vpow2.f32 %v1865_v44  ;;  %2587 = vadd.xlane.f32.xlu2 %v7367_v47  ;;  %v1367_v13 = vmul.f32 %v5430_v4, %v1366_v8  ;;  %1548 = vst [vmem:[%s7303_s21 + $0x18] sm:$0xff] %v1532_v17  ;;  %v1562_v36 = vpack.c.bf16 %v1532_v17, %v1531_v5  ;;  %v3156_v29 = vpop.f32.mrf.mxu1 }
 0x3ca   : > { %5435 = vpow2.f32 %v1863_v19  ;;  %vm1374_vm6 = vcmp.eq.f32.partialorder %v1373_v9, 8.507059e+37  ;;  %v7389_v8 = vmul.f32 0.17677669, %v3156_v29  ;;  %v7391_v19 = vmul.f32 0.17677669, %v3154_v43 }
 0x3cb   : > { %v1368_v1 = vadd.f32 %v5430_v4, %v1367_v13  ;;  %1590 = vmatmul.bf16.gmra.mxu0 %v1562_v36 }
 0x3cc   : > { %v1820_v7 = vpop.xlane.xlu2 %1819  ;;  %8917 = vst [vmem:[#allocation33_spill] sm:$0xff] %v7391_v19 }
 0x3cd   : > { %v1266_v37 = vpop.xlane.xlu0 %1265  ;;  %v1372_v20 = vsel %vm1371_vm5, %v5430_v4, %v1368_v1  ;;  %v1843_v40 = vsub.f32 %v7195_v2, %v1820_v7  ;;  %v7385_v62 = vpop.xlane.xlu1 %2513 }
 0x3ce   : > { %5437 = vrcp.f32 %v1266_v37  ;;  %v1377_v18 = vsel %vm1374_vm6, %v1376_v15, %v1372_v20  ;;  %v1358_v60 = vand.u32 2147483647, %v1266_v37  ;;  %vm1354_vm8 = vweird.f32 %v1266_v37 }
 0x3cf   : > { %v7376_v61 = vpop.eup %5433  ;;  %v1534_v35 = vmul.f32 %v7178_v30, %v1377_v18  ;;  %v1867_v5 = vmul.f32 1.442695, %v1843_v40  ;;  %v1360_v30 = vand.u32 2147483648, %v1266_v37 }
 0x3d0   : > { %8915 = vst [vmem:[#allocation31_spill] sm:$0xff] %v7376_v61  ;;  %v7378_v17 = vpop.eup %5435  ;;  %1897 = vadd.xlane.f32.xlu0 %v7376_v61  ;;  %vm1359_vm10 = vcmp.eq.f32.partialorder %v1358_v60, 8.507059e+37 }
 0x3d1   : > { %8916 = vst [vmem:[#allocation32_spill] sm:$0xff] %v7378_v17  ;;  %1895 = vadd.xlane.f32.xlu2 %v7378_v17  ;;  %v3159_v13 = vpop.f32.mrf.mxu1  ;;  %v1361_v43 = vor.u32 1.1754944e-38, %v1360_v30 }
 0x3d2   : > { %1550 = vst [vmem:[%s7303_s21 + $0x28] sm:$0xff] %v1534_v35 }
 0x3d4   : > { %v5438_v26 = vpop.eup %5437  ;;  %v1270_v10 = vpop.xlane.xlu2 %1269 }
 0x3d5   : > { %v1350_v4 = vmul.f32 %v5438_v26, %v1266_v37  ;;  %v7387_v57 = vpop.xlane.xlu0 %2511  ;;  %5439 = vrcp.f32 %v1270_v10  ;;  %vm1355_vm7 = vweird.f32 %v5438_v26  ;;  %v7399_v20 = vpop.xlane.xlu1 %2515  ;;  %vm1384_vm12 = vweird.f32 %v1270_v10 }
 0x3d6   : > { %5441 = vpow2.f32 %v1867_v5  ;;  %vm1356_vm9 = vmor %vm1354_vm8, %vm1355_vm7  ;;  %v1390_v5 = vand.u32 2147483648, %v1270_v10 }
 0x3d7   : > { %v1351_v44 = vsub.f32 1.0, %v1350_v4  ;;  %v7404_v4 = vmul.f32 0.17677669, %v3159_v13 }
 0x3d8   : > { %3209 = vmax.xlane.f32.xlu0 %v7389_v8 }
 0x3d9   : > { %v1352_v2 = vmul.f32 %v5438_v26, %v1351_v44  ;;  %3207 = vmax.xlane.f32.xlu2 %v7391_v19  ;;  %8919 = vst [vmem:[#allocation35_spill] sm:$0xff] %v7404_v4 }
 0x3db   : > { %v1353_v39 = vadd.f32 %v5438_v26, %v1352_v2  ;;  %v5440_v36 = vpop.eup %5439  ;;  %2896 = vrot.lane.b32.xlu1 %v6813_v55, %s6013_s13 }
 0x3dc   : > { %v1380_v9 = vmul.f32 %v5440_v36, %v1270_v10  ;;  %v1272_v1 = vpop.xlane.xlu2 %1271  ;;  %v7402_v40 = vpop.eup %5441  ;;  %vm1385_vm11 = vweird.f32 %v5440_v36 }
 0x3dd   : > { %v7397_v7 = vpop.xlane.xlu0 %1821  ;;  %v1357_v15 = vsel %vm1356_vm9, %v5438_v26, %v1353_v39  ;;  %5443 = vrcp.f32 %v1272_v1  ;;  %8918 = vst [vmem:[#allocation34_spill] sm:$0xff] %v7402_v40  ;;  %v1388_v26 = vand.u32 2147483647, %v1270_v10  ;;  %v3161_v39 = vpop.f32.mrf.mxu1  ;;  %vm1386_vm13 = vmor %vm1384_vm12, %vm1385_vm11  ;;  %vm1399_vm0 = vweird.f32 %v1272_v1 }
 0x3de   : > { %v1362_v29 = vsel %vm1359_vm10, %v1361_v43, %v1357_v15  ;;  %v1381_v18 = vsub.f32 1.0, %v1380_v9 }
 0x3df   : > { %v1533_v37 = vmul.f32 %v7199_v52, %v1362_v29  ;;  %v1391_v52 = vor.u32 1.1754944e-38, %v1390_v5  ;;  %vm1389_vm14 = vcmp.eq.f32.partialorder %v1388_v26, 8.507059e+37  ;;  %v2538_v26 = vsub.f32 %v7176_v53, %v7350_v58 }
 0x3e0   : > { %1899 = vadd.xlane.f32.xlu0 %v7402_v40  ;;  %v1382_v30 = vmul.f32 %v5440_v36, %v1381_v18  ;;  %v7415_v18 = vmul.f32 0.17677669, %v3161_v39  ;;  %v1844_v53 = vsub.f32 %v7220_v45, %v7397_v7 }
 0x3e1   : > { %1549 = vst [vmem:[%s7303_s21 + $0x20] sm:$0xff] %v1533_v37  ;;  %v1563_v44 = vpack.c.bf16 %v1534_v35, %v1533_v37  ;;  %3211 = vmax.xlane.f32.xlu2 %v7404_v4 }
 0x3e2   : > { %v1383_v2 = vadd.f32 %v5440_v36, %v1382_v30  ;;  %8922 = vst [vmem:[#allocation38_spill] sm:$0xff] %v7415_v18  ;;  %v1403_v30 = vand.u32 2147483647, %v1272_v1 }
 0x3e3   : > { %1595 = vmatmul.bf16.gmra.mxu0 %v1563_v44  ;;  %v5444_v60 = vpop.eup %5443  ;;  %v1405_v44 = vand.u32 2147483648, %v1272_v1 }
 0x3e4   : > { %v1395_v13 = vmul.f32 %v5444_v60, %v1272_v1  ;;  %v7411_v9 = vpop.xlane.xlu2 %2517  ;;  %v1387_v15 = vsel %vm1386_vm13, %v5440_v36, %v1383_v2  ;;  %vm1400_vm15 = vweird.f32 %v5444_v60  ;;  %vm1404_vm3 = vcmp.eq.f32.partialorder %v1403_v30, 8.507059e+37 }
 0x3e5   : > { %v7409_v43 = vpop.xlane.xlu0 %1823  ;;  %8920 = vst [vmem:[#allocation36_spill] sm:$0xff] %v7411_v9  ;;  %v7413_v35 = vpop.xlane.xlu1 %2519  ;;  %v1392_v29 = vsel %vm1389_vm14, %v1391_v52, %v1387_v15  ;;  %vm1401_vm2 = vmor %vm1399_vm0, %vm1400_vm15  ;;  %v1406_v36 = vor.u32 1.1754944e-38, %v1405_v44  ;;  %v2557_v1 = vmul.f32 1.442695, %v2538_v26 }
 0x3e6   : > { %8921 = vst [vmem:[#allocation37_spill] sm:$0xff] %v7413_v35  ;;  %v1396_v37 = vsub.f32 1.0, %v1395_v13  ;;  %v1535_v10 = vmul.f32 %v7215_v22, %v1392_v29 }
 0x3e8   : > { %3213 = vmax.xlane.f32.xlu0 %v7415_v18  ;;  %v1397_v5 = vmul.f32 %v5444_v60, %v1396_v37  ;;  %1551 = vst [vmem:[%s7303_s21 + $0x30] sm:$0xff] %v1535_v10 }
 0x3ea   : > { %v1398_v40 = vadd.f32 %v5444_v60, %v1397_v5  ;;  %v7438_v5 = vmul.f32 1.442695, %v1844_v53 }
 0x3ec   : > { %v1274_v39 = vpop.xlane.xlu2 %1273  ;;  %v1402_v52 = vsel %vm1401_vm2, %v5444_v60, %v1398_v40 }
 0x3ed   : > { %v7422_v2 = vpop.xlane.xlu0 %1279  ;;  %v7425_v22 = vpop.xlane.xlu1 %1275  ;;  %v1407_v13 = vsel %vm1404_vm3, %v1406_v36, %v1402_v52  ;;  %vm1414_vm4 = vweird.f32 %v1274_v39  ;;  %v1420_v7 = vand.u32 2147483648, %v1274_v39 }
 0x3ee   : > { %5445 = vrcp.f32 %v7422_v2  ;;  %v1536_v15 = vmul.f32 %v7222_v23, %v1407_v13  ;;  %v1418_v13 = vand.u32 2147483647, %v1274_v39  ;;  %vm1429_vm5 = vweird.f32 %v7425_v22 }
 0x3ef   : > { %5447 = vrcp.f32 %v1274_v39  ;;  %v1435_v53 = vand.u32 2147483648, %v7425_v22  ;;  %v1421_v4 = vor.u32 1.1754944e-38, %v1420_v7  ;;  %vm1459_vm9 = vweird.f32 %v7422_v2 }
 0x3f0   : > { %5449 = vrcp.f32 %v7425_v22  ;;  %1552 = vst [vmem:[%s7303_s21 + $0x38] sm:$0xff] %v1536_v15  ;;  %v1564_v29 = vpack.c.bf16 %v1536_v15, %v1535_v10  ;;  %v1433_v15 = vand.u32 2147483647, %v7425_v22  ;;  %vm7462_vm10 = vcmp.eq.f32.partialorder %v1418_v13, 8.507059e+37 }
 0x3f1   : > { %5451 = vpow2.f32 %v2557_v1  ;;  %v1436_v7 = vor.u32 1.1754944e-38, %v1435_v53 }
 0x3f2   : > { %vm7466_vm11 = vcmp.eq.f32.partialorder %v1433_v15, 8.507059e+37 }
 0x3f3   : > { %1600 = vmatmul.bf16.gmra.mxu0 %v1564_v29 }
 0x3f4   : > { %v7432_v58 = vpop.eup %5445  ;;  %v1826_v44 = vpop.xlane.xlu2 %1825 }
 0x3f5   : > { %v5448_v40 = vpop.eup %5447  ;;  %v1455_v60 = vmul.f32 %v7432_v58, %v7422_v2  ;;  %v7436_v37 = vpop.xlane.xlu0 %1281  ;;  %v1846_v26 = vsub.f32 %v7256_v33, %v1826_v44  ;;  %vm1460_vm6 = vweird.f32 %v7432_v58 }
 0x3f6   : > { %v5450_v23 = vpop.eup %5449  ;;  %v1410_v30 = vmul.f32 %v5448_v40, %v1274_v39  ;;  %5453 = vrcp.f32 %v7436_v37  ;;  %v7441_v10 = vpop.xlane.xlu1 %2521  ;;  %vm1415_vm7 = vweird.f32 %v5448_v40  ;;  %vm7472_vm12 = vmor %vm1459_vm9, %vm1460_vm6  ;;  %vm1474_vm0 = vweird.f32 %v7436_v37 }
 0x3f7   : > { %8923 = vst [vmem:[#allocation39_spill] sm:$0xff] %v7441_v10  ;;  %v1456_v45 = vsub.f32 1.0, %v1455_v60  ;;  %v1425_v36 = vmul.f32 %v5450_v23, %v7425_v22  ;;  %v1873_v29 = vmul.f32 1.442695, %v1846_v26  ;;  %v1463_v60 = vand.u32 2147483647, %v7422_v2  ;;  %v7452_v33 = vpop.eup %5451  ;;  %vm1416_vm13 = vmor %vm1414_vm4, %vm1415_vm7 }
 0x3f8   : > { %v1411_v52 = vsub.f32 1.0, %v1410_v30  ;;  %v1465_v10 = vand.u32 2147483648, %v7422_v2  ;;  %vm1430_vm8 = vweird.f32 %v5450_v23  ;;  %v1480_v39 = vand.u32 2147483648, %v7436_v37 }
 0x3f9   : > { %v1426_v1 = vsub.f32 1.0, %v1425_v36  ;;  %v1457_v35 = vmul.f32 %v7432_v58, %v1456_v45  ;;  %5455 = vpow2.f32 %v1873_v29  ;;  %vm7479_vm14 = vcmp.eq.f32.partialorder %v1463_v60, 8.507059e+37  ;;  %vm1431_vm15 = vmor %vm1429_vm5, %vm1430_vm8 }
 0x3fa   : > { %v1412_v18 = vmul.f32 %v5448_v40, %v1411_v52  ;;  %v1466_v15 = vor.u32 1.1754944e-38, %v1465_v10 }
 0x3fb   : > { %v1427_v44 = vmul.f32 %v5450_v23, %v1426_v1  ;;  %v1458_v30 = vadd.f32 %v7432_v58, %v1457_v35  ;;  %v1481_v35 = vor.u32 1.1754944e-38, %v1480_v39 }
 0x3fc   : > { %v7455_v36 = vpop.eup %5453  ;;  %v1413_v26 = vadd.f32 %v5448_v40, %v1412_v18  ;;  %v1828_v9 = vpop.xlane.xlu2 %1827 }
 0x3fd   : > { %v1470_v45 = vmul.f32 %v7455_v36, %v7436_v37  ;;  %v7460_v52 = vpop.xlane.xlu0 %1883  ;;  %v1428_v1 = vadd.f32 %v5450_v23, %v1427_v44  ;;  %v1847_v44 = vsub.f32 %v7268_v42, %v1828_v9  ;;  %v1462_v61 = vsel %vm7472_vm12, %v7432_v58, %v1458_v30 }
 0x3fe   : > { %5457 = vrcp.f32 %v7460_v52  ;;  %v1830_v2 = vpop.xlane.xlu1 %1829  ;;  %v1417_v17 = vsel %vm1416_vm13, %v5448_v40, %v1413_v26  ;;  %vm1475_vm2 = vweird.f32 %v7455_v36  ;;  %vm1920_vm6 = vweird.f32 %v7460_v52 }
 0x3ff   : > { %v1471_v29 = vsub.f32 1.0, %v1470_v45  ;;  %v1422_v53 = vsel %vm7462_vm10, %v1421_v4, %v1417_v17  ;;  %v1432_v10 = vsel %vm1431_vm15, %v5450_v23, %v1428_v1  ;;  %v7494_v60 = vpop.eup %5455  ;;  %v1875_v9 = vmul.f32 1.442695, %v1847_v44  ;;  %vm7514_vm3 = vmor %vm1474_vm0, %vm1475_vm2 }
 0x400   : > { %v1437_v22 = vsel %vm7466_vm11, %v1436_v7, %v1432_v10  ;;  %1905 = vadd.xlane.f32.xlu2 %v7494_v60  ;;  %v1537_v58 = vmul.f32 %v7241_v31, %v1422_v53  ;;  %v1467_v17 = vsel %vm7479_vm14, %v1466_v15, %v1462_v61  ;;  %v1478_v4 = vand.u32 2147483647, %v7436_v37  ;;  %v7539_v15 = vpop.f32.mrf.mxu1 }
 0x401   : > { %v1472_v42 = vmul.f32 %v7455_v36, %v1471_v29  ;;  %v1538_v19 = vmul.f32 %v7247_v56, %v1437_v22  ;;  %5459 = vpow2.f32 %v1875_v9  ;;  %v1848_v40 = vsub.f32 %v7272_v21, %v1830_v2 }
 0x402   : > { %v7508_v23 = vmul.f32 %v7245_v34, %v1467_v17  ;;  %1553 = vst [vmem:[%s7303_s21 + $0x40] sm:$0xff] %v1537_v58  ;;  %v1845_v56 = vsub.f32 %v7231_v27, %v7409_v43  ;;  %vm1479_vm4 = vcmp.eq.f32.partialorder %v1478_v4, 8.507059e+37 }
 0x403   : > { %v1473_v30 = vadd.f32 %v7455_v36, %v1472_v42  ;;  %v1565_v45 = vpack.c.bf16 %v1538_v19, %v1537_v58  ;;  %1554 = vst [vmem:[%s7303_s21 + $0x48] sm:$0xff] %v1538_v19  ;;  %v1877_v43 = vmul.f32 1.442695, %v1848_v40 }
 0x404   : > { %v5458_v26 = vpop.eup %5457  ;;  %v7524_v61 = vpop.xlane.xlu2 %1277  ;;  %1556 = vst [vmem:[%s7303_s21 + $0x58] sm:$0xff] %v7508_v23  ;;  %v1871_v7 = vmul.f32 1.442695, %v1845_v56 }
 0x405   : > { %v1916_v21 = vmul.f32 %v5458_v26, %v7460_v52  ;;  %v7522_v34 = vpop.xlane.xlu0 %3195  ;;  %v1477_v1 = vsel %vm7514_vm3, %v7455_v36, %v1473_v30  ;;  %1605 = vmatmul.bf16.gmra.mxu0 %v1565_v45  ;;  %5461 = vrcp.f32 %v7524_v61  ;;  %2589 = vadd.xlane.f32.xlu1 %v7452_v33  ;;  %vm1921_vm5 = vweird.f32 %v5458_v26 }
 0x406   : > { %v1832_v37 = vpop.xlane.xlu1 %1831  ;;  %5463 = vpow2.f32 %v7438_v5  ;;  %v1482_v18 = vsel %vm1479_vm4, %v1481_v35, %v1477_v1  ;;  %v1926_v5 = vand.u32 2147483648, %v7460_v52  ;;  %vm7551_vm7 = vmor %vm1920_vm6, %vm1921_vm5  ;;  %v1450_v35 = vand.u32 2147483648, %v7524_v61 }
 0x407   : > { %v1917_v27 = vsub.f32 1.0, %v1916_v21  ;;  %v7535_v2 = vmul.f32 %v7258_v38, %v1482_v18  ;;  %v7537_v36 = vpop.eup %5459  ;;  %5465 = vpow2.f32 %v1877_v43  ;;  %v1924_v38 = vand.u32 2147483647, %v7460_v52 }
 0x408   : > { %1907 = vadd.xlane.f32.xlu0 %v7537_v36  ;;  %5467 = vpow2.f32 %v1871_v7  ;;  %v1849_v42 = vsub.f32 %v7285_v50, %v1832_v37  ;;  %v1927_v19 = vor.u32 1.1754944e-38, %v1926_v5  ;;  %v3166_v1 = vpop.f32.mrf.mxu1  ;;  %vm1444_vm10 = vweird.f32 %v7524_v61 }
 0x409   : > { %v1918_v13 = vmul.f32 %v5458_v26, %v1917_v27  ;;  %1557 = vst [vmem:[%s7303_s21 + $0x60] sm:$0xff] %v7535_v2  ;;  %vm1925_vm8 = vcmp.eq.f32.partialorder %v1924_v38, 8.507059e+37  ;;  %v1448_v18 = vand.u32 2147483647, %v7524_v61  ;;  %v7610_v38 = vmul.f32 0.17677669, %v3166_v1 }
 0x40a   : > { %v1879_v30 = vmul.f32 1.442695, %v1849_v42  ;;  %v3227_v53 = vsub.f32 %v7281_v16, %v7522_v34  ;;  %v1451_v42 = vor.u32 1.1754944e-38, %v1450_v35 }
 0x40b   : > { %v1919_v29 = vadd.f32 %v5458_v26, %v1918_v13  ;;  %v7545_v44 = vpop.eup %5461  ;;  %vm1449_vm12 = vcmp.eq.f32.partialorder %v1448_v18, 8.507059e+37 }
 0x40c   : > { %v7549_v39 = vpop.eup %5463  ;;  %v1440_v10 = vmul.f32 %v7545_v44, %v7524_v61  ;;  %v1834_v22 = vpop.xlane.xlu2 %1833  ;;  %vm1445_vm9 = vweird.f32 %v7545_v44  ;;  %v3243_v1 = vmul.f32 1.442695, %v3227_v53 }
 0x40d   : > { %v7558_v9 = vpop.xlane.xlu0 %1885  ;;  %1901 = vadd.xlane.f32.xlu1 %v7549_v39  ;;  %v1923_v58 = vsel %vm7551_vm7, %v5458_v26, %v1919_v29  ;;  %v1850_v4 = vsub.f32 %v7294_v48, %v1834_v22  ;;  %v7568_v50 = vpop.eup %5465  ;;  %vm7602_vm11 = vmor %vm1444_vm10, %vm1445_vm9 }
 0x40e   : > { %5469 = vrcp.f32 %v7558_v9  ;;  %v7562_v52 = vpop.xlane.xlu1 %1283  ;;  %v1441_v17 = vsub.f32 1.0, %v1440_v10  ;;  %v1928_v31 = vsel %vm1925_vm8, %v1927_v19, %v1923_v58  ;;  %v7575_v26 = vpop.eup %5467  ;;  %v1939_v19 = vand.u32 2147483647, %v7558_v9 }
 0x40f   : > { %5471 = vrcp.f32 %v7562_v52  ;;  %v1881_v45 = vmul.f32 1.442695, %v1850_v4  ;;  %v7573_v56 = vmul.f32 %v7270_v63, %v1928_v31  ;;  %vm1935_vm15 = vweird.f32 %v7558_v9 }
 0x410   : > { %v1442_v40 = vmul.f32 %v7545_v44, %v1441_v17  ;;  %1909 = vadd.xlane.f32.xlu0 %v7568_v50  ;;  %v1941_v17 = vand.u32 2147483648, %v7558_v9  ;;  %vm1489_vm0 = vweird.f32 %v7562_v52  ;;  %vm1940_vm3 = vcmp.eq.f32.partialorder %v1939_v19, 8.507059e+37 }
 0x411   : > { %5473 = vpow2.f32 %v1881_v45  ;;  %4930 = vst [vmem:[%s7303_s21 + $0x80] sm:$0xff] %v7573_v56 }
 0x412   : > { %v1443_v48 = vadd.f32 %v7545_v44, %v1442_v40  ;;  %5475 = vpow2.f32 %v1879_v30  ;;  %v1495_v30 = vand.u32 2147483648, %v7562_v52  ;;  %v1942_v29 = vor.u32 1.1754944e-38, %v1941_v17 }
 0x414   : > { %v7579_v21 = vpop.eup %5469  ;;  %v7589_v27 = vpop.xlane.xlu2 %1285  ;;  %v1447_v61 = vsel %vm7602_vm11, %v7545_v44, %v1443_v48  ;;  %v1493_v44 = vand.u32 2147483647, %v7562_v52  ;;  %v7632_v48 = vmul.f32 0.17677669, %v7539_v15 }
 0x415   : > { %v7584_v37 = vpop.eup %5471  ;;  %v1931_v63 = vmul.f32 %v7579_v21, %v7558_v9  ;;  %v7591_v43 = vpop.xlane.xlu0 %1287  ;;  %5477 = vrcp.f32 %v7589_v27  ;;  %1903 = vadd.xlane.f32.xlu1 %v7575_v26  ;;  %v1452_v16 = vsel %vm1449_vm12, %v1451_v42, %v1447_v61  ;;  %vm1936_vm13 = vweird.f32 %v7579_v21 }
 0x416   : > { %v1485_v7 = vmul.f32 %v7584_v37, %v7562_v52  ;;  %v7598_v13 = vpop.xlane.xlu1 %3197  ;;  %5479 = vrcp.f32 %v7591_v43  ;;  %v1539_v45 = vmul.f32 %v7283_v6, %v1452_v16  ;;  %vm1490_vm14 = vweird.f32 %v7584_v37  ;;  %vm7648_vm2 = vmor %vm1935_vm15, %vm1936_vm13 }
 0x417   : > { %v1932_v5 = vsub.f32 1.0, %v1931_v63  ;;  %v7614_v22 = vpop.eup %5473  ;;  %vm1491_vm4 = vmor %vm1489_vm0, %vm1490_vm14  ;;  %vm1494_vm5 = vcmp.eq.f32.partialorder %v1493_v44, 8.507059e+37  ;;  %vm1504_vm6 = vweird.f32 %v7589_v27  ;;  %v1510_v44 = vand.u32 2147483648, %v7589_v27 }
 0x418   : > { %v1486_v10 = vsub.f32 1.0, %v1485_v7  ;;  %1913 = vadd.xlane.f32.xlu2 %v7614_v22  ;;  %3217 = vmax.xlane.f32.xlu0 %v7610_v38  ;;  %v7623_v34 = vpop.eup %5475  ;;  %1555 = vst [vmem:[%s7303_s21 + $0x50] sm:$0xff] %v1539_v45  ;;  %v1566_v6 = vpack.c.bf16 %v7508_v23, %v1539_v45  ;;  %v1496_v23 = vor.u32 1.1754944e-38, %v1495_v30  ;;  %v1525_v30 = vand.u32 2147483648, %v7591_v43 }
 0x419   : > { %v1933_v58 = vmul.f32 %v7579_v21, %v1932_v5  ;;  %vm1519_vm10 = vweird.f32 %v7591_v43  ;;  %v1511_v15 = vor.u32 1.1754944e-38, %v1510_v44 }
 0x41a   : > { %v1487_v4 = vmul.f32 %v7584_v37, %v1486_v10  ;;  %1610 = vmatmul.bf16.gmra.mxu0 %v1566_v6 }
 0x41b   : > { %v1934_v40 = vadd.f32 %v7579_v21, %v1933_v58  ;;  %v7629_v31 = vpop.eup %5477 }
 0x41c   : > { %v1488_v35 = vadd.f32 %v7584_v37, %v1487_v4  ;;  %v7636_v63 = vpop.eup %5479  ;;  %v1500_v18 = vmul.f32 %v7629_v31, %v7589_v27  ;;  %v7644_v7 = vpop.xlane.xlu2 %1887  ;;  %vm1505_vm7 = vweird.f32 %v7629_v31 }
 0x41d   : > { %v1515_v9 = vmul.f32 %v7636_v63, %v7591_v43  ;;  %5481 = vrcp.f32 %v7644_v7  ;;  %1911 = vadd.xlane.f32.xlu1 %v7623_v34  ;;  %v1938_v61 = vsel %vm7648_vm2, %v7579_v21, %v1934_v40  ;;  %vm1520_vm8 = vweird.f32 %v7636_v63  ;;  %vm7686_vm9 = vmor %vm1504_vm6, %vm1505_vm7 }
 0x41e   : > { %v7656_v52 = vpop.xlane.xlu1 %3199  ;;  %v1501_v5 = vsub.f32 1.0, %v1500_v18  ;;  %v1943_v10 = vsel %vm1940_vm3, %v1942_v29, %v1938_v61  ;;  %v1492_v42 = vsel %vm1491_vm4, %v7584_v37, %v1488_v35  ;;  %v1508_v40 = vand.u32 2147483647, %v7589_v27  ;;  %vm7699_vm11 = vmor %vm1519_vm10, %vm1520_vm8 }
 0x41f   : > { %v1516_v53 = vsub.f32 1.0, %v1515_v9  ;;  %v2156_v17 = vmul.f32 %v7297_v24, %v1943_v10  ;;  %v1497_v4 = vsel %vm1494_vm5, %v1496_v23, %v1492_v42  ;;  %5483 = vpow2.f32 %v3243_v1 }
 0x420   : > { %v1502_v58 = vmul.f32 %v7629_v31, %v1501_v5  ;;  %v1586_v19 = vpop.f32.mrf.mxu0  ;;  %v7673_v21 = vmul.f32 %v7299_v49, %v1497_v4  ;;  %v1523_v18 = vand.u32 2147483647, %v7591_v43  ;;  %v3228_v27 = vsub.f32 %v7315_v14, %v7598_v13 }
 0x421   : > { %v1517_v16 = vmul.f32 %v7636_v63, %v1516_v53  ;;  %1626 = vst.msk [vmem:[#allocation2] sm:$0xff] %vm1063_vm1, %v1586_v19  ;;  %v2188_v24 = vpack.c.bf16 %v2156_v17, %v7573_v56  ;;  %vm1509_vm12 = vcmp.eq.f32.partialorder %v1508_v40, 8.507059e+37  ;;  %v1526_v13 = vor.u32 1.1754944e-38, %v1525_v30 }
 0x422   : > { %v1503_v37 = vadd.f32 %v7629_v31, %v1502_v58  ;;  %4931 = vst [vmem:[%s7303_s21 + $0x88] sm:$0xff] %v2156_v17  ;;  %vm1524_vm13 = vcmp.eq.f32.partialorder %v1523_v18, 8.507059e+37  ;;  %v3245_v53 = vmul.f32 1.442695, %v3228_v27  ;;  %v1956_v4 = vand.u32 2147483648, %v7644_v7 }
 0x423   : > { %v7680_v45 = vpop.eup %5481  ;;  %v1518_v49 = vadd.f32 %v7636_v63, %v1517_v16  ;;  %v7693_v6 = vpop.xlane.xlu0 %2583  ;;  %1558 = vst [vmem:[%s7303_s21 + $0x68] sm:$0xff] %v7673_v21  ;;  %2236 = vmatmul.bf16.vlgmr.msrb.gmra.mxu2 %v2188_v24  ;;  %vm1950_vm15 = vweird.f32 %v7644_v7  ;;  %v1567_v40 = vpack.c.bf16 %v7673_v21, %v7535_v2 }
 0x424   : > { %v1946_v1 = vmul.f32 %v7680_v45, %v7644_v7  ;;  %5485 = vrcp.f32 %v7693_v6  ;;  %v3202_v43 = vpop.xlane.xlu2 %3201  ;;  %v1507_v23 = vsel %vm7686_vm9, %v7629_v31, %v1503_v37  ;;  %vm1951_vm14 = vweird.f32 %v7680_v45 }
 0x425   : > { %v3230_v29 = vsub.f32 %v7333_v59, %v3202_v43  ;;  %3215 = vmax.xlane.f32.xlu1 %v7632_v48  ;;  %v1522_v14 = vsel %vm7699_vm11, %v7636_v63, %v1518_v49  ;;  %v1512_v61 = vsel %vm1509_vm12, %v1511_v15, %v1507_v23  ;;  %v7723_v19 = vpop.eup %5483  ;;  %vm7747_vm0 = vmor %vm1950_vm15, %vm1951_vm14  ;;  %v2626_v2 = vand.u32 2147483648, %v7693_v6 }
 0x426   : > { %v7710_v9 = vpop.xlane.xlu1 %1889  ;;  %v1947_v5 = vsub.f32 1.0, %v1946_v1  ;;  %v1527_v58 = vsel %vm1524_vm13, %v1526_v13, %v1522_v14  ;;  %v7721_v31 = vmul.f32 %v7309_v46, %v1512_v61  ;;  %v1954_v46 = vand.u32 2147483647, %v7644_v7  ;;  %v2472_v7 = vpop.f32.mrf.mxu3 }
 0x427   : > { %5487 = vrcp.f32 %v7710_v9  ;;  %v3249_v59 = vmul.f32 1.442695, %v3230_v29  ;;  %v7727_v63 = vmul.f32 %v7312_v54, %v1527_v58  ;;  %v3229_v54 = vsub.f32 %v7325_v12, %v7656_v52 }
 0x428   : > { %v1948_v10 = vmul.f32 %v7680_v45, %v1947_v5  ;;  %v1588_v42 = vpop.f32.mrf.mxu0  ;;  %1559 = vst [vmem:[%s7303_s21 + $0x70] sm:$0xff] %v7721_v31  ;;  %vm1955_vm2 = vcmp.eq.f32.partialorder %v1954_v46, 8.507059e+37  ;;  %v1957_v52 = vor.u32 1.1754944e-38, %v1956_v4  ;;  %v2624_v27 = vand.u32 2147483647, %v7693_v6 }
 0x429   : > { %5489 = vpow2.f32 %v3249_v59  ;;  %1627 = vst.msk [vmem:[#allocation2 + $0x8] sm:$0xff] %vm1063_vm1, %v1588_v42  ;;  %v7765_v43 = vmul.f32 0.17677669, %v2472_v7  ;;  %vm2620_vm4 = vweird.f32 %v7693_v6  ;;  %v2627_v13 = vor.u32 1.1754944e-38, %v2626_v2 }
 0x42a   : > { %v5486_v17 = vpop.eup %5485  ;;  %v1949_v44 = vadd.f32 %v7680_v45, %v1948_v10  ;;  %1560 = vst [vmem:[%s7303_s21 + $0x78] sm:$0xff] %v7727_v63  ;;  %5491 = vpow2.f32 %v3245_v53  ;;  %1615 = vmatmul.bf16.gmra.mxu0 %v1567_v40  ;;  %v1971_v5 = vand.u32 2147483648, %v7710_v9  ;;  %v1969_v59 = vand.u32 2147483647, %v7710_v9 }
 0x42b   : > { %v2616_v16 = vmul.f32 %v5486_v17, %v7693_v6  ;;  %vm2621_vm3 = vweird.f32 %v5486_v17  ;;  %vm2625_vm6 = vcmp.eq.f32.partialorder %v2624_v27, 8.507059e+37  ;;  %v2540_v42 = vsub.f32 %v7197_v32, %v7385_v62  ;;  %v7821_v27 = vpop.xlane.xlu0 %3205 }
 0x42c   : > { %v7745_v30 = vpop.xlane.xlu2 %1891  ;;  %v1953_v12 = vsel %vm7747_vm0, %v7680_v45, %v1949_v44  ;;  %v3247_v45 = vmul.f32 1.442695, %v3229_v54  ;;  %vm2622_vm5 = vmor %vm2620_vm4, %vm2621_vm3  ;;  %v2539_v58 = vsub.f32 %v7211_v41, %v7387_v57  ;;  %vm1965_vm8 = vweird.f32 %v7710_v9 }
 0x42d   : > { %v7739_v37 = vpop.eup %5487  ;;  %v2617_v35 = vsub.f32 1.0, %v2616_v16  ;;  %5493 = vrcp.f32 %v7745_v30  ;;  %3275 = vadd.xlane.f32.xlu1 %v7723_v19  ;;  %v1958_v15 = vsel %vm1955_vm2, %v1957_v52, %v1953_v12  ;;  %vm1970_vm10 = vcmp.eq.f32.partialorder %v1969_v59, 8.507059e+37 }
 0x42e   : > { %v1961_v49 = vmul.f32 %v7739_v37, %v7710_v9  ;;  %v7755_v18 = vpop.xlane.xlu1 %2585  ;;  %v2157_v61 = vmul.f32 %v7323_v25, %v1958_v15  ;;  %vm1966_vm7 = vweird.f32 %v7739_v37  ;;  %v1972_v57 = vor.u32 1.1754944e-38, %v1971_v5 }
 0x42f   : > { %5495 = vrcp.f32 %v7755_v18  ;;  %v7762_v21 = vpop.eup %5489  ;;  %v2618_v56 = vmul.f32 %v5486_v17, %v2617_v35  ;;  %vm1967_vm9 = vmor %vm1965_vm8, %vm1966_vm7  ;;  %v2639_v46 = vand.u32 2147483647, %v7755_v18  ;;  %v2641_v40 = vand.u32 2147483648, %v7755_v18 }
 0x430   : > { %v1962_v1 = vsub.f32 1.0, %v1961_v49  ;;  %3281 = vadd.xlane.f32.xlu0 %v7762_v21  ;;  %3588 = vrot.lane.b32.xlu2 %v6813_v55, %s6014_s22  ;;  %v7772_v14 = vpop.eup %5491  ;;  %4932 = vst [vmem:[%s7303_s21 + $0x90] sm:$0xff] %v2157_v61  ;;  %5497 = vpow2.f32 %v3247_v45  ;;  %v1984_v49 = vand.u32 2147483647, %v7745_v30  ;;  %v2561_v12 = vmul.f32 1.442695, %v2540_v42 }
 0x431   : > { %v2619_v29 = vadd.f32 %v5486_v17, %v2618_v56  ;;  %vm1980_vm13 = vweird.f32 %v7745_v30  ;;  %v2474_v56 = vpop.f32.mrf.mxu3  ;;  %vm2635_vm14 = vweird.f32 %v7755_v18  ;;  %vm2640_vm2 = vcmp.eq.f32.partialorder %v2639_v46, 8.507059e+37 }
 0x432   : > { %v1963_v23 = vmul.f32 %v7739_v37, %v1962_v1  ;;  %vm1985_vm3 = vcmp.eq.f32.partialorder %v1984_v49, 8.507059e+37  ;;  %v7851_v59 = vmul.f32 0.17677669, %v2474_v56 }
 0x433   : > { %v7777_v53 = vpop.eup %5493  ;;  %v2623_v10 = vsel %vm2622_vm5, %v5486_v17, %v2619_v29 }
 0x434   : > { %v1964_v6 = vadd.f32 %v7739_v37, %v1963_v23  ;;  %v2628_v4 = vsel %vm2625_vm6, %v2627_v13, %v2623_v10  ;;  %v1976_v25 = vmul.f32 %v7777_v53, %v7745_v30  ;;  %v7789_v44 = vpop.xlane.xlu2 %3203  ;;  %vm1981_vm11 = vweird.f32 %v7777_v53 }
 0x435   : > { %v7781_v55 = vpop.eup %5495  ;;  %v7793_v17 = vmul.f32 %v7331_v51, %v2628_v4  ;;  %3277 = vadd.xlane.f32.xlu1 %v7772_v14  ;;  %v1986_v51 = vand.u32 2147483648, %v7745_v30  ;;  %vm7830_vm15 = vmor %vm1980_vm13, %vm1981_vm11 }
 0x436   : > { %v2631_v32 = vmul.f32 %v7781_v55, %v7755_v18  ;;  %v7799_v41 = vpop.xlane.xlu1 %1893  ;;  %v1977_v62 = vsub.f32 1.0, %v1976_v25  ;;  %v1968_v16 = vsel %vm1967_vm9, %v7739_v37, %v1964_v6  ;;  %vm2636_vm12 = vweird.f32 %v7781_v55  ;;  %v7819_v52 = vpop.eup %5497 }
 0x437   : > { %5499 = vrcp.f32 %v7799_v41  ;;  %4954 = vst [vmem:[%s7303_s21 + $0x100] sm:$0xff] %v7793_v17  ;;  %v1973_v24 = vsel %vm1970_vm10, %v1972_v57, %v1968_v16  ;;  %v2559_v37 = vmul.f32 1.442695, %v2539_v58  ;;  %vm7836_vm0 = vmor %vm2635_vm14, %vm2636_vm12  ;;  %v2642_v18 = vor.u32 1.1754944e-38, %v2641_v40 }
 0x438   : > { %v2632_v9 = vsub.f32 1.0, %v2631_v32  ;;  %v1978_v54 = vmul.f32 %v7777_v53, %v1977_v62  ;;  %2523 = vmax.xlane.f32.xlu0 %v7765_v43  ;;  %v2158_v35 = vmul.f32 %v7336_v0, %v1973_v24  ;;  %v1568_v0 = vpack.c.bf16 %v7727_v63, %v7721_v31 }
 0x439   : > { %v1987_v63 = vor.u32 1.1754944e-38, %v1986_v51  ;;  %v2001_v4 = vand.u32 2147483648, %v7799_v41  ;;  %v1999_v25 = vand.u32 2147483647, %v7799_v41  ;;  %vm1995_vm5 = vweird.f32 %v7799_v41 }
 0x43a   : > { %v2633_v7 = vmul.f32 %v7781_v55, %v2632_v9  ;;  %v1979_v2 = vadd.f32 %v7777_v53, %v1978_v54  ;;  %4933 = vst [vmem:[%s7303_s21 + $0x98] sm:$0xff] %v2158_v35  ;;  %v2189_v15 = vpack.c.bf16 %v2158_v35, %v2157_v61  ;;  %v3169_v61 = vpop.f32.mrf.mxu1  ;;  %1620 = vmatmul.bf16.gmra.mxu0 %v1568_v0  ;;  %v8952_v0 = vld [vmem:[#allocation29_spill] sm:$0xff] }
 0x43b   : > { %v2541_v9 = vsub.f32 %v7213_v11, %v7399_v20  ;;  %v2002_v46 = vor.u32 1.1754944e-38, %v2001_v4  ;;  %vm2000_vm7 = vcmp.eq.f32.partialorder %v1999_v25, 8.507059e+37  ;;  %v8951_v20 = vld [vmem:[#allocation30_spill] sm:$0xff] }
 0x43c   : > { %v2634_v1 = vadd.f32 %v7781_v55, %v2633_v7  ;;  %v7840_v23 = vpop.xlane.xlu2 %2587  ;;  %v1983_v31 = vsel %vm7830_vm15, %v7777_v53, %v1979_v2  ;;  %2241 = vmatmul.bf16.gmra.mxu2 %v2189_v15 }
 0x43d   : > { %v5500_v45 = vpop.eup %5499  ;;  %5501 = vrcp.f32 %v7840_v23  ;;  %3279 = vadd.xlane.f32.xlu1 %v7819_v52  ;;  %v1988_v10 = vsel %vm1985_vm3, %v1987_v63, %v1983_v31  ;;  %v2656_v7 = vand.u32 2147483648, %v7840_v23  ;;  %v2654_v11 = vand.u32 2147483647, %v7840_v23 }
 0x43e   : > { %v2638_v13 = vsel %vm7836_vm0, %v7781_v55, %v2634_v1  ;;  %v1991_v5 = vmul.f32 %v5500_v45, %v7799_v41  ;;  %5503 = vpow2.f32 %v2561_v12  ;;  %v2159_v42 = vmul.f32 %v7345_v3, %v1988_v10  ;;  %v8950_v41 = vld [vmem:[#allocation28_spill] sm:$0xff] }
 0x43f   : > { %v2643_v53 = vsel %vm2640_vm2, %v2642_v18, %v2638_v13  ;;  %5505 = vpow2.f32 %v2559_v37  ;;  %vm1996_vm4 = vweird.f32 %v5500_v45  ;;  %v3232_v24 = vsub.f32 %v8950_v41, %v7821_v27 }
 0x440   : > { %v7854_v6 = vmul.f32 %v7343_v28, %v2643_v53  ;;  %v1992_v55 = vsub.f32 1.0, %v1991_v5  ;;  %2525 = vmax.xlane.f32.xlu0 %v7851_v59  ;;  %4934 = vst [vmem:[%s7303_s21 + $0xa0] sm:$0xff] %v2159_v42  ;;  %vm1997_vm6 = vmor %vm1995_vm5, %vm1996_vm4  ;;  %v2563_v2 = vmul.f32 1.442695, %v2541_v9  ;;  %v3231_v27 = vsub.f32 %v8952_v0, %v7789_v44  ;;  %v8956_v0 = vld [vmem:[#allocation32_spill] sm:$0xff] }
 0x441   : > { %vm2650_vm9 = vweird.f32 %v7840_v23  ;;  %v2657_v31 = vor.u32 1.1754944e-38, %v2656_v7  ;;  %v3253_v13 = vmul.f32 1.442695, %v3232_v24  ;;  %vm2655_vm11 = vcmp.eq.f32.partialorder %v2654_v11, 8.507059e+37 }
 0x442   : > { %4955 = vst [vmem:[%s7303_s21 + $0x108] sm:$0xff] %v7854_v6  ;;  %v1993_v58 = vmul.f32 %v5500_v45, %v1992_v55  ;;  %v3171_v49 = vpop.f32.mrf.mxu1  ;;  %v7905_v53 = vmul.f32 0.17677669, %v3169_v61 }
 0x443   : > { %v5502_v32 = vpop.eup %5501  ;;  %v7863_v62 = vpop.xlane.xlu0 %1897  ;;  %v7892_v29 = vmul.f32 0.17677669, %v3171_v49 }
 0x444   : > { %v1994_v28 = vadd.f32 %v5500_v45, %v1993_v58  ;;  %v7865_v57 = vpop.eup %5503  ;;  %v2646_v3 = vmul.f32 %v5502_v32, %v7840_v23  ;;  %5507 = vrcp.f32 %v7863_v62  ;;  %v7870_v51 = vpop.xlane.xlu2 %1895  ;;  %vm2651_vm8 = vweird.f32 %v5502_v32 }
 0x445   : > { %5509 = vrcp.f32 %v7870_v51  ;;  %2593 = vadd.xlane.f32.xlu1 %v7865_v57  ;;  %v7876_v40 = vpop.eup %5505  ;;  %vm7894_vm10 = vmor %vm2650_vm9, %vm2651_vm8  ;;  %v3251_v58 = vmul.f32 1.442695, %v3231_v27  ;;  %v2031_v61 = vand.u32 2147483648, %v7863_v62  ;;  %vm2025_vm13 = vweird.f32 %v7863_v62 }
 0x446   : > { %v2647_v16 = vsub.f32 1.0, %v2646_v3  ;;  %v1998_v54 = vsel %vm1997_vm6, %v5500_v45, %v1994_v28  ;;  %5511 = vpow2.f32 %v2563_v2  ;;  %v2888_v3 = vpack.c.bf16 %v7854_v6, %v7793_v17 }
 0x447   : > { %v2003_v35 = vsel %vm2000_vm7, %v2002_v46, %v1998_v54  ;;  %5513 = vpow2.f32 %v3253_v13  ;;  %v2016_v46 = vand.u32 2147483648, %v7870_v51  ;;  %v2014_v17 = vand.u32 2147483647, %v7870_v51 }
 0x448   : > { %v2648_v12 = vmul.f32 %v5502_v32, %v2647_v16  ;;  %2591 = vadd.xlane.f32.xlu0 %v7876_v40  ;;  %v2160_v37 = vmul.f32 %v8951_v20, %v2003_v35  ;;  %v1591_v56 = vpop.f32.mrf.mxu0  ;;  %5515 = vpow2.f32 %v3251_v58  ;;  %vm2010_vm0 = vweird.f32 %v7870_v51 }
 0x449   : > { %1628 = vst.msk [vmem:[#allocation2 + $0x10] sm:$0xff] %vm1063_vm1, %v1591_v56  ;;  %v2032_v35 = vor.u32 1.1754944e-38, %v2031_v61  ;;  %v2017_v49 = vor.u32 1.1754944e-38, %v2016_v46  ;;  %vm2015_vm4 = vcmp.eq.f32.partialorder %v2014_v17, 8.507059e+37  ;;  %v8955_v56 = vld [vmem:[#allocation31_spill] sm:$0xff] }
 0x44a   : > { %v7884_v1 = vpop.eup %5507  ;;  %v2649_v15 = vadd.f32 %v5502_v32, %v2648_v12  ;;  %v2190_v30 = vpack.c.bf16 %v2160_v37, %v2159_v42  ;;  %4935 = vst [vmem:[%s7303_s21 + $0xa8] sm:$0xff] %v2160_v37  ;;  %v7939_v37 = vpop.f32.mrf.mxu1 }
 0x44b   : > { %v7890_v45 = vpop.eup %5509  ;;  %v2021_v63 = vmul.f32 %v7884_v1, %v7863_v62  ;;  %v3210_v44 = vpop.xlane.xlu0 %3209  ;;  %vm2026_vm12 = vweird.f32 %v7884_v1 }
 0x44c   : > { %v2006_v23 = vmul.f32 %v7890_v45, %v7870_v51  ;;  %v2653_v5 = vsel %vm7894_vm10, %v5502_v32, %v2649_v15  ;;  %2246 = vmatmul.bf16.gmra.mxu2 %v2190_v30  ;;  %v3234_v25 = vsub.f32 %v7389_v8, %v3210_v44  ;;  %v2029_v8 = vand.u32 2147483647, %v7863_v62  ;;  %vm2027_vm15 = vmor %vm2025_vm13, %vm2026_vm12  ;;  %v7931_v24 = vpop.eup %5511  ;;  %v3208_v51 = vpop.xlane.xlu2 %3207  ;;  %v8957_v30 = vld [vmem:[#allocation33_spill] sm:$0xff]  ;;  %v8959_v44 = vld [vmem:[#allocation26_spill] sm:$0xff] }
 0x44d   : > { %v2022_v10 = vsub.f32 1.0, %v2021_v63  ;;  %3221 = vmax.xlane.f32.xlu1 %v7892_v29  ;;  %v2897_v55 = vpop.permute.xlu1 %2896  ;;  %v2658_v42 = vsel %vm2655_vm11, %v2657_v31, %v2653_v5  ;;  %vm2011_vm14 = vweird.f32 %v7890_v45  ;;  %v7937_v20 = vpop.eup %5513  ;;  %v8958_v63 = vld [vmem:[#allocation36_spill] sm:$0xff] }
 0x44e   : > { %v2007_v4 = vsub.f32 1.0, %v2006_v23  ;;  %2927 = vmatpush.bf16.msrb.mxu0 %v2897_v55  ;;  %v7910_v28 = vmul.f32 %v7367_v47, %v2658_v42  ;;  %v2477_v47 = vpop.f32.mrf.mxu3  ;;  %v3257_v54 = vmul.f32 1.442695, %v3234_v25  ;;  %vm2012_vm2 = vmor %vm2010_vm0, %vm2011_vm14  ;;  %vm2030_vm3 = vcmp.eq.f32.partialorder %v2029_v8, 8.507059e+37  ;;  %v7945_v15 = vpop.eup %5515 }
 0x44f   : > { %v2023_v32 = vmul.f32 %v7884_v1, %v2022_v10  ;;  %v2542_v13 = vsub.f32 %v8959_v44, %v8958_v63  ;;  %v7985_v44 = vmul.f32 0.17677669, %v7939_v37 }
 0x450   : > { %v2008_v9 = vmul.f32 %v7890_v45, %v2007_v4  ;;  %3219 = vmax.xlane.f32.xlu0 %v7905_v53  ;;  %4956 = vst [vmem:[%s7303_s21 + $0x110] sm:$0xff] %v7910_v28  ;;  %v1593_v16 = vpop.f32.mrf.mxu0 }
 0x451   : > { %2928 = vmatmul.bf16.vlgmr.msrb.gmra.mxu0 %v2888_v3  ;;  %v2024_v6 = vadd.f32 %v7884_v1, %v2023_v32  ;;  %1629 = vst.msk [vmem:[#allocation2 + $0x18] sm:$0xff] %vm1063_vm1, %v1593_v16  ;;  %v2565_v4 = vmul.f32 1.442695, %v2542_v13 }
 0x452   : > { %v2009_v41 = vadd.f32 %v7890_v45, %v2008_v9  ;;  %v7957_v9 = vmul.f32 0.17677669, %v2477_v47  ;;  %v3176_v46 = vpop.f32.mrf.mxu1  ;;  %v8960_v47 = vld [vmem:[#allocation35_spill] sm:$0xff] }
 0x453   : > { %v1900_v62 = vpop.xlane.xlu0 %1899  ;;  %v2028_v7 = vsel %vm2027_vm15, %v7884_v1, %v2024_v6  ;;  %v7962_v6 = vmul.f32 0.17677669, %v3176_v46 }
 0x454   : > { %5517 = vrcp.f32 %v1900_v62  ;;  %v2013_v12 = vsel %vm2012_vm2, %v7890_v45, %v2009_v41  ;;  %v2033_v11 = vsel %vm2030_vm3, %v2032_v35, %v2028_v7  ;;  %v3233_v45 = vsub.f32 %v8957_v30, %v3208_v51  ;;  %v3212_v8 = vpop.xlane.xlu2 %3211  ;;  %v8961_v35 = vld [vmem:[#allocation34_spill] sm:$0xff] }
 0x455   : > { %2595 = vadd.xlane.f32.xlu1 %v7931_v24  ;;  %5519 = vpow2.f32 %v3257_v54  ;;  %v2018_v2 = vsel %vm2015_vm4, %v2017_v49, %v2013_v12  ;;  %v2162_v1 = vmul.f32 %v8955_v56, %v2033_v11  ;;  %v2046_v25 = vand.u32 2147483648, %v1900_v62  ;;  %v8962_v12 = vld [vmem:[#allocation39_spill] sm:$0xff]  ;;  %v8964_v30 = vld [vmem:[#allocation38_spill] sm:$0xff] }
 0x456   : > { %v2161_v27 = vmul.f32 %v8956_v0, %v2018_v2  ;;  %v2479_v23 = vpop.f32.mrf.mxu3  ;;  %v3255_v55 = vmul.f32 1.442695, %v3233_v45  ;;  %v2044_v61 = vand.u32 2147483647, %v1900_v62  ;;  %vm2040_vm6 = vweird.f32 %v1900_v62 }
 0x457   : > { %4937 = vst [vmem:[%s7303_s21 + $0xb8] sm:$0xff] %v2162_v1  ;;  %v7955_v58 = vmul.f32 0.17677669, %v2479_v23  ;;  %v2047_v17 = vor.u32 1.1754944e-38, %v2046_v25  ;;  %v3235_v54 = vsub.f32 %v8960_v47, %v3212_v8  ;;  %v8965_v23 = vld [vmem:[#allocation37_spill] sm:$0xff] }
 0x458   : > { %3285 = vadd.xlane.f32.xlu0 %v7937_v20  ;;  %4936 = vst [vmem:[%s7303_s21 + $0xb0] sm:$0xff] %v2161_v27  ;;  %v2191_v18 = vpack.c.bf16 %v2162_v1, %v2161_v27  ;;  %5521 = vpow2.f32 %v3255_v55  ;;  %vm2045_vm8 = vcmp.eq.f32.partialorder %v2044_v61, 8.507059e+37 }
 0x459   : > { %3283 = vadd.xlane.f32.xlu2 %v7945_v15  ;;  %5523 = vpow2.f32 %v2565_v4  ;;  %v3259_v56 = vmul.f32 1.442695, %v3235_v54 }
 0x45a   : > { %v5518_v31 = vpop.eup %5517 }
 0x45b   : > { %v2036_v5 = vmul.f32 %v5518_v31, %v1900_v62  ;;  %v7952_v10 = vpop.eup %5519  ;;  %vm2041_vm5 = vweird.f32 %v5518_v31  ;;  %v8963_v62 = vld [vmem:[#allocation27_spill] sm:$0xff]  ;;  %v3214_v51 = vpop.xlane.xlu0 %3213  ;;  %5525 = vpow2.f32 %v3259_v56 }
 0x45c   : > { %2251 = vmatmul.bf16.gmra.mxu2 %v2191_v18  ;;  %vm2042_vm7 = vmor %vm2040_vm6, %vm2041_vm5  ;;  %v2544_v11 = vsub.f32 %v8963_v62, %v8962_v12  ;;  %v3236_v45 = vsub.f32 %v8964_v30, %v3214_v51 }
 0x45d   : > { %v2037_v42 = vsub.f32 1.0, %v2036_v5  ;;  %3289 = vadd.xlane.f32.xlu1 %v7952_v10  ;;  %v8966_v5 = vld [vmem:[#allocation25_spill] sm:$0xff] }
 0x45e   : > { %v7971_v2 = vpop.eup %5521  ;;  %v2482_v27 = vpop.f32.mrf.mxu3  ;;  %v2569_v18 = vmul.f32 1.442695, %v2544_v11  ;;  %v3261_v63 = vmul.f32 1.442695, %v3236_v45  ;;  %v2543_v55 = vsub.f32 %v8966_v5, %v8965_v23 }
 0x45f   : > { %v2038_v32 = vmul.f32 %v5518_v31, %v2037_v42  ;;  %v7975_v0 = vpop.eup %5523 }
 0x460   : > { %v1596_v3 = vpop.f32.mrf.mxu0  ;;  %2529 = vmax.xlane.f32.xlu0 %v7955_v58  ;;  %5527 = vpow2.f32 %v2569_v18  ;;  %v2567_v25 = vmul.f32 1.442695, %v2543_v55 }
 0x461   : > { %1630 = vst.msk [vmem:[#allocation2 + $0x20] sm:$0xff] %vm1063_vm1, %v1596_v3  ;;  %v2039_v16 = vadd.f32 %v5518_v31, %v2038_v32  ;;  %2527 = vmax.xlane.f32.xlu2 %v7957_v9  ;;  %v7991_v42 = vpop.eup %5525  ;;  %5529 = vpow2.f32 %v3261_v63 }
 0x463   : > { %v2043_v41 = vsel %vm2042_vm7, %v5518_v31, %v2039_v16  ;;  %v7981_v31 = vmul.f32 0.17677669, %v2482_v27 }
 0x464   : > { %v2048_v7 = vsel %vm2045_vm8, %v2047_v17, %v2043_v41 }
 0x465   : > { %3225 = vmax.xlane.f32.xlu1 %v7962_v6  ;;  %v7967_v49 = vmul.f32 %v8961_v35, %v2048_v7 }
 0x466   : > { %v7994_v4 = vpop.eup %5527  ;;  %v2484_v37 = vpop.f32.mrf.mxu3 }
 0x467   : > { %4938 = vst [vmem:[%s7303_s21 + $0xc0] sm:$0xff] %v7967_v49  ;;  %v7997_v61 = vpop.eup %5529  ;;  %v7999_v46 = vmul.f32 0.17677669, %v2484_v37 }
 0x468   : > { %v1598_v1 = vpop.f32.mrf.mxu0  ;;  %3287 = vadd.xlane.f32.xlu0 %v7971_v2 }
 0x469   : > { %1631 = vst.msk [vmem:[#allocation2 + $0x28] sm:$0xff] %vm1063_vm1, %v1598_v1  ;;  %2597 = vadd.xlane.f32.xlu2 %v7975_v0 }
 0x46d   : > { %2531 = vmax.xlane.f32.xlu1 %v7981_v31 }
 0x470   : > { %v1601_v13 = vpop.f32.mrf.mxu0  ;;  %3223 = vmax.xlane.f32.xlu0 %v7985_v44 }
 0x471   : > { %1632 = vst.msk [vmem:[#allocation2 + $0x30] sm:$0xff] %vm1063_vm1, %v1601_v13  ;;  %3291 = vadd.xlane.f32.xlu2 %v7991_v42 }
 0x473   : > { %v1906_v32 = vpop.xlane.xlu2 %1905 }
 0x474   : > { %5531 = vrcp.f32 %v1906_v32  ;;  %v2091_v35 = vand.u32 2147483648, %v1906_v32  ;;  %v2089_v51 = vand.u32 2147483647, %v1906_v32  ;;  %vm2085_vm10 = vweird.f32 %v1906_v32 }
 0x475   : > { %2601 = vadd.xlane.f32.xlu1 %v7994_v4  ;;  %5533 = vpow2.f32 %v2567_v25 }
 0x476   : > { %v2092_v18 = vor.u32 1.1754944e-38, %v2091_v35  ;;  %vm2090_vm13 = vcmp.eq.f32.partialorder %v2089_v51, 8.507059e+37 }
 0x478   : > { %v1603_v3 = vpop.f32.mrf.mxu0  ;;  %v2590_v8 = vpop.xlane.xlu1 %2589  ;;  %3293 = vadd.xlane.f32.xlu0 %v7997_v61 }
 0x479   : > { %1633 = vst.msk [vmem:[#allocation2 + $0x38] sm:$0xff] %vm1063_vm1, %v1603_v3  ;;  %5535 = vrcp.f32 %v2590_v8  ;;  %2533 = vmax.xlane.f32.xlu2 %v7999_v46  ;;  %v2671_v63 = vand.u32 2147483648, %v2590_v8  ;;  %v2669_v25 = vand.u32 2147483647, %v2590_v8  ;;  %vm2665_vm14 = vweird.f32 %v2590_v8 }
 0x47a   : > { %v5532_v16 = vpop.eup %5531 }
 0x47b   : > { %v2081_v17 = vmul.f32 %v5532_v16, %v1906_v32  ;;  %v1908_v47 = vpop.xlane.xlu0 %1907  ;;  %v8004_v54 = vpop.eup %5533  ;;  %vm2086_vm9 = vweird.f32 %v5532_v16  ;;  %v2672_v35 = vor.u32 1.1754944e-38, %v2671_v63  ;;  %vm2670_vm0 = vcmp.eq.f32.partialorder %v2669_v25, 8.507059e+37 }
 0x47c   : > { %5537 = vrcp.f32 %v1908_v47  ;;  %vm8012_vm11 = vmor %vm2085_vm10, %vm2086_vm9  ;;  %v2106_v51 = vand.u32 2147483648, %v1908_v47  ;;  %vm2100_vm3 = vweird.f32 %v1908_v47 }
 0x47d   : > { %v2082_v41 = vsub.f32 1.0, %v2081_v17 }
 0x47f   : > { %v5536_v7 = vpop.eup %5535  ;;  %v2083_v12 = vmul.f32 %v5532_v16, %v2082_v41 }
 0x480   : > { %v2661_v62 = vmul.f32 %v5536_v7, %v2590_v8  ;;  %v8006_v11 = vpop.xlane.xlu1 %1901  ;;  %2599 = vadd.xlane.f32.xlu0 %v8004_v54  ;;  %vm2666_vm12 = vweird.f32 %v5536_v7 }
 0x481   : > { %5539 = vrcp.f32 %v8006_v11  ;;  %v2084_v56 = vadd.f32 %v5532_v16, %v2083_v12  ;;  %vm8025_vm15 = vmor %vm2665_vm14, %vm2666_vm12  ;;  %v2104_v12 = vand.u32 2147483647, %v1908_v47  ;;  %vm2055_vm6 = vweird.f32 %v8006_v11 }
 0x482   : > { %v2662_v1 = vsub.f32 1.0, %v2661_v62  ;;  %v1606_v27 = vpop.f32.mrf.mxu0  ;;  %v8010_v30 = vpop.eup %5537 }
 0x483   : > { %1634 = vst.msk [vmem:[#allocation2 + $0x40] sm:$0xff] %vm1063_vm1, %v1606_v27  ;;  %v2096_v23 = vmul.f32 %v8010_v30, %v1908_v47  ;;  %v8018_v5 = vpop.xlane.xlu0 %1909  ;;  %v2088_v55 = vsel %vm8012_vm11, %v5532_v16, %v2084_v56  ;;  %vm2101_vm2 = vweird.f32 %v8010_v30  ;;  %vm8054_vm5 = vcmp.eq.f32.partialorder %v2104_v12, 8.507059e+37 }
 0x484   : > { %v2663_v13 = vmul.f32 %v5536_v7, %v2662_v1  ;;  %5541 = vrcp.f32 %v8018_v5  ;;  %v2093_v3 = vsel %vm2090_vm13, %v2092_v18, %v2088_v55  ;;  %vm8050_vm4 = vmor %vm2100_vm3, %vm2101_vm2  ;;  %vm2115_vm9 = vweird.f32 %v8018_v5 }
 0x485   : > { %v2097_v37 = vsub.f32 1.0, %v2096_v23  ;;  %v8030_v62 = vmul.f32 %v7494_v60, %v2093_v3 }
 0x486   : > { %v2664_v32 = vadd.f32 %v5536_v7, %v2663_v13  ;;  %v2059_v13 = vand.u32 2147483647, %v8006_v11 }
 0x487   : > { %v8023_v17 = vpop.eup %5539  ;;  %v2098_v16 = vmul.f32 %v8010_v30, %v2097_v37  ;;  %4941 = vst [vmem:[%s7303_s21 + $0xd8] sm:$0xff] %v8030_v62 }
 0x488   : > { %v2051_v8 = vmul.f32 %v8023_v17, %v8006_v11  ;;  %v8035_v56 = vpop.xlane.xlu1 %1903  ;;  %v2668_v1 = vsel %vm8025_vm15, %v5536_v7, %v2664_v32  ;;  %v2061_v7 = vand.u32 2147483648, %v8006_v11  ;;  %v2107_v32 = vor.u32 1.1754944e-38, %v2106_v51 }
 0x489   : > { %5543 = vrcp.f32 %v8035_v56  ;;  %v2099_v60 = vadd.f32 %v8010_v30, %v2098_v16  ;;  %v2673_v18 = vsel %vm2670_vm0, %v2672_v35, %v2668_v1  ;;  %vm2056_vm7 = vweird.f32 %v8023_v17 }
 0x48a   : > { %v2052_v27 = vsub.f32 1.0, %v2051_v8  ;;  %v1608_v45 = vpop.f32.mrf.mxu0  ;;  %v8044_v63 = vpop.eup %5541  ;;  %v2858_v23 = vmul.f32 %v7452_v33, %v2673_v18  ;;  %vm8073_vm8 = vcmp.eq.f32.partialorder %v2059_v13, 8.507059e+37  ;;  %vm2057_vm10 = vmor %vm2055_vm6, %vm2056_vm7  ;;  %v2074_v13 = vand.u32 2147483647, %v8035_v56 }
 0x48b   : > { %1635 = vst.msk [vmem:[#allocation2 + $0x48] sm:$0xff] %vm1063_vm1, %v1608_v45  ;;  %v2111_v47 = vmul.f32 %v8044_v63, %v8018_v5  ;;  %v8061_v3 = vpop.xlane.xlu2 %1913  ;;  %v3218_v41 = vpop.xlane.xlu0 %3217  ;;  %v2103_v33 = vsel %vm8050_vm4, %v8010_v30, %v2099_v60  ;;  %v2121_v45 = vand.u32 2147483648, %v8018_v5  ;;  %vm2116_vm11 = vweird.f32 %v8044_v63 }
 0x48c   : > { %v2053_v37 = vmul.f32 %v8023_v17, %v2052_v27  ;;  %5545 = vrcp.f32 %v8061_v3  ;;  %4957 = vst [vmem:[%s7303_s21 + $0x118] sm:$0xff] %v2858_v23  ;;  %v3238_v16 = vsub.f32 %v7610_v38, %v3218_v41  ;;  %v2889_v51 = vpack.c.bf16 %v2858_v23, %v7910_v28  ;;  %vm8103_vm12 = vmor %vm2115_vm9, %vm2116_vm11 }
 0x48d   : > { %v2112_v12 = vsub.f32 1.0, %v2111_v47  ;;  %v2062_v27 = vor.u32 1.1754944e-38, %v2061_v7  ;;  %v2108_v38 = vsel %vm8054_vm5, %v2107_v32, %v2103_v33  ;;  %v2119_v28 = vand.u32 2147483647, %v8018_v5 }
 0x48e   : > { %v2054_v35 = vadd.f32 %v8023_v17, %v2053_v37  ;;  %v3265_v60 = vmul.f32 1.442695, %v3238_v16  ;;  %2933 = vmatmul.bf16.gmra.mxu0 %v2889_v51  ;;  %v2122_v37 = vor.u32 1.1754944e-38, %v2121_v45  ;;  %v2076_v11 = vand.u32 2147483648, %v8035_v56 }
 0x48f   : > { %v5544_v8 = vpop.eup %5543  ;;  %v2113_v18 = vmul.f32 %v8044_v63, %v2112_v12  ;;  %v8099_v41 = vmul.f32 %v7537_v36, %v2108_v38  ;;  %vm2120_vm14 = vcmp.eq.f32.partialorder %v2119_v28, 8.507059e+37  ;;  %vm2070_vm15 = vweird.f32 %v8035_v56 }
 0x490   : > { %v2066_v30 = vmul.f32 %v5544_v8, %v8035_v56  ;;  %v8081_v55 = vpop.xlane.xlu1 %1911  ;;  %v2058_v25 = vsel %vm2057_vm10, %v8023_v17, %v2054_v35  ;;  %vm2071_vm13 = vweird.f32 %v5544_v8  ;;  %vm8110_vm0 = vcmp.eq.f32.partialorder %v2074_v13, 8.507059e+37 }
 0x491   : > { %5547 = vrcp.f32 %v8081_v55  ;;  %v2114_v7 = vadd.f32 %v8044_v63, %v2113_v18  ;;  %v2063_v47 = vsel %vm8073_vm8, %v2062_v27, %v2058_v25  ;;  %4942 = vst [vmem:[%s7303_s21 + $0xe0] sm:$0xff] %v8099_v41  ;;  %vm2072_vm2 = vmor %vm2070_vm15, %vm2071_vm13  ;;  %v2077_v56 = vor.u32 1.1754944e-38, %v2076_v11 }
 0x492   : > { %v2067_v23 = vsub.f32 1.0, %v2066_v30  ;;  %5549 = vpow2.f32 %v3265_v60  ;;  %v5546_v32 = vpop.eup %5545  ;;  %v2164_v16 = vmul.f32 %v7549_v39, %v2063_v47  ;;  %v2149_v18 = vand.u32 2147483647, %v8061_v3 }
 0x493   : > { %v2141_v17 = vmul.f32 %v5546_v32, %v8061_v3  ;;  %v3589_v35 = vpop.permute.xlu2 %3588  ;;  %v2118_v5 = vsel %vm8103_vm12, %v8044_v63, %v2114_v7  ;;  %v2151_v30 = vand.u32 2147483648, %v8061_v3  ;;  %vm2146_vm3 = vweird.f32 %v5546_v32 }
 0x494   : > { %v2068_v12 = vmul.f32 %v5544_v8, %v2067_v23  ;;  %3619 = vmatpush.bf16.msrb.mxu1 %v3589_v35  ;;  %5212 = vmatpush.bf16.msra.mxu2 %v3589_v35  ;;  %4939 = vst [vmem:[%s7303_s21 + $0xc8] sm:$0xff] %v2164_v16  ;;  %v2192_v39 = vpack.c.bf16 %v2164_v16, %v7967_v49  ;;  %vm2145_vm4 = vweird.f32 %v8061_v3  ;;  %vm2150_vm6 = vcmp.eq.f32.partialorder %v2149_v18, 8.507059e+37 }
 0x495   : > { %v2142_v1 = vsub.f32 1.0, %v2141_v17  ;;  %v2123_v27 = vsel %vm2120_vm14, %v2122_v37, %v2118_v5  ;;  %vm2147_vm5 = vmor %vm2145_vm4, %vm2146_vm3  ;;  %v2152_v11 = vor.u32 1.1754944e-38, %v2151_v30  ;;  %v2134_v17 = vand.u32 2147483647, %v8081_v55 }
 0x496   : > { %v2069_v51 = vadd.f32 %v5544_v8, %v2068_v12  ;;  %v8125_v60 = vmul.f32 %v7568_v50, %v2123_v27  ;;  %2256 = vmatmul.bf16.gmra.mxu2 %v2192_v39  ;;  %vm2130_vm8 = vweird.f32 %v8081_v55 }
 0x497   : > { %v5548_v45 = vpop.eup %5547  ;;  %v2143_v38 = vmul.f32 %v5546_v32, %v2142_v1  ;;  %vm2135_vm10 = vcmp.eq.f32.partialorder %v2134_v17, 8.507059e+37 }
 0x498   : > { %v8127_v63 = vpop.eup %5549  ;;  %v2126_v28 = vmul.f32 %v5548_v45, %v8081_v55  ;;  %v3216_v49 = vpop.xlane.xlu1 %3215  ;;  %v2073_v13 = vsel %vm2072_vm2, %v5544_v8, %v2069_v51  ;;  %4943 = vst [vmem:[%s7303_s21 + $0xe8] sm:$0xff] %v8125_v60  ;;  %vm2131_vm7 = vweird.f32 %v5548_v45 }
 0x499   : > { %3297 = vadd.xlane.f32.xlu0 %v8127_v63  ;;  %v3237_v7 = vsub.f32 %v7632_v48, %v3216_v49  ;;  %v2078_v23 = vsel %vm8110_vm0, %v2077_v56, %v2073_v13  ;;  %v2144_v50 = vadd.f32 %v5546_v32, %v2143_v38  ;;  %v1611_v8 = vpop.f32.mrf.mxu0  ;;  %v2136_v48 = vand.u32 2147483648, %v8081_v55  ;;  %vm2132_vm9 = vmor %vm2130_vm8, %vm2131_vm7 }
 0x49a   : > { %v2127_v25 = vsub.f32 1.0, %v2126_v28  ;;  %v2165_v37 = vmul.f32 %v7575_v26, %v2078_v23  ;;  %1636 = vst.msk [vmem:[#allocation2 + $0x50] sm:$0xff] %vm1063_vm1, %v1611_v8 }
 0x49b   : > { %v3263_v47 = vmul.f32 1.442695, %v3237_v7  ;;  %v2148_v12 = vsel %vm2147_vm5, %v5546_v32, %v2144_v50  ;;  %v2137_v16 = vor.u32 1.1754944e-38, %v2136_v48 }
 0x49c   : > { %v2128_v33 = vmul.f32 %v5548_v45, %v2127_v25  ;;  %4940 = vst [vmem:[%s7303_s21 + $0xd0] sm:$0xff] %v2165_v37  ;;  %v2153_v3 = vsel %vm2150_vm6, %v2152_v11, %v2148_v12 }
 0x49d   : > { %5551 = vpow2.f32 %v3263_v47  ;;  %v8144_v26 = vmul.f32 %v7614_v22, %v2153_v3  ;;  %v2193_v22 = vpack.c.bf16 %v8030_v62, %v2165_v37 }
 0x49e   : > { %v2129_v35 = vadd.f32 %v5548_v45, %v2128_v33 }
 0x49f   : > { %4945 = vst [vmem:[%s7303_s21 + $0xf8] sm:$0xff] %v8144_v26 }
 0x4a0   : > { %v3276_v36 = vpop.xlane.xlu1 %3275  ;;  %v2133_v5 = vsel %vm2132_vm9, %v5548_v45, %v2129_v35 }
 0x4a1   : > { %5553 = vrcp.f32 %v3276_v36  ;;  %v2138_v32 = vsel %vm2135_vm10, %v2137_v16, %v2133_v5  ;;  %v1613_v1 = vpop.f32.mrf.mxu0  ;;  %v3318_v38 = vand.u32 2147483648, %v3276_v36  ;;  %v3316_v7 = vand.u32 2147483647, %v3276_v36 }
 0x4a2   : > { %v8151_v27 = vmul.f32 %v7623_v34, %v2138_v32  ;;  %1637 = vst.msk [vmem:[#allocation2 + $0x58] sm:$0xff] %vm1063_vm1, %v1613_v1  ;;  %vm3312_vm12 = vweird.f32 %v3276_v36 }
 0x4a3   : > { %v8148_v51 = vpop.eup %5551  ;;  %v3282_v39 = vpop.xlane.xlu0 %3281  ;;  %v3319_v25 = vor.u32 1.1754944e-38, %v3318_v38  ;;  %vm3317_vm15 = vcmp.eq.f32.partialorder %v3316_v7, 8.507059e+37 }
 0x4a4   : > { %5555 = vrcp.f32 %v3282_v39  ;;  %3295 = vadd.xlane.f32.xlu2 %v8148_v51  ;;  %4944 = vst [vmem:[%s7303_s21 + $0xf0] sm:$0xff] %v8151_v27  ;;  %v3361_v47 = vand.u32 2147483647, %v3282_v39  ;;  %v3363_v33 = vand.u32 2147483648, %v3282_v39  ;;  %vm3357_vm0 = vweird.f32 %v3282_v39 }
 0x4a6   : > { %2261 = vmatmul.bf16.gmra.mxu2 %v2193_v22  ;;  %vm3362_vm3 = vcmp.eq.f32.partialorder %v3361_v47, 8.507059e+37  ;;  %v3364_v5 = vor.u32 1.1754944e-38, %v3363_v33 }
 0x4a7   : > { %v5554_v55 = vpop.eup %5553 }
 0x4a8   : > { %v3308_v45 = vmul.f32 %v5554_v55, %v3276_v36  ;;  %v3278_v56 = vpop.xlane.xlu1 %3277  ;;  %vm3313_vm11 = vweird.f32 %v5554_v55 }
 0x4a9   : > { %5557 = vrcp.f32 %v3278_v56  ;;  %v1616_v34 = vpop.f32.mrf.mxu0  ;;  %vm3314_vm13 = vmor %vm3312_vm12, %vm3313_vm11  ;;  %v3333_v32 = vand.u32 2147483648, %v3278_v56  ;;  %vm3327_vm5 = vweird.f32 %v3278_v56 }
 0x4aa   : > { %v5556_v18 = vpop.eup %5555  ;;  %v3309_v30 = vsub.f32 1.0, %v3308_v45  ;;  %1638 = vst.msk [vmem:[#allocation2 + $0x60] sm:$0xff] %vm1063_vm1, %v1616_v34 }
 0x4ab   : > { %v3353_v28 = vmul.f32 %v5556_v18, %v3282_v39  ;;  %v2524_v49 = vpop.xlane.xlu0 %2523  ;;  %vm3358_vm14 = vweird.f32 %v5556_v18  ;;  %v3331_v39 = vand.u32 2147483647, %v3278_v56  ;;  %v3334_v7 = vor.u32 1.1754944e-38, %v3333_v32 }
 0x4ac   : > { %v3310_v13 = vmul.f32 %v5554_v55, %v3309_v30  ;;  %v2545_v23 = vsub.f32 %v7765_v43, %v2524_v49  ;;  %vm8161_vm2 = vmor %vm3357_vm0, %vm3358_vm14 }
 0x4ad   : > { %v3354_v50 = vsub.f32 1.0, %v3353_v28  ;;  %vm3332_vm7 = vcmp.eq.f32.partialorder %v3331_v39, 8.507059e+37 }
 0x4ae   : > { %v3311_v62 = vadd.f32 %v5554_v55, %v3310_v13  ;;  %v2571_v37 = vmul.f32 1.442695, %v2545_v23 }
 0x4af   : > { %v5558_v11 = vpop.eup %5557  ;;  %v3355_v8 = vmul.f32 %v5556_v18, %v3354_v50 }
 0x4b0   : > { %v3315_v48 = vsel %vm3314_vm13, %v5554_v55, %v3311_v62  ;;  %v3323_v12 = vmul.f32 %v5558_v11, %v3278_v56  ;;  %5559 = vpow2.f32 %v2571_v37  ;;  %v3280_v17 = vpop.xlane.xlu1 %3279  ;;  %vm3328_vm4 = vweird.f32 %v5558_v11 }
 0x4b1   : > { %v3320_v3 = vsel %vm3317_vm15, %v3319_v25, %v3315_v48  ;;  %v3356_v35 = vadd.f32 %v5556_v18, %v3355_v8  ;;  %5561 = vrcp.f32 %v3280_v17  ;;  %v1618_v1 = vpop.f32.mrf.mxu0  ;;  %vm3329_vm6 = vmor %vm3327_vm5, %vm3328_vm4  ;;  %v3348_v50 = vand.u32 2147483648, %v3280_v17 }
 0x4b2   : > { %v3547_v43 = vmul.f32 %v7723_v19, %v3320_v3  ;;  %v3324_v36 = vsub.f32 1.0, %v3323_v12  ;;  %1639 = vst.msk [vmem:[#allocation2 + $0x68] sm:$0xff] %vm1063_vm1, %v1618_v1  ;;  %v2194_v19 = vpack.c.bf16 %v8125_v60, %v8099_v41  ;;  %vm3342_vm9 = vweird.f32 %v3280_v17 }
 0x4b3   : > { %v2526_v22 = vpop.xlane.xlu0 %2525  ;;  %v3360_v55 = vsel %vm8161_vm2, %v5556_v18, %v3356_v35 }
 0x4b4   : > { %4978 = vst [vmem:[%s7303_s21 + $0x180] sm:$0xff] %v3547_v43  ;;  %v3325_v45 = vmul.f32 %v5558_v11, %v3324_v36  ;;  %v2546_v30 = vsub.f32 %v7851_v59, %v2526_v22  ;;  %v3365_v38 = vsel %vm3362_vm3, %v3364_v5, %v3360_v55 }
 0x4b5   : > { %v8175_v18 = vmul.f32 %v7762_v21, %v3365_v38 }
 0x4b6   : > { %v8172_v28 = vpop.eup %5559  ;;  %v3326_v34 = vadd.f32 %v5558_v11, %v3325_v45  ;;  %v2573_v49 = vmul.f32 1.442695, %v2546_v30  ;;  %2266 = vmatmul.bf16.gmra.mxu2 %v2194_v19 }
 0x4b7   : > { %v5562_v13 = vpop.eup %5561  ;;  %2603 = vadd.xlane.f32.xlu1 %v8172_v28  ;;  %4981 = vst [vmem:[%s7303_s21 + $0x198] sm:$0xff] %v8175_v18 }
 0x4b8   : > { %v3330_v59 = vsel %vm3329_vm6, %v5558_v11, %v3326_v34  ;;  %v3338_v23 = vmul.f32 %v5562_v13, %v3280_v17  ;;  %5563 = vpow2.f32 %v2573_v49  ;;  %v2594_v41 = vpop.xlane.xlu1 %2593  ;;  %vm3343_vm8 = vweird.f32 %v5562_v13 }
 0x4b9   : > { %v3335_v60 = vsel %vm3332_vm7, %v3334_v7, %v3330_v59  ;;  %5565 = vrcp.f32 %v2594_v41  ;;  %v1621_v62 = vpop.f32.mrf.mxu0  ;;  %v3346_v11 = vand.u32 2147483647, %v3280_v17  ;;  %vm3344_vm10 = vmor %vm3342_vm9, %vm3343_vm8  ;;  %v2701_v39 = vand.u32 2147483648, %v2594_v41 }
 0x4ba   : > { %v3548_v56 = vmul.f32 %v7772_v14, %v3335_v60  ;;  %v3339_v21 = vsub.f32 1.0, %v3338_v23  ;;  %1640 = vst.msk [vmem:[#allocation2 + $0x70] sm:$0xff] %vm1063_vm1, %v1621_v62  ;;  %v3349_v14 = vor.u32 1.1754944e-38, %v3348_v50  ;;  %v2699_v19 = vand.u32 2147483647, %v2594_v41 }
 0x4bb   : > { %v8181_v25 = vpop.xlane.xlu0 %2591  ;;  %vm3347_vm11 = vcmp.eq.f32.partialorder %v3346_v11, 8.507059e+37  ;;  %vm2695_vm13 = vweird.f32 %v2594_v41  ;;  %v2702_v59 = vor.u32 1.1754944e-38, %v2701_v39 }
 0x4bc   : > { %4979 = vst [vmem:[%s7303_s21 + $0x188] sm:$0xff] %v3548_v56  ;;  %v3340_v37 = vmul.f32 %v5562_v13, %v3339_v21  ;;  %5567 = vrcp.f32 %v8181_v25  ;;  %v3580_v8 = vpack.c.bf16 %v3548_v56, %v3547_v43  ;;  %v2686_v7 = vand.u32 2147483648, %v8181_v25 }
 0x4bd   : > { %vm2680_vm0 = vweird.f32 %v8181_v25 }
 0x4be   : > { %v8186_v47 = vpop.eup %5563  ;;  %v3341_v33 = vadd.f32 %v5562_v13, %v3340_v37  ;;  %3620 = vmatmul.bf16.vlgmr.msrb.gmra.mxu1 %v3580_v8  ;;  %v2687_v56 = vor.u32 1.1754944e-38, %v2686_v7 }
 0x4bf   : > { %v5566_v48 = vpop.eup %5565  ;;  %2605 = vadd.xlane.f32.xlu2 %v8186_v47 }
 0x4c0   : > { %v2691_v12 = vmul.f32 %v5566_v48, %v2594_v41  ;;  %v3222_v3 = vpop.xlane.xlu1 %3221  ;;  %v3345_v35 = vsel %vm3344_vm10, %v5562_v13, %v3341_v33  ;;  %vm2696_vm12 = vweird.f32 %v5566_v48 }
 0x4c1   : > { %v3240_v16 = vsub.f32 %v7892_v29, %v3222_v3  ;;  %v3350_v36 = vsel %vm3347_vm11, %v3349_v14, %v3345_v35  ;;  %v1623_v1 = vpop.f32.mrf.mxu0  ;;  %vm8197_vm14 = vmor %vm2695_vm13, %vm2696_vm12 }
 0x4c2   : > { %v5568_v5 = vpop.eup %5567  ;;  %v2692_v43 = vsub.f32 1.0, %v2691_v12  ;;  %v3549_v32 = vmul.f32 %v7819_v52, %v3350_v36  ;;  %1641 = vst.msk [vmem:[#allocation2 + $0x78] sm:$0xff] %vm1063_vm1, %v1623_v1  ;;  %v2195_v52 = vpack.c.bf16 %v8144_v26, %v8151_v27  ;;  %vm2700_vm1 = vcmp.eq.f32.partialorder %v2699_v19, 8.507059e+37 }
 0x4c3   : > { %v2676_v17 = vmul.f32 %v5568_v5, %v8181_v25  ;;  %v3269_v22 = vmul.f32 1.442695, %v3240_v16  ;;  %v3220_v55 = vpop.xlane.xlu0 %3219  ;;  %vm2681_vm15 = vweird.f32 %v5568_v5 }
 0x4c4   : > { %v2693_v45 = vmul.f32 %v5566_v48, %v2692_v43  ;;  %v3239_v30 = vsub.f32 %v7905_v53, %v3220_v55  ;;  %4980 = vst [vmem:[%s7303_s21 + $0x190] sm:$0xff] %v3549_v32  ;;  %v2684_v53 = vand.u32 2147483647, %v8181_v25  ;;  %vm2682_vm2 = vmor %vm2680_vm0, %vm2681_vm15  ;;  %v3581_v25 = vpack.c.bf16 %v8175_v18, %v3549_v32 }
 0x4c5   : > { %v2677_v29 = vsub.f32 1.0, %v2676_v17  ;;  %5569 = vpow2.f32 %v3269_v22 }
 0x4c6   : > { %v2694_v38 = vadd.f32 %v5566_v48, %v2693_v45  ;;  %v3267_v34 = vmul.f32 1.442695, %v3239_v30  ;;  %2271 = vmatmul.bf16.gmra.mxu2 %v2195_v52  ;;  %vm2685_vm3 = vcmp.eq.f32.partialorder %v2684_v53, 8.507059e+37 }
 0x4c7   : > { %v2678_v13 = vmul.f32 %v5568_v5, %v2677_v29 }
 0x4c8   : > { %5571 = vpow2.f32 %v3267_v34  ;;  %v8203_v23 = vpop.xlane.xlu1 %2595  ;;  %v2698_v41 = vsel %vm8197_vm14, %v5566_v48, %v2694_v38 }
 0x4c9   : > { %v2679_v26 = vadd.f32 %v5568_v5, %v2678_v13  ;;  %5573 = vrcp.f32 %v8203_v23  ;;  %v2703_v27 = vsel %vm2700_vm1, %v2702_v59, %v2698_v41  ;;  %v2714_v33 = vand.u32 2147483647, %v8203_v23 }
 0x4ca   : > { %v2860_v62 = vmul.f32 %v7865_v57, %v2703_v27  ;;  %v8224_v57 = vpop.f32.mrf.mxu2  ;;  %v2716_v14 = vand.u32 2147483648, %v8203_v23  ;;  %vm2710_vm4 = vweird.f32 %v8203_v23 }
 0x4cb   : > { %v8209_v60 = vpop.eup %5569  ;;  %v8211_v21 = vpop.xlane.xlu0 %3285  ;;  %v2683_v50 = vsel %vm2682_vm2, %v5568_v5, %v2679_v26  ;;  %vm8236_vm5 = vcmp.eq.f32.partialorder %v2714_v33, 8.507059e+37 }
 0x4cc   : > { %5575 = vrcp.f32 %v8211_v21  ;;  %3301 = vadd.xlane.f32.xlu1 %v8209_v60  ;;  %v8216_v37 = vpop.xlane.xlu2 %3283  ;;  %v2688_v11 = vsel %vm2685_vm3, %v2687_v56, %v2683_v50  ;;  %4959 = vst [vmem:[%s7303_s21 + $0x128] sm:$0xff] %v2860_v62  ;;  %v3391_v3 = vand.u32 2147483647, %v8211_v21  ;;  %v3393_v43 = vand.u32 2147483648, %v8211_v21 }
 0x4cd   : > { %5577 = vrcp.f32 %v8216_v37  ;;  %v2859_v12 = vmul.f32 %v7876_v40, %v2688_v11  ;;  %v2717_v32 = vor.u32 1.1754944e-38, %v2716_v14  ;;  %vm3387_vm6 = vweird.f32 %v8211_v21 }
 0x4ce   : > { %v8220_v8 = vpop.eup %5571  ;;  %3625 = vmatmul.bf16.gmra.mxu1 %v3581_v25  ;;  %v3378_v1 = vand.u32 2147483648, %v8216_v37  ;;  %vm8244_vm7 = vcmp.eq.f32.partialorder %v3391_v3, 8.507059e+37  ;;  %vm3372_vm8 = vweird.f32 %v8216_v37  ;;  %v3376_v38 = vand.u32 2147483647, %v8216_v37 }
 0x4cf   : > { %v5574_v48 = vpop.eup %5573  ;;  %3299 = vadd.xlane.f32.xlu0 %v8220_v8  ;;  %4958 = vst [vmem:[%s7303_s21 + $0x120] sm:$0xff] %v2859_v12  ;;  %v2890_v40 = vpack.c.bf16 %v2860_v62, %v2859_v12  ;;  %v3394_v49 = vor.u32 1.1754944e-38, %v3393_v43 }
 0x4d0   : > { %v2706_v18 = vmul.f32 %v5574_v48, %v8203_v23  ;;  %v8231_v35 = vpop.xlane.xlu1 %3289  ;;  %vm2711_vm9 = vweird.f32 %v5574_v48  ;;  %v3379_v26 = vor.u32 1.1754944e-38, %v3378_v1  ;;  %vm3377_vm1 = vcmp.eq.f32.partialorder %v3376_v38, 8.507059e+37 }
 0x4d1   : > { %5579 = vrcp.f32 %v8231_v35  ;;  %2938 = vmatmul.bf16.gmra.mxu0 %v2890_v40  ;;  %vm8255_vm11 = vmor %vm2710_vm4, %vm2711_vm9  ;;  %v3421_v56 = vand.u32 2147483647, %v8231_v35  ;;  %vm3417_vm0 = vweird.f32 %v8231_v35 }
 0x4d2   : > { %v5576_v16 = vpop.eup %5575  ;;  %v2707_v36 = vsub.f32 1.0, %v2706_v18  ;;  %v8261_v25 = vpop.f32.mrf.mxu2 }
 0x4d3   : > { %v3383_v17 = vmul.f32 %v5576_v16, %v8211_v21  ;;  %v2530_v22 = vpop.xlane.xlu0 %2529  ;;  %v5578_v55 = vpop.eup %5577  ;;  %vm3388_vm10 = vweird.f32 %v5576_v16  ;;  %vm3422_vm3 = vcmp.eq.f32.partialorder %v3421_v56, 8.507059e+37 }
 0x4d4   : > { %v2708_v45 = vmul.f32 %v5574_v48, %v2707_v36  ;;  %v2548_v30 = vsub.f32 %v7955_v58, %v2530_v22  ;;  %v3368_v29 = vmul.f32 %v5578_v55, %v8216_v37  ;;  %v2528_v34 = vpop.xlane.xlu2 %2527  ;;  %vm3373_vm12 = vweird.f32 %v5578_v55  ;;  %vm3389_vm13 = vmor %vm3387_vm6, %vm3388_vm10 }
 0x4d5   : > { %v3384_v19 = vsub.f32 1.0, %v3383_v17  ;;  %v2547_v7 = vsub.f32 %v7957_v9, %v2528_v34  ;;  %v3423_v36 = vand.u32 2147483648, %v8231_v35  ;;  %vm3374_vm14 = vmor %vm3372_vm8, %vm3373_vm12 }
 0x4d6   : > { %v2709_v52 = vadd.f32 %v5574_v48, %v2708_v45  ;;  %v2577_v13 = vmul.f32 1.442695, %v2548_v30  ;;  %v3369_v41 = vsub.f32 1.0, %v3368_v29 }
 0x4d7   : > { %v5580_v59 = vpop.eup %5579  ;;  %v3385_v53 = vmul.f32 %v5576_v16, %v3384_v19  ;;  %v2575_v50 = vmul.f32 1.442695, %v2547_v7 }
 0x4d8   : > { %v3413_v27 = vmul.f32 %v5580_v59, %v8231_v35  ;;  %5581 = vpow2.f32 %v2577_v13  ;;  %v3226_v62 = vpop.xlane.xlu1 %3225  ;;  %v3370_v11 = vmul.f32 %v5578_v55, %v3369_v41  ;;  %v2713_v33 = vsel %vm8255_vm11, %v5574_v48, %v2709_v52 }
 0x4d9   : > { %v3386_v9 = vadd.f32 %v5576_v16, %v3385_v53  ;;  %5583 = vpow2.f32 %v2575_v50  ;;  %v3242_v14 = vsub.f32 %v7962_v6, %v3226_v62  ;;  %v2718_v12 = vsel %vm8236_vm5, %v2717_v32, %v2713_v33 }
 0x4da   : > { %v3414_v23 = vsub.f32 1.0, %v3413_v27  ;;  %v3371_v3 = vadd.f32 %v5578_v55, %v3370_v11  ;;  %v8274_v40 = vmul.f32 %v7931_v24, %v2718_v12  ;;  %vm3418_vm15 = vweird.f32 %v5580_v59  ;;  %v8296_v45 = vpop.f32.mrf.mxu2 }
 0x4db   : > { %v3390_v18 = vsel %vm3389_vm13, %v5576_v16, %v3386_v9  ;;  %v8271_v43 = vpop.xlane.xlu0 %3287  ;;  %v3273_v17 = vmul.f32 1.442695, %v3242_v14  ;;  %vm3419_vm2 = vmor %vm3417_vm0, %vm3418_vm15 }
 0x4dc   : > { %v3395_v21 = vsel %vm8244_vm7, %v3394_v49, %v3390_v18  ;;  %v3415_v6 = vmul.f32 %v5580_v59, %v3414_v23  ;;  %5585 = vrcp.f32 %v8271_v43  ;;  %v3375_v16 = vsel %vm3374_vm14, %v5578_v55, %v3371_v3  ;;  %v8283_v5 = vpop.xlane.xlu2 %2597  ;;  %4960 = vst [vmem:[%s7303_s21 + $0x130] sm:$0xff] %v8274_v40 }
 0x4dd   : > { %v3552_v48 = vmul.f32 %v7937_v20, %v3395_v21  ;;  %v3380_v37 = vsel %vm3377_vm1, %v3379_v26, %v3375_v16  ;;  %5587 = vrcp.f32 %v8283_v5  ;;  %v3424_v20 = vor.u32 1.1754944e-38, %v3423_v36 }
 0x4de   : > { %v8287_v24 = vpop.eup %5581  ;;  %v3416_v32 = vadd.f32 %v5580_v59, %v3415_v6  ;;  %v3551_v1 = vmul.f32 %v7945_v15, %v3380_v37  ;;  %5589 = vpow2.f32 %v3273_v17  ;;  %vm3402_vm5 = vweird.f32 %v8271_v43 }
 0x4df   : > { %4983 = vst [vmem:[%s7303_s21 + $0x1a8] sm:$0xff] %v3552_v48  ;;  %2609 = vadd.xlane.f32.xlu0 %v8287_v24  ;;  %v8294_v35 = vpop.eup %5583  ;;  %v3408_v58 = vand.u32 2147483648, %v8271_v43  ;;  %v2731_v62 = vand.u32 2147483648, %v8283_v5  ;;  %v2729_v11 = vand.u32 2147483647, %v8283_v5  ;;  %vm2725_vm8 = vweird.f32 %v8283_v5 }
 0x4e0   : > { %v2532_v22 = vpop.xlane.xlu1 %2531  ;;  %v3420_v55 = vsel %vm3419_vm2, %v5580_v59, %v3416_v32  ;;  %4982 = vst [vmem:[%s7303_s21 + $0x1a0] sm:$0xff] %v3551_v1  ;;  %2607 = vadd.xlane.f32.xlu2 %v8294_v35  ;;  %v3582_v30 = vpack.c.bf16 %v3552_v48, %v3551_v1 }
 0x4e1   : > { %v2549_v39 = vsub.f32 %v7981_v31, %v2532_v22  ;;  %v3425_v15 = vsel %vm3422_vm3, %v3424_v20, %v3420_v55  ;;  %v3409_v36 = vor.u32 1.1754944e-38, %v3408_v58  ;;  %vm2730_vm11 = vcmp.eq.f32.partialorder %v2729_v11, 8.507059e+37 }
 0x4e2   : > { %v5586_v19 = vpop.eup %5585  ;;  %v8302_v29 = vmul.f32 %v7952_v10, %v3425_v15  ;;  %3630 = vmatmul.bf16.vlgmr.msra.gmra.mxu2 %v3582_v30  ;;  %v8329_v23 = vpop.f32.mrf.mxu2 }
 0x4e3   : > { %v3398_v38 = vmul.f32 %v5586_v19, %v8271_v43  ;;  %v2579_v34 = vmul.f32 1.442695, %v2549_v39  ;;  %v3224_v52 = vpop.xlane.xlu0 %3223  ;;  %v5588_v49 = vpop.eup %5587  ;;  %vm3403_vm4 = vweird.f32 %v5586_v19 }
 0x4e4   : > { %v3241_v13 = vsub.f32 %v7985_v44, %v3224_v52  ;;  %4985 = vst [vmem:[%s7303_s21 + $0x1b8] sm:$0xff] %v8302_v29  ;;  %v2721_v7 = vmul.f32 %v5588_v49, %v8283_v5  ;;  %v8309_v59 = vpop.xlane.xlu2 %3291  ;;  %v8312_v26 = vpop.eup %5589  ;;  %v3406_v44 = vand.u32 2147483647, %v8271_v43  ;;  %vm8322_vm6 = vmor %vm3402_vm5, %vm3403_vm4  ;;  %vm2726_vm7 = vweird.f32 %v5588_v49 }
 0x4e5   : > { %v3399_v31 = vsub.f32 1.0, %v3398_v38  ;;  %5591 = vpow2.f32 %v2579_v34  ;;  %vm2727_vm10 = vmor %vm2725_vm8, %vm2726_vm7  ;;  %v2732_v43 = vor.u32 1.1754944e-38, %v2731_v62  ;;  %v3438_v5 = vand.u32 2147483648, %v8309_v59 }
 0x4e6   : > { %v3271_v53 = vmul.f32 1.442695, %v3241_v13  ;;  %5593 = vrcp.f32 %v8309_v59  ;;  %v2722_v41 = vsub.f32 1.0, %v2721_v7  ;;  %vm3407_vm9 = vcmp.eq.f32.partialorder %v3406_v44, 8.507059e+37 }
 0x4e7   : > { %v3400_v10 = vmul.f32 %v5586_v19, %v3399_v31  ;;  %vm3432_vm12 = vweird.f32 %v8309_v59  ;;  %v3439_v13 = vor.u32 1.1754944e-38, %v3438_v5 }
 0x4e8   : > { %5595 = vpow2.f32 %v3271_v53  ;;  %v8317_v27 = vpop.xlane.xlu1 %2601  ;;  %v2723_v50 = vmul.f32 %v5588_v49, %v2722_v41  ;;  %3305 = vadd.xlane.f32.xlu2 %v8312_v26 }
 0x4e9   : > { %v3401_v56 = vadd.f32 %v5586_v19, %v3400_v10  ;;  %5597 = vrcp.f32 %v8317_v27  ;;  %v2761_v34 = vand.u32 2147483648, %v8317_v27  ;;  %v2759_v10 = vand.u32 2147483647, %v8317_v27 }
 0x4ea   : > { %v2724_v14 = vadd.f32 %v5588_v49, %v2723_v50  ;;  %vm2755_vm0 = vweird.f32 %v8317_v27 }
 0x4eb   : > { %v8327_v33 = vpop.eup %5591  ;;  %v8331_v12 = vpop.xlane.xlu0 %3293  ;;  %v3405_v18 = vsel %vm8322_vm6, %v5586_v19, %v3401_v56  ;;  %v2762_v44 = vor.u32 1.1754944e-38, %v2761_v34  ;;  %vm2760_vm4 = vcmp.eq.f32.partialorder %v2759_v10, 8.507059e+37 }
 0x4ec   : > { %v5594_v3 = vpop.eup %5593  ;;  %5599 = vrcp.f32 %v8331_v12  ;;  %2611 = vadd.xlane.f32.xlu0 %v8327_v33  ;;  %v2534_v6 = vpop.xlane.xlu2 %2533  ;;  %v2728_v37 = vsel %vm2727_vm10, %v5588_v49, %v2724_v14  ;;  %v3410_v32 = vsel %vm3407_vm9, %v3409_v36, %v3405_v18  ;;  %v3453_v58 = vand.u32 2147483648, %v8331_v12 }
 0x4ed   : > { %v3428_v21 = vmul.f32 %v5594_v3, %v8309_v59  ;;  %v2550_v16 = vsub.f32 %v7999_v46, %v2534_v6  ;;  %v2733_v20 = vsel %vm2730_vm11, %v2732_v43, %v2728_v37  ;;  %vm3433_vm13 = vweird.f32 %v5594_v3 }
 0x4ee   : > { %v8339_v48 = vpop.eup %5595  ;;  %v2862_v39 = vmul.f32 %v7975_v0, %v2733_v20  ;;  %v3436_v46 = vand.u32 2147483647, %v8309_v59  ;;  %v3553_v15 = vmul.f32 %v7971_v2, %v3410_v32  ;;  %vm8358_vm14 = vmor %vm3432_vm12, %vm3433_vm13  ;;  %v3451_v62 = vand.u32 2147483647, %v8331_v12  ;;  %v2929_v32 = vpop.f32.mrf.mxu0 }
 0x4ef   : > { %v5598_v17 = vpop.eup %5597  ;;  %v3429_v1 = vsub.f32 1.0, %v3428_v21  ;;  %3303 = vadd.xlane.f32.xlu1 %v8339_v48  ;;  %v2581_v55 = vmul.f32 1.442695, %v2550_v16  ;;  %vm3447_vm5 = vweird.f32 %v8331_v12  ;;  %v3454_v36 = vor.u32 1.1754944e-38, %v3453_v58 }
 0x4f0   : > { %v2751_v22 = vmul.f32 %v5598_v17, %v8317_v27  ;;  %4961 = vst [vmem:[%s7303_s21 + $0x138] sm:$0xff] %v2862_v39  ;;  %v2891_v52 = vpack.c.bf16 %v2862_v39, %v8274_v40  ;;  %v3583_v0 = vpack.c.bf16 %v8302_v29, %v3553_v15  ;;  %vm2756_vm15 = vweird.f32 %v5598_v17  ;;  %v8363_v40 = vpop.f32.mrf.mxu2 }
 0x4f1   : > { %v3430_v30 = vmul.f32 %v5594_v3, %v3429_v1  ;;  %5601 = vpow2.f32 %v2581_v55  ;;  %4984 = vst [vmem:[%s7303_s21 + $0x1b0] sm:$0xff] %v3553_v15  ;;  %vm3437_vm1 = vcmp.eq.f32.partialorder %v3436_v46, 8.507059e+37  ;;  %vm2757_vm2 = vmor %vm2755_vm0, %vm2756_vm15  ;;  %vm3452_vm7 = vcmp.eq.f32.partialorder %v3451_v62, 8.507059e+37 }
 0x4f2   : > { %v5600_v19 = vpop.eup %5599  ;;  %v2752_v38 = vsub.f32 1.0, %v2751_v22  ;;  %2943 = vmatmul.bf16.gmra.mxu0 %v2891_v52  ;;  %3635 = vmatmul.bf16.gmra.mxu2 %v3583_v0 }
 0x4f3   : > { %v3431_v49 = vadd.f32 %v5594_v3, %v3430_v30  ;;  %v3443_v31 = vmul.f32 %v5600_v19, %v8331_v12  ;;  %v2600_v7 = vpop.xlane.xlu0 %2599  ;;  %vm3448_vm3 = vweird.f32 %v5600_v19 }
 0x4f4   : > { %v2753_v53 = vmul.f32 %v5598_v17, %v2752_v38  ;;  %5603 = vrcp.f32 %v2600_v7  ;;  %vm3449_vm6 = vmor %vm3447_vm5, %vm3448_vm3  ;;  %v2746_v12 = vand.u32 2147483648, %v2600_v7  ;;  %v2744_v5 = vand.u32 2147483647, %v2600_v7 }
 0x4f5   : > { %v3444_v29 = vsub.f32 1.0, %v3443_v31  ;;  %v3435_v59 = vsel %vm8358_vm14, %v5594_v3, %v3431_v49  ;;  %vm2740_vm9 = vweird.f32 %v2600_v7 }
 0x4f6   : > { %v2754_v41 = vadd.f32 %v5598_v17, %v2753_v53  ;;  %v3440_v56 = vsel %vm3437_vm1, %v3439_v13, %v3435_v59  ;;  %vm2745_vm11 = vcmp.eq.f32.partialorder %v2744_v5, 8.507059e+37  ;;  %v2931_v46 = vpop.f32.mrf.mxu0 }
 0x4f7   : > { %v3445_v50 = vmul.f32 %v5600_v19, %v3444_v29  ;;  %v3555_v9 = vmul.f32 %v7991_v42, %v3440_v56  ;;  %v8371_v11 = vpop.eup %5601 }
 0x4f8   : > { %v2758_v27 = vsel %vm2757_vm2, %v5598_v17, %v2754_v41  ;;  %2613 = vadd.xlane.f32.xlu1 %v8371_v11  ;;  %v8379_v17 = vpop.f32.mrf.mxu2 }
 0x4f9   : > { %v3446_v14 = vadd.f32 %v5600_v19, %v3445_v50  ;;  %4986 = vst [vmem:[%s7303_s21 + $0x1c0] sm:$0xff] %v3555_v9  ;;  %v2763_v18 = vsel %vm2760_vm4, %v2762_v44, %v2758_v27 }
 0x4fa   : > { %v5604_v3 = vpop.eup %5603  ;;  %v2864_v43 = vmul.f32 %v7994_v4, %v2763_v18 }
 0x4fb   : > { %v2736_v42 = vmul.f32 %v5604_v3, %v2600_v7  ;;  %v3450_v21 = vsel %vm3449_vm6, %v5600_v19, %v3446_v14  ;;  %vm2741_vm8 = vweird.f32 %v5604_v3 }
 0x4fc   : > { %v3455_v6 = vsel %vm3452_vm7, %v3454_v36, %v3450_v21  ;;  %4963 = vst [vmem:[%s7303_s21 + $0x148] sm:$0xff] %v2864_v43  ;;  %vm2742_vm10 = vmor %vm2740_vm9, %vm2741_vm8 }
 0x4fd   : > { %v2737_v16 = vsub.f32 1.0, %v2736_v42  ;;  %v3556_v37 = vmul.f32 %v7997_v61, %v3455_v6  ;;  %v2747_v61 = vor.u32 1.1754944e-38, %v2746_v12 }
 0x4ff   : > { %v2738_v1 = vmul.f32 %v5604_v3, %v2737_v16  ;;  %4987 = vst [vmem:[%s7303_s21 + $0x1c8] sm:$0xff] %v3556_v37  ;;  %v3584_v20 = vpack.c.bf16 %v3556_v37, %v3555_v9 }
 0x500   : > { %2295 = vrot.lane.b32.xlu0 %v8261_v25, %s6014_s22  ;;  %2293 = vrot.lane.b32.xlu2 %v8224_v57, %s6014_s22  ;;  %v8388_v15 = vpop.f32.mrf.mxu2 }
 0x501   : > { %v2739_v4 = vadd.f32 %v5604_v3, %v2738_v1 }
 0x502   : > { %3640 = vmatmul.bf16.gmra.mxu2 %v3584_v20 }
 0x503   : > { %v2743_v22 = vsel %vm2742_vm10, %v5604_v3, %v2739_v4 }
 0x504   : > { %v2748_v55 = vsel %vm2745_vm11, %v2747_v61, %v2743_v22 }
 0x505   : > { %v2863_v39 = vmul.f32 %v8004_v54, %v2748_v55 }
 0x507   : > { %4962 = vst [vmem:[%s7303_s21 + $0x140] sm:$0xff] %v2863_v39  ;;  %v2892_v30 = vpack.c.bf16 %v2864_v43, %v2863_v39 }
 0x508   : > { %2987 = vrot.lane.b32.xlu2 %v2931_v46, %s6013_s13  ;;  %v8392_v19 = vpop.f32.mrf.mxu2 }
 0x509   : > { %2948 = vmatmul.bf16.gmra.mxu0 %v2892_v30 }
 0x50b   : > { %v8394_v49 = vpop.f32.mrf.mxu0 }
 0x50c   : > { %v3298_v25 = vpop.xlane.xlu0 %3297 }
 0x50d   : > { %5605 = vrcp.f32 %v3298_v25  ;;  %v3483_v52 = vand.u32 2147483648, %v3298_v25  ;;  %v3481_v31 = vand.u32 2147483647, %v3298_v25  ;;  %vm3477_vm13 = vweird.f32 %v3298_v25 }
 0x50f   : > { %v3484_v7 = vor.u32 1.1754944e-38, %v3483_v52  ;;  %vm3482_vm15 = vcmp.eq.f32.partialorder %v3481_v31, 8.507059e+37 }
 0x511   : > { %2985 = vrot.lane.b32.xlu1 %v2929_v32, %s6013_s13 }
 0x513   : > { %v5606_v57 = vpop.eup %5605  ;;  %v2936_v44 = vpop.f32.mrf.mxu0 }
 0x514   : > { %v3473_v38 = vmul.f32 %v5606_v57, %v3298_v25  ;;  %vm3478_vm12 = vweird.f32 %v5606_v57 }
 0x515   : > { %vm3479_vm14 = vmor %vm3477_vm13, %vm3478_vm12 }
 0x516   : > { %v3474_v34 = vsub.f32 1.0, %v3473_v38 }
 0x517   : > { %v3296_v54 = vpop.xlane.xlu2 %3295 }
 0x518   : > { %v3475_v13 = vmul.f32 %v5606_v57, %v3474_v34  ;;  %5607 = vrcp.f32 %v3296_v54  ;;  %v3468_v56 = vand.u32 2147483648, %v3296_v54  ;;  %vm3462_vm0 = vweird.f32 %v3296_v54 }
 0x519   : > { %2297 = vrot.lane.b32.xlu1 %v8296_v45, %s6014_s22  ;;  %v8398_v2 = vpop.f32.mrf.mxu2  ;;  %v3466_v45 = vand.u32 2147483647, %v3296_v54 }
 0x51a   : > { %v3476_v0 = vadd.f32 %v5606_v57, %v3475_v13  ;;  %v3469_v27 = vor.u32 1.1754944e-38, %v3468_v56 }
 0x51b   : > { %vm3467_vm3 = vcmp.eq.f32.partialorder %v3466_v45, 8.507059e+37 }
 0x51c   : > { %v3480_v53 = vsel %vm3479_vm14, %v5606_v57, %v3476_v0 }
 0x51d   : > { %v3485_v10 = vsel %vm3482_vm15, %v3484_v7, %v3480_v53 }
 0x51e   : > { %v5608_v29 = vpop.eup %5607  ;;  %v3558_v59 = vmul.f32 %v8127_v63, %v3485_v10 }
 0x51f   : > { %v3458_v41 = vmul.f32 %v5608_v29, %v3296_v54  ;;  %vm3463_vm1 = vweird.f32 %v5608_v29 }
 0x520   : > { %4989 = vst [vmem:[%s7303_s21 + $0x1d8] sm:$0xff] %v3558_v59  ;;  %vm3464_vm2 = vmor %vm3462_vm0, %vm3463_vm1 }
 0x521   : > { %v3459_v58 = vsub.f32 1.0, %v3458_v41  ;;  %2991 = vrot.lane.b32.xlu1 %v2936_v44, %s6013_s13  ;;  %v8403_v62 = vpop.f32.mrf.mxu2 }
 0x523   : > { %v3460_v50 = vmul.f32 %v5608_v29, %v3459_v58 }
 0x525   : > { %v3461_v9 = vadd.f32 %v5608_v29, %v3460_v50 }
 0x527   : > { %v3465_v14 = vsel %vm3464_vm2, %v5608_v29, %v3461_v9 }
 0x528   : > { %v3470_v63 = vsel %vm3467_vm3, %v3469_v27, %v3465_v14 }
 0x529   : > { %v3557_v18 = vmul.f32 %v8148_v51, %v3470_v63  ;;  %2301 = vrot.lane.b32.xlu1 %v8363_v40, %s6014_s22  ;;  %v8408_v36 = vpop.f32.mrf.mxu2 }
 0x52a   : > { %v2604_v3 = vpop.xlane.xlu1 %2603 }
 0x52b   : > { %5609 = vrcp.f32 %v2604_v3  ;;  %4988 = vst [vmem:[%s7303_s21 + $0x1d0] sm:$0xff] %v3557_v18  ;;  %v3585_v43 = vpack.c.bf16 %v3558_v59, %v3557_v18  ;;  %v2776_v37 = vand.u32 2147483648, %v2604_v3  ;;  %v2774_v51 = vand.u32 2147483647, %v2604_v3 }
 0x52c   : > { %vm2770_vm5 = vweird.f32 %v2604_v3 }
 0x52d   : > { %3645 = vmatmul.bf16.gmra.mxu2 %v3585_v43  ;;  %v2777_v5 = vor.u32 1.1754944e-38, %v2776_v37  ;;  %vm2775_vm7 = vcmp.eq.f32.partialorder %v2774_v51, 8.507059e+37 }
 0x531   : > { %v5610_v42 = vpop.eup %5609  ;;  %v8411_v32 = vpop.f32.mrf.mxu2 }
 0x532   : > { %v2766_v21 = vmul.f32 %v5610_v42, %v2604_v3  ;;  %v2606_v6 = vpop.xlane.xlu2 %2605  ;;  %vm2771_vm4 = vweird.f32 %v5610_v42 }
 0x533   : > { %5611 = vrcp.f32 %v2606_v6  ;;  %vm2772_vm6 = vmor %vm2770_vm5, %vm2771_vm4  ;;  %v2791_v46 = vand.u32 2147483648, %v2606_v6  ;;  %v2789_v25 = vand.u32 2147483647, %v2606_v6  ;;  %vm2785_vm9 = vweird.f32 %v2606_v6 }
 0x534   : > { %v2767_v16 = vsub.f32 1.0, %v2766_v21 }
 0x535   : > { %v2792_v52 = vor.u32 1.1754944e-38, %v2791_v46  ;;  %vm2790_vm11 = vcmp.eq.f32.partialorder %v2789_v25, 8.507059e+37 }
 0x536   : > { %v2768_v12 = vmul.f32 %v5610_v42, %v2767_v16 }
 0x538   : > { %v2769_v1 = vadd.f32 %v5610_v42, %v2768_v12 }
 0x539   : > { %v5612_v40 = vpop.eup %5611  ;;  %v8416_v57 = vpop.f32.mrf.mxu2 }
 0x53a   : > { %v2781_v4 = vmul.f32 %v5612_v40, %v2606_v6  ;;  %v2773_v20 = vsel %vm2772_vm6, %v5610_v42, %v2769_v1  ;;  %vm2786_vm8 = vweird.f32 %v5612_v40 }
 0x53b   : > { %v2778_v61 = vsel %vm2775_vm7, %v2777_v5, %v2773_v20  ;;  %v3621_v55 = vpop.f32.mrf.mxu1  ;;  %vm2787_vm10 = vmor %vm2785_vm9, %vm2786_vm8  ;;  %vm2341_vm8 = vcmask 523520  }
 0x53c   : > { %v2782_v22 = vsub.f32 1.0, %v2781_v4  ;;  %v2865_v39 = vmul.f32 %v8172_v28, %v2778_v61  ;;  %3677 = vrot.lane.b32.xlu0 %v3621_v55, %s6012_s1 }
 0x53e   : > { %v2783_v30 = vmul.f32 %v5612_v40, %v2782_v22  ;;  %4964 = vst [vmem:[%s7303_s21 + $0x150] sm:$0xff] %v2865_v39 }
 0x53f   : > { %v3302_v38 = vpop.xlane.xlu1 %3301 }
 0x540   : > { %v2784_v34 = vadd.f32 %v5612_v40, %v2783_v30  ;;  %5613 = vrcp.f32 %v3302_v38  ;;  %v3513_v44 = vand.u32 2147483648, %v3302_v38  ;;  %v3511_v50 = vand.u32 2147483647, %v3302_v38 }
 0x541   : > { %v8423_v41 = vpop.f32.mrf.mxu2  ;;  %vm3507_vm13 = vweird.f32 %v3302_v38 }
 0x542   : > { %v3300_v54 = vpop.xlane.xlu0 %3299  ;;  %v2788_v13 = vsel %vm2787_vm10, %v5612_v40, %v2784_v34  ;;  %vm3512_vm1 = vcmp.eq.f32.partialorder %v3511_v50, 8.507059e+37 }
 0x543   : > { %5615 = vrcp.f32 %v3300_v54  ;;  %v3623_v28 = vpop.f32.mrf.mxu1  ;;  %v2793_v31 = vsel %vm2790_vm11, %v2792_v52, %v2788_v13  ;;  %v3498_v14 = vand.u32 2147483648, %v3300_v54  ;;  %v3496_v63 = vand.u32 2147483647, %v3300_v54 }
 0x544   : > { %3679 = vrot.lane.b32.xlu2 %v3623_v28, %s6012_s1  ;;  %2299 = vrot.lane.b32.xlu0 %v8329_v23, %s6014_s22  ;;  %v2866_v0 = vmul.f32 %v8186_v47, %v2793_v31  ;;  %v3514_v47 = vor.u32 1.1754944e-38, %v3513_v44  ;;  %vm3492_vm0 = vweird.f32 %v3300_v54 }
 0x545   : > { %vm3497_vm3 = vcmp.eq.f32.partialorder %v3496_v63, 8.507059e+37 }
 0x546   : > { %v5614_v7 = vpop.eup %5613  ;;  %4965 = vst [vmem:[%s7303_s21 + $0x158] sm:$0xff] %v2866_v0  ;;  %v2893_v10 = vpack.c.bf16 %v2866_v0, %v2865_v39 }
 0x547   : > { %v3503_v53 = vmul.f32 %v5614_v7, %v3302_v38  ;;  %vm3508_vm12 = vweird.f32 %v5614_v7 }
 0x548   : > { %2953 = vmatmul.bf16.gmra.mxu0 %v2893_v10  ;;  %vm3509_vm14 = vmor %vm3507_vm13, %vm3508_vm12 }
 0x549   : > { %v5616_v29 = vpop.eup %5615  ;;  %v3504_v59 = vsub.f32 1.0, %v3503_v53  ;;  %v8429_v37 = vpop.f32.mrf.mxu2 }
 0x54a   : > { %v3488_v58 = vmul.f32 %v5616_v29, %v3300_v54  ;;  %vm3493_vm15 = vweird.f32 %v5616_v29 }
 0x54b   : > { %v3505_v56 = vmul.f32 %v5614_v7, %v3504_v59  ;;  %v3626_v9 = vpop.f32.mrf.mxu1  ;;  %vm3494_vm2 = vmor %vm3492_vm0, %vm3493_vm15 }
 0x54c   : > { %v3489_v45 = vsub.f32 1.0, %v3488_v58  ;;  %2989 = vrot.lane.b32.xlu2 %v8394_v49, %s6013_s13  ;;  %3681 = vrot.lane.b32.xlu0 %v3626_v9, %s6012_s1  ;;  %v3499_v49 = vor.u32 1.1754944e-38, %v3498_v14 }
 0x54d   : > { %v3506_v27 = vadd.f32 %v5614_v7, %v3505_v56 }
 0x54e   : > { %v3490_v23 = vmul.f32 %v5616_v29, %v3489_v45  ;;  %v2939_v42 = vpop.f32.mrf.mxu0 }
 0x54f   : > { %v3510_v18 = vsel %vm3509_vm14, %v5614_v7, %v3506_v27 }
 0x550   : > { %v3491_v3 = vadd.f32 %v5616_v29, %v3490_v23  ;;  %v3515_v43 = vsel %vm3512_vm1, %v3514_v47, %v3510_v18 }
 0x551   : > { %v3560_v21 = vmul.f32 %v8209_v60, %v3515_v43 }
 0x552   : > { %v2610_v6 = vpop.xlane.xlu0 %2609  ;;  %v3495_v16 = vsel %vm3494_vm2, %v5616_v29, %v3491_v3 }
 0x553   : > { %5617 = vrcp.f32 %v2610_v6  ;;  %4991 = vst [vmem:[%s7303_s21 + $0x1e8] sm:$0xff] %v3560_v21  ;;  %v3628_v12 = vpop.f32.mrf.mxu1  ;;  %v2608_v51 = vpop.xlane.xlu2 %2607  ;;  %v3500_v1 = vsel %vm3497_vm3, %v3499_v49, %v3495_v16  ;;  %vm2815_vm5 = vweird.f32 %v2610_v6  ;;  %v2819_v46 = vand.u32 2147483647, %v2610_v6 }
 0x554   : > { %5619 = vrcp.f32 %v2608_v51  ;;  %3683 = vrot.lane.b32.xlu2 %v3628_v12, %s6012_s1  ;;  %2303 = vrot.lane.b32.xlu0 %v8379_v17, %s6014_s22  ;;  %v3559_v40 = vmul.f32 %v8220_v8, %v3500_v1  ;;  %v8442_v17 = vpop.f32.mrf.mxu2  ;;  %v2821_v25 = vand.u32 2147483648, %v2610_v6  ;;  %v2806_v54 = vand.u32 2147483648, %v2608_v51 }
 0x555   : > { %v2804_v28 = vand.u32 2147483647, %v2608_v51  ;;  %vm2800_vm9 = vweird.f32 %v2608_v51  ;;  %vm2820_vm10 = vcmp.eq.f32.partialorder %v2819_v46, 8.507059e+37 }
 0x556   : > { %4990 = vst [vmem:[%s7303_s21 + $0x1e0] sm:$0xff] %v3559_v40  ;;  %v3586_v60 = vpack.c.bf16 %v3560_v21, %v3559_v40  ;;  %v2941_v4 = vpop.f32.mrf.mxu0  ;;  %v2822_v10 = vor.u32 1.1754944e-38, %v2821_v25  ;;  %v2807_v29 = vor.u32 1.1754944e-38, %v2806_v54 }
 0x557   : > { %2995 = vrot.lane.b32.xlu1 %v2941_v4, %s6013_s13  ;;  %vm2805_vm12 = vcmp.eq.f32.partialorder %v2804_v28, 8.507059e+37 }
 0x558   : > { %3650 = vmatmul.bf16.gmra.mxu2 %v3586_v60 }
 0x559   : > { %v5618_v5 = vpop.eup %5617 }
 0x55a   : > { %v2811_v20 = vmul.f32 %v5618_v5, %v2610_v6  ;;  %v5620_v61 = vpop.eup %5619  ;;  %vm2816_vm4 = vweird.f32 %v5618_v5 }
 0x55b   : > { %v2796_v55 = vmul.f32 %v5620_v61, %v2608_v51  ;;  %v8438_v39 = vpop.xlane.xlu2 %3305  ;;  %vm8447_vm6 = vmor %vm2815_vm5, %vm2816_vm4  ;;  %vm2801_vm7 = vweird.f32 %v5620_v61 }
 0x55c   : > { %v2812_v22 = vsub.f32 1.0, %v2811_v20  ;;  %2993 = vrot.lane.b32.xlu2 %v2939_v42, %s6013_s13  ;;  %5621 = vrcp.f32 %v8438_v39  ;;  %vm2802_vm11 = vmor %vm2800_vm9, %vm2801_vm7  ;;  %v3541_v27 = vand.u32 2147483647, %v8438_v39  ;;  %v3543_v18 = vand.u32 2147483648, %v8438_v39 }
 0x55d   : > { %v2797_v30 = vsub.f32 1.0, %v2796_v55  ;;  %vm3537_vm14 = vweird.f32 %v8438_v39 }
 0x55e   : > { %v2813_v8 = vmul.f32 %v5618_v5, %v2812_v22  ;;  %vm8475_vm1 = vcmp.eq.f32.partialorder %v3541_v27, 8.507059e+37  ;;  %v3544_v51 = vor.u32 1.1754944e-38, %v3543_v18 }
 0x55f   : > { %v8444_v38 = vpop.xlane.xlu0 %2611  ;;  %v2798_v52 = vmul.f32 %v5620_v61, %v2797_v30  ;;  %2305 = vrot.lane.b32.xlu1 %v8388_v15, %s6014_s22 }
 0x560   : > { %v2814_v34 = vadd.f32 %v5618_v5, %v2813_v8  ;;  %5623 = vrcp.f32 %v8444_v38  ;;  %v2836_v42 = vand.u32 2147483648, %v8444_v38  ;;  %v2834_v12 = vand.u32 2147483647, %v8444_v38 }
 0x561   : > { %v2799_v31 = vadd.f32 %v5620_v61, %v2798_v52  ;;  %vm2830_vm2 = vweird.f32 %v8444_v38 }
 0x562   : > { %v8453_v0 = vpop.xlane.xlu1 %3303  ;;  %v2818_v7 = vsel %vm8447_vm6, %v5618_v5, %v2814_v34  ;;  %v5622_v53 = vpop.eup %5621  ;;  %v2837_v4 = vor.u32 1.1754944e-38, %v2836_v42  ;;  %vm2835_vm5 = vcmp.eq.f32.partialorder %v2834_v12, 8.507059e+37 }
 0x563   : > { %5625 = vrcp.f32 %v8453_v0  ;;  %v3533_v59 = vmul.f32 %v5622_v53, %v8438_v39  ;;  %v2294_v44 = vpop.permute.xlu2 %2293  ;;  %v2803_v15 = vsel %vm2802_vm11, %v5620_v61, %v2799_v31  ;;  %v2823_v58 = vsel %vm2820_vm10, %v2822_v10, %v2818_v7 }
 0x564   : > { %2342 = vst.msk [vmem:[#allocation2] sm:$0xff] %vm2341_vm8, %v2294_v44  ;;  %v2808_v9 = vsel %vm2805_vm12, %v2807_v29, %v2803_v15  ;;  %v2868_v14 = vmul.f32 %v8287_v24, %v2823_v58  ;;  %vm3538_vm13 = vweird.f32 %v5622_v53  ;;  %v3528_v20 = vand.u32 2147483648, %v8453_v0 }
 0x565   : > { %v3534_v50 = vsub.f32 1.0, %v3533_v59  ;;  %v3631_v45 = vpop.f32.mrf.mxu2  ;;  %v2867_v23 = vmul.f32 %v8294_v35, %v2808_v9  ;;  %vm8471_vm15 = vmor %vm3537_vm14, %vm3538_vm13  ;;  %v3526_v22 = vand.u32 2147483647, %v8453_v0  ;;  %vm3522_vm6 = vweird.f32 %v8453_v0 }
 0x566   : > { %v5624_v56 = vpop.eup %5623  ;;  %3685 = vrot.lane.b32.xlu0 %v3631_v45, %s6012_s1  ;;  %4967 = vst [vmem:[%s7303_s21 + $0x168] sm:$0xff] %v2868_v14  ;;  %vm3033_vm10 = vcmask 785920   ;;  %v5161_v45 = vld [vmem:[#allocation9 + $0x30] sm:$0xff] }
 0x567   : > { %v2826_v47 = vmul.f32 %v5624_v56, %v8444_v38  ;;  %v3535_v63 = vmul.f32 %v5622_v53, %v3534_v50  ;;  %4966 = vst [vmem:[%s7303_s21 + $0x160] sm:$0xff] %v2867_v23  ;;  %v2894_v21 = vpack.c.bf16 %v2868_v14, %v2867_v23  ;;  %vm2831_vm0 = vweird.f32 %v5624_v56  ;;  %v5160_v23 = vld [vmem:[#allocation9 + $0x28] sm:$0xff]  ;;  %v5159_v14 = vld [vmem:[#allocation9 + $0x20] sm:$0xff] }
 0x568   : > { %vm2832_vm3 = vmor %vm2830_vm2, %vm2831_vm0  ;;  %v3529_v38 = vor.u32 1.1754944e-38, %v3528_v20  ;;  %vm3527_vm9 = vcmp.eq.f32.partialorder %v3526_v22, 8.507059e+37 }
 0x569   : > { %v5626_v3 = vpop.eup %5625  ;;  %v2827_v43 = vsub.f32 1.0, %v2826_v47  ;;  %v3536_v49 = vadd.f32 %v5622_v53, %v3535_v63  ;;  %2958 = vmatmul.bf16.gmra.mxu0 %v2894_v21  ;;  %v5156_v21 = vld [vmem:[#allocation9 + $0x8] sm:$0xff] }
 0x56a   : > { %v3518_v6 = vmul.f32 %v5626_v3, %v8453_v0  ;;  %vm3523_vm4 = vweird.f32 %v5626_v3 }
 0x56b   : > { %v2828_v16 = vmul.f32 %v5624_v56, %v2827_v43  ;;  %v2614_v40 = vpop.xlane.xlu1 %2613  ;;  %v3540_v60 = vsel %vm8471_vm15, %v5622_v53, %v3536_v49  ;;  %vm3524_vm7 = vmor %vm3522_vm6, %vm3523_vm4  ;;  %v2988_v28 = vpop.permute.xlu2 %2987  ;;  %v5157_v43 = vld [vmem:[#allocation9 + $0x10] sm:$0xff]  ;;  %vm3725_vm15 = vcmask 1048320  }
 0x56c   : > { %v3519_v1 = vsub.f32 1.0, %v3518_v6  ;;  %5627 = vrcp.f32 %v2614_v40  ;;  %v3545_v39 = vsel %vm8475_vm1, %v3544_v51, %v3540_v60  ;;  %v2851_v10 = vand.u32 2147483648, %v2614_v40  ;;  %v5155_v6 = vld [vmem:[#allocation9] sm:$0xff] }
 0x56d   : > { %v2829_v5 = vadd.f32 %v5624_v56, %v2828_v16  ;;  %v3633_v55 = vpop.f32.mrf.mxu2  ;;  %v3562_v8 = vmul.f32 %v8312_v26, %v3545_v39  ;;  %v2849_v59 = vand.u32 2147483647, %v2614_v40  ;;  %vm2845_vm12 = vweird.f32 %v2614_v40 }
 0x56e   : > { %v3520_v61 = vmul.f32 %v5626_v3, %v3519_v1  ;;  %3687 = vrot.lane.b32.xlu2 %v3633_v55, %s6012_s1  ;;  %2307 = vrot.lane.b32.xlu0 %v8392_v19, %s6014_s22  ;;  %v2852_v58 = vor.u32 1.1754944e-38, %v2851_v10 }
 0x56f   : > { %v2833_v30 = vsel %vm2832_vm3, %v5624_v56, %v2829_v5  ;;  %v2944_v34 = vpop.f32.mrf.mxu0  ;;  %4993 = vst [vmem:[%s7303_s21 + $0x1f8] sm:$0xff] %v3562_v8  ;;  %vm2850_vm14 = vcmp.eq.f32.partialorder %v2849_v59, 8.507059e+37 }
 0x570   : > { %v3521_v46 = vadd.f32 %v5626_v3, %v3520_v61  ;;  %v2838_v25 = vsel %vm2835_vm5, %v2837_v4, %v2833_v30 }
 0x571   : > { %v2869_v52 = vmul.f32 %v8327_v33, %v2838_v25  ;;  %v5162_v33 = vld [vmem:[#allocation9 + $0x38] sm:$0xff] }
 0x572   : > { %v2296_v54 = vpop.permute.xlu0 %2295  ;;  %v3525_v13 = vsel %vm3524_vm7, %v5626_v3, %v3521_v46  ;;  %v5628_v19 = vpop.eup %5627  ;;  %3830 = vmatpush.bf16.msrb.mxu3 %v5162_v33  ;;  %v5158_v3 = vld [vmem:[#allocation9 + $0x18] sm:$0xff] }
 0x573   : > { %2343 = vst.msk [vmem:[#allocation2 + $0x8] sm:$0xff] %vm2341_vm8, %v2296_v54  ;;  %v3530_v26 = vsel %vm3527_vm9, %v3529_v38, %v3525_v13  ;;  %v2841_v31 = vmul.f32 %v5628_v19, %v2614_v40  ;;  %vm2846_vm11 = vweird.f32 %v5628_v19 }
 0x574   : > { %v3561_v0 = vmul.f32 %v8339_v48, %v3530_v26  ;;  %4968 = vst [vmem:[%s7303_s21 + $0x170] sm:$0xff] %v2869_v52  ;;  %vm2847_vm13 = vmor %vm2845_vm12, %vm2846_vm11 }
 0x575   : > { %3035 = vst.msk [vmem:[#allocation2 + $0x8] sm:$0xff] %vm3033_vm10, %v2988_v28  ;;  %v2842_v7 = vsub.f32 1.0, %v2841_v31  ;;  %v3636_v44 = vpop.f32.mrf.mxu2 }
 0x576   : > { %4992 = vst [vmem:[%s7303_s21 + $0x1f0] sm:$0xff] %v3561_v0  ;;  %v3587_v53 = vpack.c.bf16 %v3562_v8, %v3561_v0  ;;  %2997 = vrot.lane.b32.xlu2 %v2944_v34, %s6013_s13  ;;  %3689 = vrot.lane.b32.xlu0 %v3636_v44, %s6012_s1 }
 0x577   : > { %v2843_v29 = vmul.f32 %v5628_v19, %v2842_v7  ;;  %v2946_v15 = vpop.f32.mrf.mxu0  ;;  %3831 = vmatpush.bf16.msrb.mxu3 %v5161_v45 }
 0x578   : > { %3655 = vmatmul.bf16.gmra.mxu2 %v3587_v53  ;;  %2999 = vrot.lane.b32.xlu1 %v2946_v15, %s6013_s13 }
 0x579   : > { %v2844_v48 = vadd.f32 %v5628_v19, %v2843_v29 }
 0x57b   : > { %v2848_v56 = vsel %vm2847_vm13, %v5628_v19, %v2844_v48  ;;  %3832 = vmatpush.bf16.msrb.mxu3 %v5160_v23 }
 0x57c   : > { %v2853_v50 = vsel %vm2850_vm14, %v2852_v58, %v2848_v56 }
 0x57d   : > { %v2870_v9 = vmul.f32 %v8371_v11, %v2853_v50  ;;  %v3638_v27 = vpop.f32.mrf.mxu2 }
 0x57e   : > { %3691 = vrot.lane.b32.xlu2 %v3638_v27, %s6012_s1  ;;  %2311 = vrot.lane.b32.xlu0 %v8403_v62, %s6014_s22 }
 0x57f   : > { %4969 = vst [vmem:[%s7303_s21 + $0x178] sm:$0xff] %v2870_v9  ;;  %v2895_v47 = vpack.c.bf16 %v2870_v9, %v2869_v52  ;;  %3833 = vmatpush.bf16.msrb.mxu3 %v5159_v14 }
 0x580   : > { %2309 = vrot.lane.b32.xlu1 %v8398_v2, %s6014_s22 }
 0x581   : > { %2963 = vmatmul.bf16.gmra.mxu0 %v2895_v47 }
 0x583   : > { %v2986_v63 = vpop.permute.xlu1 %2985  ;;  %3834 = vmatpush.bf16.msrb.mxu3 %v5158_v3 }
 0x584   : > { %3034 = vst.msk [vmem:[#allocation2] sm:$0xff] %vm3033_vm10, %v2986_v63 }
 0x585   : > { %v3641_v18 = vpop.f32.mrf.mxu2 }
 0x586   : > { %v2949_v11 = vpop.f32.mrf.mxu0  ;;  %3693 = vrot.lane.b32.xlu0 %v3641_v18, %s6012_s1 }
 0x587   : > { %3001 = vrot.lane.b32.xlu2 %v2949_v11, %s6013_s13  ;;  %3835 = vmatpush.bf16.msrb.mxu3 %v5157_v43  ;;  %v5661_v43 = vld [vmem:[%s6208_s9] sm:$0xff] }
 0x58b   : > { %v2298_v62 = vpop.permute.xlu1 %2297  ;;  %3836 = vmatpush.bf16.msrb.mxu3 %v5156_v21 }
 0x58c   : > { %2344 = vst.msk [vmem:[#allocation2 + $0x10] sm:$0xff] %vm2341_vm8, %v2298_v62 }
 0x58d   : > { %v3643_v42 = vpop.f32.mrf.mxu2 }
 0x58e   : > { %v2951_v2 = vpop.f32.mrf.mxu0  ;;  %2315 = vrot.lane.b32.xlu0 %v8411_v32, %s6014_s22 }
 0x58f   : > { %3003 = vrot.lane.b32.xlu1 %v2951_v2, %s6013_s13  ;;  %3695 = vrot.lane.b32.xlu2 %v3643_v42, %s6012_s1 }
 0x590   : > { %3837 = vmatpush.bf16.msrb.mxu3 %v5155_v6  ;;  %v5662_v6 = vld [vmem:[%s6208_s9 + $0x8] sm:$0xff] }
 0x593   : > { %v2992_v49 = vpop.permute.xlu1 %2991 }
 0x597   : > { %2313 = vrot.lane.b32.xlu1 %v8408_v36, %s6014_s22 }
 0x59b   : > { %v2302_v35 = vpop.permute.xlu1 %2301 }
 0x59c   : > { %2346 = vst.msk [vmem:[#allocation2 + $0x20] sm:$0xff] %vm2341_vm8, %v2302_v35 }
 0x59e   : > { %v3680_v24 = vpop.permute.xlu2 %3679 }
 0x59f   : > { %3727 = vst.msk [vmem:[#allocation2 + $0x8] sm:$0xff] %vm3725_vm15, %v3680_v24 }
 0x5a6   : > { %v2990_v16 = vpop.permute.xlu2 %2989  ;;  %v3743_v60 = vld [vmem:[#allocation2 + $0x8] sm:$0xff] }
 0x5a7   : > { %3036 = vst.msk [vmem:[#allocation2 + $0x10] sm:$0xff] %vm3033_vm10, %v2990_v16 }
 0x5ae   : > { %v3684_v32 = vpop.permute.xlu2 %3683  ;;  %v3678_v12 = vpop.permute.xlu0 %3677 }
 0x5af   : > { %3726 = vst.msk [vmem:[#allocation2] sm:$0xff] %vm3725_vm15, %v3678_v12 }
 0x5b0   : > { %v3646_v51 = vpop.f32.mrf.mxu2 }
 0x5b1   : > { %3697 = vrot.lane.b32.xlu0 %v3646_v51, %s6012_s1 }
 0x5b6   : > { %v2994_v1 = vpop.permute.xlu2 %2993  ;;  %v2300_v36 = vpop.permute.xlu0 %2299  ;;  %v3742_v40 = vld [vmem:[#allocation2] sm:$0xff] }
 0x5b7   : > { %3038 = vst.msk [vmem:[#allocation2 + $0x20] sm:$0xff] %vm3033_vm10, %v2994_v1  ;;  %v3758_v5 = vpack.c.bf16 %v3743_v60, %v3742_v40  ;;  %v5663_v40 = vld [vmem:[%s6208_s9 + $0x10] sm:$0xff] }
 0x5b8   : > { %2345 = vst.msk [vmem:[#allocation2 + $0x18] sm:$0xff] %vm2341_vm8, %v2300_v36 }
 0x5b9   : > { %3037 = vst.msk [vmem:[#allocation2 + $0x18] sm:$0xff] %vm3033_vm10, %v2992_v49  ;;  %2319 = vrot.lane.b32.xlu0 %v8423_v41, %s6014_s22  ;;  %3838 = vmatmul.bf16.vlgmr.msrb.gmra.mxu3 %v3758_v5  ;;  %v3648_v41 = vpop.f32.mrf.mxu2 }
 0x5ba   : > { %3729 = vst.msk [vmem:[#allocation2 + $0x18] sm:$0xff] %vm3725_vm15, %v3684_v32 }
 0x5be   : > { %v3682_v4 = vpop.permute.xlu0 %3681 }
 0x5bf   : > { %3728 = vst.msk [vmem:[#allocation2 + $0x10] sm:$0xff] %vm3725_vm15, %v3682_v4 }
 0x5c1   : > { %v3745_v55 = vld [vmem:[#allocation2 + $0x18] sm:$0xff] }
 0x5c5   : > { %v2954_v20 = vpop.f32.mrf.mxu0 }
 0x5c6   : > { %v2304_v61 = vpop.permute.xlu0 %2303  ;;  %3005 = vrot.lane.b32.xlu2 %v2954_v20, %s6013_s13  ;;  %v3744_v22 = vld [vmem:[#allocation2 + $0x10] sm:$0xff] }
 0x5c7   : > { %2347 = vst.msk [vmem:[#allocation2 + $0x28] sm:$0xff] %vm2341_vm8, %v2304_v61  ;;  %v3759_v39 = vpack.c.bf16 %v3745_v55, %v3744_v22  ;;  %v5664_v61 = vld [vmem:[%s6208_s9 + $0x18] sm:$0xff] }
 0x5c8   : > { %v3688_v8 = vpop.permute.xlu2 %3687 }
 0x5c9   : > { %3843 = vmatmul.bf16.gmra.mxu3 %v3759_v39  ;;  %v2996_v30 = vpop.permute.xlu1 %2995 }
 0x5ca   : > { %3039 = vst.msk [vmem:[#allocation2 + $0x28] sm:$0xff] %vm3033_vm10, %v2996_v30 }
 0x5cb   : > { %3731 = vst.msk [vmem:[#allocation2 + $0x28] sm:$0xff] %vm3725_vm15, %v3688_v8 }
 0x5cd   : > { %v2956_v46 = vpop.f32.mrf.mxu0 }
 0x5ce   : > { %3699 = vrot.lane.b32.xlu2 %v3648_v41, %s6012_s1  ;;  %3007 = vrot.lane.b32.xlu1 %v2956_v46, %s6013_s13  ;;  %v5665_v46 = vld [vmem:[%s6208_s9 + $0x20] sm:$0xff] }
 0x5d0   : > { %v2998_v38 = vpop.permute.xlu2 %2997 }
 0x5d1   : > { %v2306_v25 = vpop.permute.xlu1 %2305 }
 0x5d2   : > { %2348 = vst.msk [vmem:[#allocation2 + $0x30] sm:$0xff] %vm2341_vm8, %v2306_v25  ;;  %v3747_v19 = vld [vmem:[#allocation2 + $0x28] sm:$0xff] }
 0x5d3   : > { %3040 = vst.msk [vmem:[#allocation2 + $0x30] sm:$0xff] %vm3033_vm10, %v2998_v38 }
 0x5d6   : > { %2317 = vrot.lane.b32.xlu1 %v8416_v57, %s6014_s22 }
 0x5d8   : > { %v3686_v34 = vpop.permute.xlu0 %3685  ;;  %v3692_v57 = vpop.permute.xlu2 %3691 }
 0x5d9   : > { %3730 = vst.msk [vmem:[#allocation2 + $0x20] sm:$0xff] %vm3725_vm15, %v3686_v34 }
 0x5db   : > { %v3651_v52 = vpop.f32.mrf.mxu2 }
 0x5dc   : > { %3701 = vrot.lane.b32.xlu0 %v3651_v52, %s6012_s1 }
 0x5e0   : > { %v2308_v54 = vpop.permute.xlu0 %2307  ;;  %v3746_v13 = vld [vmem:[#allocation2 + $0x20] sm:$0xff] }
 0x5e1   : > { %2349 = vst.msk [vmem:[#allocation2 + $0x38] sm:$0xff] %vm2341_vm8, %v2308_v54  ;;  %v3760_v26 = vpack.c.bf16 %v3747_v19, %v3746_v13  ;;  %v3002_v33 = vpop.permute.xlu2 %3001 }
 0x5e3   : > { %3848 = vmatmul.bf16.gmra.mxu3 %v3760_v26  ;;  %v3653_v7 = vpop.f32.mrf.mxu2 }
 0x5e4   : > { %2323 = vrot.lane.b32.xlu0 %v8442_v17, %s6014_s22 }
 0x5e6   : > { %v2959_v28 = vpop.f32.mrf.mxu0 }
 0x5e7   : > { %3009 = vrot.lane.b32.xlu2 %v2959_v28, %s6013_s13 }
 0x5e8   : > { %v3690_v31 = vpop.permute.xlu0 %3689 }
 0x5e9   : > { %3732 = vst.msk [vmem:[#allocation2 + $0x30] sm:$0xff] %vm3725_vm15, %v3690_v31  ;;  %v3696_v50 = vpop.permute.xlu2 %3695 }
 0x5ea   : > { %v3000_v0 = vpop.permute.xlu1 %2999 }
 0x5eb   : > { %3041 = vst.msk [vmem:[#allocation2 + $0x38] sm:$0xff] %vm3033_vm10, %v3000_v0 }
 0x5ec   : > { %3733 = vst.msk [vmem:[#allocation2 + $0x38] sm:$0xff] %vm3725_vm15, %v3692_v57  ;;  %v5666_v57 = vld [vmem:[%s6208_s9 + $0x28] sm:$0xff] }
 0x5ee   : > { %v2961_v53 = vpop.f32.mrf.mxu0 }
 0x5ef   : > { %3011 = vrot.lane.b32.xlu1 %v2961_v53, %s6013_s13  ;;  %3703 = vrot.lane.b32.xlu2 %v3653_v7, %s6012_s1 }
 0x5f0   : > { %v2312_v10 = vpop.permute.xlu0 %2311  ;;  %v3748_v29 = vld [vmem:[#allocation2 + $0x30] sm:$0xff] }
 0x5f1   : > { %2351 = vst.msk [vmem:[#allocation2 + $0x48] sm:$0xff] %vm2341_vm8, %v2312_v10 }
 0x5f2   : > { %v2310_v17 = vpop.permute.xlu1 %2309 }
 0x5f3   : > { %2350 = vst.msk [vmem:[#allocation2 + $0x40] sm:$0xff] %vm2341_vm8, %v2310_v17  ;;  %v3749_v59 = vld [vmem:[#allocation2 + $0x38] sm:$0xff]  ;;  %v5667_v17 = vld [vmem:[%s6208_s9 + $0x30] sm:$0xff] }
 0x5f4   : > { %3042 = vst.msk [vmem:[#allocation2 + $0x40] sm:$0xff] %vm3033_vm10, %v3002_v33  ;;  %v3761_v44 = vpack.c.bf16 %v3749_v59, %v3748_v29 }
 0x5f6   : > { %3853 = vmatmul.bf16.gmra.mxu3 %v3761_v44 }
 0x5f7   : > { %2321 = vrot.lane.b32.xlu1 %v8429_v37, %s6014_s22  ;;  %s5907_s22 = scalar_lea.hbm %s8860_s8, 1024 }
 0x5f8   : > { %v3694_v15 = vpop.permute.xlu0 %3693 }
 0x5f9   : > { %3734 = vst.msk [vmem:[#allocation2 + $0x40] sm:$0xff] %vm3725_vm15, %v3694_v15 }
 0x5fb   : > { %v3656_v48 = vpop.f32.mrf.mxu2 }
 0x5fc   : > { %3705 = vrot.lane.b32.xlu0 %v3656_v48, %s6012_s1  ;;  %v5668_v48 = vld [vmem:[%s6208_s9 + $0x38] sm:$0xff] }
 0x5fe   : > { %v2964_v58 = vpop.f32.mrf.mxu0 }
 0x5ff   : > { %3013 = vrot.lane.b32.xlu2 %v2964_v58, %s6013_s13 }
 0x600   : > { %v2316_v45 = vpop.permute.xlu0 %2315  ;;  %v3750_v47 = vld [vmem:[#allocation2 + $0x40] sm:$0xff] }
 0x601   : > { %v3004_v56 = vpop.permute.xlu1 %3003  ;;  %2353 = vst.msk [vmem:[#allocation2 + $0x58] sm:$0xff] %vm2341_vm8, %v2316_v45 }
 0x602   : > { %3043 = vst.msk [vmem:[#allocation2 + $0x48] sm:$0xff] %vm3033_vm10, %v3004_v56 }
 0x603   : > { %3735 = vst.msk [vmem:[#allocation2 + $0x48] sm:$0xff] %vm3725_vm15, %v3696_v50  ;;  %v3658_v9 = vpop.f32.mrf.mxu2 }
 0x606   : > { %v2966_v37 = vpop.f32.mrf.mxu0 }
 0x607   : > { %3707 = vrot.lane.b32.xlu2 %v3658_v9, %s6012_s1  ;;  %3015 = vrot.lane.b32.xlu1 %v2966_v37, %s6013_s13  ;;  %v5669_v9 = vld [vmem:[%s6208_s9 + $0x40] sm:$0xff] }
 0x609   : > { %v2314_v27 = vpop.permute.xlu1 %2313 }
 0x60a   : > { %2352 = vst.msk [vmem:[#allocation2 + $0x50] sm:$0xff] %vm2341_vm8, %v2314_v27  ;;  %v3751_v23 = vld [vmem:[#allocation2 + $0x48] sm:$0xff] }
 0x60b   : > { %v3762_v14 = vpack.c.bf16 %v3751_v23, %v3750_v47  ;;  %v5670_v23 = vld [vmem:[%s6208_s9 + $0x48] sm:$0xff] }
 0x60d   : > { %3858 = vmatmul.bf16.gmra.mxu3 %v3762_v14 }
 0x620   : > { %v3006_v63 = vpop.permute.xlu2 %3005 }
 0x621   : > { %3044 = vst.msk [vmem:[#allocation2 + $0x50] sm:$0xff] %vm3033_vm10, %v3006_v63 }
 0x623   : > { %v3698_v11 = vpop.permute.xlu0 %3697 }
 0x624   : > { %3736 = vst.msk [vmem:[#allocation2 + $0x50] sm:$0xff] %vm3725_vm15, %v3698_v11  ;;  %v5170_v11 = vld [vmem:[#allocation11 + $0x38] sm:$0xff] }
 0x625   : > { %4240 = vmatpush.bf16.msra.mxu0 %v5170_v11 }
 0x628   : > { %v3700_v21 = vpop.permute.xlu2 %3699 }
 0x62b   : > { %v2320_v18 = vpop.permute.xlu0 %2319  ;;  %v3752_v12 = vld [vmem:[#allocation2 + $0x50] sm:$0xff] }
 0x62c   : > { %2355 = vst.msk [vmem:[#allocation2 + $0x68] sm:$0xff] %vm2341_vm8, %v2320_v18  ;;  %v5169_v18 = vld [vmem:[#allocation11 + $0x30] sm:$0xff] }
 0x62d   : > { %4241 = vmatpush.bf16.msra.mxu0 %v5169_v18 }
 0x63c   : > { %v3839_v3 = vpop.f32.mrf.mxu3 }
 0x63d   : > { %v8570_v62 = vadd.f32 %v5661_v43, %v3839_v3  ;;  %v5168_v3 = vld [vmem:[#allocation11 + $0x28] sm:$0xff]  ;;  %v5167_v43 = vld [vmem:[#allocation11 + $0x20] sm:$0xff] }
 0x63e   : > { %4242 = vmatpush.bf16.msra.mxu0 %v5168_v3 }
 0x63f   : > { %v3895_v2 = vmul.f32 %v8570_v62, %v8570_v62 }
 0x640   : > { %v3008_v42 = vpop.permute.xlu1 %3007 }
 0x641   : > { %3911 = vadd.xlane.f32.xlu1 %v3895_v2  ;;  %3045 = vst.msk [vmem:[#allocation2 + $0x58] sm:$0xff] %vm3033_vm10, %v3008_v42  ;;  %v3010_v32 = vpop.permute.xlu2 %3009  ;;  %v5166_v2 = vld [vmem:[#allocation11 + $0x18] sm:$0xff] }
 0x642   : > { %3737 = vst.msk [vmem:[#allocation2 + $0x58] sm:$0xff] %vm3725_vm15, %v3700_v21  ;;  %4243 = vmatpush.bf16.msra.mxu0 %v5167_v43  ;;  %v5165_v21 = vld [vmem:[#allocation11 + $0x10] sm:$0xff] }
 0x644   : > { %v3841_v49 = vpop.f32.mrf.mxu3 }
 0x645   : > { %v8577_v35 = vadd.f32 %v5662_v6, %v3841_v49  ;;  %v9001_v49 = vld [vmem:[#allocation24_spill] sm:$0xff] }
 0x646   : > { %4244 = vmatpush.bf16.msra.mxu0 %v5166_v2 }
 0x647   : > { %v3896_v24 = vmul.f32 %v8577_v35, %v8577_v35 }
 0x648   : > { %v2318_v16 = vpop.permute.xlu1 %2317 }
 0x649   : > { %3913 = vadd.xlane.f32.xlu0 %v3896_v24  ;;  %2354 = vst.msk [vmem:[#allocation2 + $0x60] sm:$0xff] %vm2341_vm8, %v2318_v16  ;;  %v3753_v51 = vld [vmem:[#allocation2 + $0x58] sm:$0xff]  ;;  %v3704_v30 = vpop.permute.xlu2 %3703  ;;  %v5164_v16 = vld [vmem:[#allocation11 + $0x8] sm:$0xff] }
 0x64a   : > { %3046 = vst.msk [vmem:[#allocation2 + $0x60] sm:$0xff] %vm3033_vm10, %v3010_v32  ;;  %v3763_v1 = vpack.c.bf16 %v3753_v51, %v3752_v12  ;;  %4245 = vmatpush.bf16.msra.mxu0 %v5165_v21  ;;  %v5163_v12 = vld [vmem:[#allocation11] sm:$0xff] }
 0x64c   : > { %v3844_v36 = vpop.f32.mrf.mxu3  ;;  %3863 = vmatmul.bf16.gmra.mxu3 %v3763_v1 }
 0x64d   : > { %v8584_v60 = vadd.f32 %v5663_v40, %v3844_v36 }
 0x64e   : > { %v3702_v5 = vpop.permute.xlu0 %3701  ;;  %4246 = vmatpush.bf16.msra.mxu0 %v5164_v16 }
 0x64f   : > { %v3897_v4 = vmul.f32 %v8584_v60, %v8584_v60  ;;  %3738 = vst.msk [vmem:[#allocation2 + $0x60] sm:$0xff] %vm3725_vm15, %v3702_v5 }
 0x651   : > { %3915 = vadd.xlane.f32.xlu2 %v3897_v4 }
 0x652   : > { %4247 = vmatpush.bf16.msra.mxu0 %v5163_v12 }
 0x654   : > { %v3846_v20 = vpop.f32.mrf.mxu3 }
 0x655   : > { %v8590_v22 = vadd.f32 %v5664_v61, %v3846_v20 }
 0x656   : > { %v2324_v55 = vpop.permute.xlu0 %2323  ;;  %v3754_v54 = vld [vmem:[#allocation2 + $0x60] sm:$0xff] }
 0x657   : > { %v3898_v39 = vmul.f32 %v8590_v22, %v8590_v22  ;;  %2357 = vst.msk [vmem:[#allocation2 + $0x78] sm:$0xff] %vm2341_vm8, %v2324_v55 }
 0x659   : > { %3917 = vadd.xlane.f32.xlu1 %v3898_v39  ;;  %v3014_v52 = vpop.permute.xlu2 %3013 }
 0x661   : > { %v3012_v8 = vpop.permute.xlu1 %3011  ;;  %v3708_v53 = vpop.permute.xlu2 %3707 }
 0x662   : > { %3047 = vst.msk [vmem:[#allocation2 + $0x68] sm:$0xff] %vm3033_vm10, %v3012_v8 }
 0x663   : > { %3739 = vst.msk [vmem:[#allocation2 + $0x68] sm:$0xff] %vm3725_vm15, %v3704_v30 }
 0x666   : > { %v3849_v41 = vpop.f32.mrf.mxu3 }
 0x667   : > { %v8598_v25 = vadd.f32 %v5665_v46, %v3849_v41 }
 0x669   : > { %v3899_v38 = vmul.f32 %v8598_v25, %v8598_v25  ;;  %v2322_v34 = vpop.permute.xlu1 %2321 }
 0x66a   : > { %2356 = vst.msk [vmem:[#allocation2 + $0x70] sm:$0xff] %vm2341_vm8, %v2322_v34  ;;  %v3755_v13 = vld [vmem:[#allocation2 + $0x68] sm:$0xff] }
 0x66b   : > { %3919 = vadd.xlane.f32.xlu0 %v3899_v38  ;;  %3048 = vst.msk [vmem:[#allocation2 + $0x70] sm:$0xff] %vm3033_vm10, %v3014_v52  ;;  %v3764_v19 = vpack.c.bf16 %v3755_v13, %v3754_v54 }
 0x66d   : > { %3868 = vmatmul.bf16.gmra.mxu3 %v3764_v19 }
 0x66e   : > { %v3706_v26 = vpop.permute.xlu0 %3705  ;;  %v3851_v28 = vpop.f32.mrf.mxu3 }
 0x66f   : > { %3740 = vst.msk [vmem:[#allocation2 + $0x70] sm:$0xff] %vm3725_vm15, %v3706_v26  ;;  %v8606_v31 = vadd.f32 %v5666_v57, %v3851_v28 }
 0x671   : > { %v3900_v0 = vmul.f32 %v8606_v31, %v8606_v31 }
 0x673   : > { %3921 = vadd.xlane.f32.xlu2 %v3900_v0 }
 0x676   : > { %v3756_v44 = vld [vmem:[#allocation2 + $0x70] sm:$0xff] }
 0x679   : > { %v3016_v7 = vpop.permute.xlu1 %3015  ;;  %v3854_v10 = vpop.f32.mrf.mxu3 }
 0x67a   : > { %3049 = vst.msk [vmem:[#allocation2 + $0x78] sm:$0xff] %vm3033_vm10, %v3016_v7  ;;  %v8612_v33 = vadd.f32 %v5667_v17, %v3854_v10  ;;  %v5671_v7 = vld [vmem:[%s6208_s9 + $0x50] sm:$0xff]  ;;  %v8639_v10 = vld [vmem:[#allocation6 + $0x1] ss:$0 sm:$0xff] }
 0x67b   : > { %3741 = vst.msk [vmem:[#allocation2 + $0x78] sm:$0xff] %vm3725_vm15, %v3708_v53 }
 0x67c   : > { %v3901_v29 = vmul.f32 %v8612_v33, %v8612_v33 }
 0x67e   : > { %3923 = vadd.xlane.f32.xlu1 %v3901_v29 }
 0x681   : > { %v3856_v59 = vpop.f32.mrf.mxu3 }
 0x682   : > { %v3757_v15 = vld [vmem:[#allocation2 + $0x78] sm:$0xff]  ;;  %v8618_v58 = vadd.f32 %v5668_v48, %v3856_v59 }
 0x683   : > { %v3765_v56 = vpack.c.bf16 %v3757_v15, %v3756_v44 }
 0x684   : > { %v3902_v50 = vmul.f32 %v8618_v58, %v8618_v58 }
 0x685   : > { %3873 = vmatmul.bf16.gmra.mxu3 %v3765_v56 }
 0x686   : > { %3925 = vadd.xlane.f32.xlu0 %v3902_v50 }
 0x690   : > { %v3859_v45 = vpop.f32.mrf.mxu3 }
 0x691   : > { %v8623_v37 = vadd.f32 %v5669_v9, %v3859_v45 }
 0x693   : > { %v3903_v27 = vmul.f32 %v8623_v37, %v8623_v37 }
 0x695   : > { %3927 = vadd.xlane.f32.xlu2 %v3903_v27 }
 0x698   : > { %v3861_v47 = vpop.f32.mrf.mxu3 }
 0x699   : > { %v8628_v14 = vadd.f32 %v5670_v23, %v3861_v47 }
 0x69b   : > { %v3904_v63 = vmul.f32 %v8628_v14, %v8628_v14 }
 0x69d   : > { %3929 = vadd.xlane.f32.xlu1 %v3904_v63  ;;  %v5672_v63 = vld [vmem:[%s6208_s9 + $0x58] sm:$0xff] }
 0x6b4   : > { %v3912_v42 = vpop.xlane.xlu1 %3911 }
 0x6b5   : > { %v3943_v6 = vmul.f32 %v3912_v42, %v9001_v49 }
 0x6b7   : > { %v3959_v24 = vadd.f32 1e-06, %v3943_v6 }
 0x6b9   : > { %5629 = vrsqrt.f32 %v3959_v24  ;;  %vm3981_vm1 = vweird.f32 %v3959_v24 }
 0x6bc   : > { %v3914_v32 = vpop.xlane.xlu0 %3913 }
 0x6bd   : > { %v3944_v51 = vmul.f32 %v3914_v32, %v9001_v49 }
 0x6bf   : > { %v5630_v1 = vpop.eup %5629  ;;  %v3960_v36 = vadd.f32 1e-06, %v3944_v51 }
 0x6c0   : > { %v3976_v40 = vmul.f32 %v5630_v1, %v3959_v24  ;;  %vm3982_vm8 = vweird.f32 %v5630_v1 }
 0x6c1   : > { %5631 = vrsqrt.f32 %v3960_v36  ;;  %vm3983_vm0 = vmor %vm3981_vm1, %vm3982_vm8  ;;  %vm3991_vm3 = vweird.f32 %v3960_v36 }
 0x6c2   : > { %v3977_v5 = vmul.f32 %v5630_v1, %v3976_v40 }
 0x6c4   : > { %v3978_v4 = vmul.f32 0.5, %v3977_v5  ;;  %v3916_v20 = vpop.xlane.xlu2 %3915 }
 0x6c5   : > { %v3945_v61 = vmul.f32 %v3916_v20, %v9001_v49 }
 0x6c6   : > { %v3979_v55 = vsub.f32 1.5, %v3978_v4 }
 0x6c7   : > { %v5632_v39 = vpop.eup %5631  ;;  %v3961_v8 = vadd.f32 1e-06, %v3945_v61 }
 0x6c8   : > { %v3986_v30 = vmul.f32 %v5632_v39, %v3960_v36  ;;  %v3980_v41 = vmul.f32 %v5630_v1, %v3979_v55  ;;  %vm3992_vm2 = vweird.f32 %v5632_v39 }
 0x6c9   : > { %5633 = vrsqrt.f32 %v3961_v8  ;;  %vm3993_vm4 = vmor %vm3991_vm3, %vm3992_vm2  ;;  %vm4001_vm6 = vweird.f32 %v3961_v8 }
 0x6ca   : > { %v3987_v46 = vmul.f32 %v5632_v39, %v3986_v30  ;;  %v3984_v54 = vsel %vm3983_vm0, %v5630_v1, %v3980_v41 }
 0x6cb   : > { %v4135_v17 = vmul.f32 %v3984_v54, %v8570_v62 }
 0x6cc   : > { %v3988_v38 = vmul.f32 0.5, %v3987_v46  ;;  %v3918_v34 = vpop.xlane.xlu1 %3917 }
 0x6cd   : > { %v3946_v52 = vmul.f32 %v3918_v34, %v9001_v49  ;;  %v4152_v56 = vmul.f32 %v8639_v10, %v4135_v17 }
 0x6ce   : > { %v3989_v13 = vsub.f32 1.5, %v3988_v38 }
 0x6cf   : > { %v5634_v19 = vpop.eup %5633  ;;  %v3962_v26 = vadd.f32 1e-06, %v3946_v52  ;;  %v3864_v28 = vpop.f32.mrf.mxu3  ;;  %v5673_v52 = vld [vmem:[%s6208_s9 + $0x60] sm:$0xff] }
 0x6d0   : > { %v3990_v57 = vmul.f32 %v5632_v39, %v3989_v13  ;;  %v3996_v0 = vmul.f32 %v5634_v19, %v3961_v8  ;;  %v8637_v53 = vadd.f32 %v5671_v7, %v3864_v28  ;;  %vm4002_vm5 = vweird.f32 %v5634_v19 }
 0x6d1   : > { %5635 = vrsqrt.f32 %v3962_v26  ;;  %vm4003_vm7 = vmor %vm4001_vm6, %vm4002_vm5  ;;  %vm4011_vm10 = vweird.f32 %v3962_v26 }
 0x6d2   : > { %v3994_v29 = vsel %vm3993_vm4, %v5632_v39, %v3990_v57  ;;  %v3997_v59 = vmul.f32 %v5634_v19, %v3996_v0  ;;  %v3905_v44 = vmul.f32 %v8637_v53, %v8637_v53 }
 0x6d3   : > { %v4136_v15 = vmul.f32 %v3994_v29, %v8577_v35 }
 0x6d4   : > { %v3998_v48 = vmul.f32 0.5, %v3997_v59  ;;  %3931 = vadd.xlane.f32.xlu0 %v3905_v44 }
 0x6d5   : > { %v4153_v50 = vmul.f32 %v8639_v10, %v4136_v15  ;;  %v5674_v15 = vld [vmem:[%s6208_s9 + $0x68] sm:$0xff] }
 0x6d6   : > { %v3999_v45 = vsub.f32 1.5, %v3998_v48 }
 0x6d7   : > { %v5636_v9 = vpop.eup %5635  ;;  %v3866_v27 = vpop.f32.mrf.mxu3  ;;  %v4168_v47 = vpack.c.bf16 %v4153_v50, %v4152_v56 }
 0x6d8   : > { %v4006_v23 = vmul.f32 %v5636_v9, %v3962_v26  ;;  %v8648_v11 = vadd.f32 %v5672_v63, %v3866_v27  ;;  %v4000_v18 = vmul.f32 %v5634_v19, %v3999_v45  ;;  %vm4012_vm9 = vweird.f32 %v5636_v9 }
 0x6d9   : > { %4248 = vmatmul.bf16.vlgmr.msra.gmra.mxu0 %v4168_v47  ;;  %vm4013_vm11 = vmor %vm4011_vm10, %vm4012_vm9 }
 0x6da   : > { %v4007_v3 = vmul.f32 %v5636_v9, %v4006_v23  ;;  %v3906_v43 = vmul.f32 %v8648_v11, %v8648_v11  ;;  %v4004_v42 = vsel %vm4003_vm7, %v5634_v19, %v4000_v18 }
 0x6db   : > { %v4137_v12 = vmul.f32 %v4004_v42, %v8584_v60 }
 0x6dc   : > { %v4008_v2 = vmul.f32 0.5, %v4007_v3  ;;  %3933 = vadd.xlane.f32.xlu2 %v3906_v43 }
 0x6dd   : > { %v4154_v36 = vmul.f32 %v8639_v10, %v4137_v12 }
 0x6de   : > { %v4009_v21 = vsub.f32 1.5, %v4008_v2  ;;  %v3920_v6 = vpop.xlane.xlu0 %3919 }
 0x6df   : > { %v3947_v24 = vmul.f32 %v3920_v6, %v9001_v49 }
 0x6e0   : > { %v4010_v16 = vmul.f32 %v5636_v9, %v4009_v21 }
 0x6e1   : > { %v3963_v32 = vadd.f32 1e-06, %v3947_v24 }
 0x6e2   : > { %v4014_v51 = vsel %vm4013_vm11, %v5636_v9, %v4010_v16 }
 0x6e3   : > { %5637 = vrsqrt.f32 %v3963_v32  ;;  %v4138_v1 = vmul.f32 %v4014_v51, %v8590_v22  ;;  %vm4021_vm13 = vweird.f32 %v3963_v32 }
 0x6e5   : > { %v4155_v40 = vmul.f32 %v8639_v10, %v4138_v1 }
 0x6e6   : > { %v3922_v5 = vpop.xlane.xlu2 %3921 }
 0x6e7   : > { %v3948_v4 = vmul.f32 %v3922_v5, %v9001_v49  ;;  %v4169_v20 = vpack.c.bf16 %v4155_v40, %v4154_v36  ;;  %v5675_v40 = vld [vmem:[%s6208_s9 + $0x70] sm:$0xff] }
 0x6e9   : > { %v5638_v61 = vpop.eup %5637  ;;  %v3964_v55 = vadd.f32 1e-06, %v3948_v4  ;;  %4253 = vmatmul.bf16.gmra.mxu0 %v4169_v20 }
 0x6ea   : > { %v4016_v39 = vmul.f32 %v5638_v61, %v3963_v32  ;;  %vm4022_vm12 = vweird.f32 %v5638_v61 }
 0x6eb   : > { %5639 = vrsqrt.f32 %v3964_v55  ;;  %vm4023_vm14 = vmor %vm4021_vm13, %vm4022_vm12  ;;  %vm4031_vm8 = vweird.f32 %v3964_v55 }
 0x6ec   : > { %v4017_v8 = vmul.f32 %v5638_v61, %v4016_v39 }
 0x6ee   : > { %v4018_v30 = vmul.f32 0.5, %v4017_v8  ;;  %v5178_v8 = vld [vmem:[#allocation12 + $0x38] sm:$0xff] }
 0x6ef   : > { %4377 = vmatpush.bf16.msra.mxu1 %v5178_v8 }
 0x6f0   : > { %v4019_v41 = vsub.f32 1.5, %v4018_v30  ;;  %v3869_v38 = vpop.f32.mrf.mxu3 }
 0x6f1   : > { %v5640_v46 = vpop.eup %5639  ;;  %v8659_v54 = vadd.f32 %v5673_v52, %v3869_v38  ;;  %v3924_v13 = vpop.xlane.xlu1 %3923 }
 0x6f2   : > { %v4026_v34 = vmul.f32 %v5640_v46, %v3964_v55  ;;  %v3949_v19 = vmul.f32 %v3924_v13, %v9001_v49  ;;  %v4020_v26 = vmul.f32 %v5638_v61, %v4019_v41  ;;  %vm4032_vm15 = vweird.f32 %v5640_v46  ;;  %v5177_v41 = vld [vmem:[#allocation12 + $0x30] sm:$0xff] }
 0x6f3   : > { %v3907_v57 = vmul.f32 %v8659_v54, %v8659_v54  ;;  %vm4033_vm1 = vmor %vm4031_vm8, %vm4032_vm15  ;;  %4378 = vmatpush.bf16.msra.mxu1 %v5177_v41 }
 0x6f4   : > { %v4027_v28 = vmul.f32 %v5640_v46, %v4026_v34  ;;  %v3965_v0 = vadd.f32 1e-06, %v3949_v19  ;;  %v4024_v17 = vsel %vm4023_vm14, %v5638_v61, %v4020_v26  ;;  %v5676_v19 = vld [vmem:[%s6208_s9 + $0x78] sm:$0xff]  ;;  %s5903_s9 = scalar_lea.hbm %s5902_s3, 512 }
 0x6f5   : > { %3935 = vadd.xlane.f32.xlu1 %v3907_v57  ;;  %v4139_v45 = vmul.f32 %v4024_v17, %v8598_v25  ;;  %p5904_p1 = scmp.ne.s32.totalorder %s5902_s3, %s5903_s9  ;;  %p5909_p7 = scmp.lt.s32.totalorder %s5907_s22, %s5903_s9 }
 0x6f6   : > { %v4028_v7 = vmul.f32 0.5, %v4027_v28  ;;  %5641 = vrsqrt.f32 %v3965_v0  ;;  %vm4041_vm2 = vweird.f32 %v3965_v0 }
 0x6f7   : > { %v4156_v3 = vmul.f32 %v8639_v10, %v4139_v45  ;;  %p5905_p3 = pnand %p5904_p1, %p6171_p5  ;;  %p5910_p8 = por %p5909_p7, %p5908_p12 }
 0x6f8   : > { %v4029_v29 = vsub.f32 1.5, %v4028_v7  ;;  %v3871_v59 = vpop.f32.mrf.mxu3 }
 0x6f9   : > { %v8665_v48 = vadd.f32 %v5674_v15, %v3871_v59  ;;  %v3926_v56 = vpop.xlane.xlu0 %3925  ;;  %p5906_p4 = pneg %p5905_p3 }
 0x6fa   : > { %v4030_v44 = vmul.f32 %v5640_v46, %v4029_v29  ;;  %v3950_v50 = vmul.f32 %v3926_v56, %v9001_v49 }
 0x6fb   : > { %v3908_v27 = vmul.f32 %v8665_v48, %v8665_v48  ;;  %p5911_p9 = pnand %p5910_p8, %p5906_p4 }
 0x6fc   : > { %v4034_v9 = vsel %vm4033_vm1, %v5640_v46, %v4030_v44  ;;  %v5642_v47 = vpop.eup %5641  ;;  %v3966_v23 = vadd.f32 1e-06, %v3950_v50 }
 0x6fd   : > { %v4140_v63 = vmul.f32 %v4034_v9, %v8606_v31  ;;  %v4036_v18 = vmul.f32 %v5642_v47, %v3965_v0  ;;  %3937 = vadd.xlane.f32.xlu0 %v3908_v27  ;;  %vm4042_vm0 = vweird.f32 %v5642_v47 }
 0x6fe   : > { %5643 = vrsqrt.f32 %v3966_v23  ;;  %vm4043_vm3 = vmor %vm4041_vm2, %vm4042_vm0  ;;  %vm4051_vm5 = vweird.f32 %v3966_v23 }
 0x6ff   : > { %v4157_v43 = vmul.f32 %v8639_v10, %v4140_v63  ;;  %v4037_v2 = vmul.f32 %v5642_v47, %v4036_v18 }
 0x701   : > { %v4170_v42 = vpack.c.bf16 %v4157_v43, %v4156_v3  ;;  %v4038_v21 = vmul.f32 0.5, %v4037_v2 }
 0x703   : > { %4258 = vmatmul.bf16.gmra.mxu0 %v4170_v42  ;;  %v4039_v6 = vsub.f32 1.5, %v4038_v21 }
 0x704   : > { %v5644_v24 = vpop.eup %5643 }
 0x705   : > { %v4046_v16 = vmul.f32 %v5644_v24, %v3966_v23  ;;  %v4040_v12 = vmul.f32 %v5642_v47, %v4039_v6  ;;  %vm4052_vm4 = vweird.f32 %v5644_v24 }
 0x706   : > { %vm4053_vm6 = vmor %vm4051_vm5, %vm4052_vm4 }
 0x707   : > { %v4047_v51 = vmul.f32 %v5644_v24, %v4046_v16  ;;  %v4044_v55 = vsel %vm4043_vm3, %v5642_v47, %v4040_v12  ;;  %v5176_v16 = vld [vmem:[#allocation12 + $0x28] sm:$0xff]  ;;  %v5174_v12 = vld [vmem:[#allocation12 + $0x18] sm:$0xff] }
 0x708   : > { %v3928_v32 = vpop.xlane.xlu2 %3927  ;;  %v3874_v36 = vpop.f32.mrf.mxu3  ;;  %v4141_v38 = vmul.f32 %v4044_v55, %v8612_v33  ;;  %4379 = vmatpush.bf16.msra.mxu1 %v5176_v16 }
 0x709   : > { %v3951_v1 = vmul.f32 %v3928_v32, %v9001_v49  ;;  %v8676_v5 = vadd.f32 %v5675_v40, %v3874_v36  ;;  %v4048_v4 = vmul.f32 0.5, %v4047_v51  ;;  %v5175_v32 = vld [vmem:[#allocation12 + $0x20] sm:$0xff]  ;;  %v5173_v51 = vld [vmem:[#allocation12 + $0x10] sm:$0xff] }
 0x70a   : > { %v4158_v29 = vmul.f32 %v8639_v10, %v4141_v38  ;;  %v5171_v36 = vld [vmem:[#allocation12] sm:$0xff] }
 0x70b   : > { %v3967_v20 = vadd.f32 1e-06, %v3951_v1  ;;  %v3909_v61 = vmul.f32 %v8676_v5, %v8676_v5  ;;  %v4049_v39 = vsub.f32 1.5, %v4048_v4  ;;  %v5172_v1 = vld [vmem:[#allocation12 + $0x8] sm:$0xff] }
 0x70c   : > { %4380 = vmatpush.bf16.msra.mxu1 %v5175_v32 }
 0x70d   : > { %5645 = vrsqrt.f32 %v3967_v20  ;;  %3939 = vadd.xlane.f32.xlu2 %v3909_v61  ;;  %v4050_v30 = vmul.f32 %v5644_v24, %v4049_v39  ;;  %vm4061_vm9 = vweird.f32 %v3967_v20 }
 0x70f   : > { %v4054_v34 = vsel %vm4053_vm6, %v5644_v24, %v4050_v30 }
 0x710   : > { %v3930_v46 = vpop.xlane.xlu1 %3929  ;;  %v3876_v52 = vpop.f32.mrf.mxu3  ;;  %v4142_v28 = vmul.f32 %v4054_v34, %v8618_v58  ;;  %4381 = vmatpush.bf16.msra.mxu1 %v5174_v12 }
 0x711   : > { %v3952_v13 = vmul.f32 %v3930_v46, %v9001_v49  ;;  %v8683_v26 = vadd.f32 %v5676_v19, %v3876_v52 }
 0x712   : > { %v4159_v59 = vmul.f32 %v8639_v10, %v4142_v28 }
 0x713   : > { %v5646_v57 = vpop.eup %5645  ;;  %v3968_v0 = vadd.f32 1e-06, %v3952_v13  ;;  %v3910_v17 = vmul.f32 %v8683_v26, %v8683_v26 }
 0x714   : > { %v4056_v7 = vmul.f32 %v5646_v57, %v3967_v20  ;;  %v4171_v15 = vpack.c.bf16 %v4159_v59, %v4158_v29  ;;  %vm4062_vm7 = vweird.f32 %v5646_v57  ;;  %4382 = vmatpush.bf16.msra.mxu1 %v5173_v51 }
 0x715   : > { %5647 = vrsqrt.f32 %v3968_v0  ;;  %3941 = vadd.xlane.f32.xlu1 %v3910_v17  ;;  %vm4063_vm10 = vmor %vm4061_vm9, %vm4062_vm7  ;;  %vm4071_vm12 = vweird.f32 %v3968_v0 }
 0x716   : > { %v4057_v44 = vmul.f32 %v5646_v57, %v4056_v7  ;;  %4263 = vmatmul.bf16.gmra.mxu0 %v4171_v15 }
 0x718   : > { %v4058_v56 = vmul.f32 0.5, %v4057_v44  ;;  %4383 = vmatpush.bf16.msra.mxu1 %v5172_v1 }
 0x71a   : > { %v4059_v50 = vsub.f32 1.5, %v4058_v56 }
 0x71b   : > { %v5648_v45 = vpop.eup %5647 }
 0x71c   : > { %v4066_v9 = vmul.f32 %v5648_v45, %v3968_v0  ;;  %v4060_v27 = vmul.f32 %v5646_v57, %v4059_v50  ;;  %vm4072_vm11 = vweird.f32 %v5648_v45  ;;  %4384 = vmatpush.bf16.msra.mxu1 %v5171_v36 }
 0x71d   : > { %vm4073_vm13 = vmor %vm4071_vm12, %vm4072_vm11 }
 0x71e   : > { %v4067_v47 = vmul.f32 %v5648_v45, %v4066_v9  ;;  %v4064_v63 = vsel %vm4063_vm10, %v5646_v57, %v4060_v27 }
 0x71f   : > { %v4143_v43 = vmul.f32 %v4064_v63, %v8623_v37 }
 0x720   : > { %v4068_v23 = vmul.f32 0.5, %v4067_v47 }
 0x721   : > { %v4160_v21 = vmul.f32 %v8639_v10, %v4143_v43 }
 0x722   : > { %v4069_v18 = vsub.f32 1.5, %v4068_v23 }
 0x724   : > { %v4070_v3 = vmul.f32 %v5648_v45, %v4069_v18 }
 0x726   : > { %v4074_v2 = vsel %vm4073_vm13, %v5648_v45, %v4070_v3 }
 0x727   : > { %v4144_v42 = vmul.f32 %v4074_v2, %v8628_v14 }
 0x729   : > { %v4161_v6 = vmul.f32 %v8639_v10, %v4144_v42 }
 0x72b   : > { %v4172_v24 = vpack.c.bf16 %v4161_v6, %v4160_v21 }
 0x72d   : > { %4268 = vmatmul.bf16.gmra.mxu0 %v4172_v24 }
 0x747   : > { %v3932_v40 = vpop.xlane.xlu0 %3931 }
 0x748   : > { %v3953_v4 = vmul.f32 %v3932_v40, %v9001_v49 }
 0x74a   : > { %v3969_v20 = vadd.f32 1e-06, %v3953_v4 }
 0x74c   : > { %5649 = vrsqrt.f32 %v3969_v20  ;;  %vm4081_vm15 = vweird.f32 %v3969_v20 }
 0x74f   : > { %v3934_v61 = vpop.xlane.xlu2 %3933 }
 0x750   : > { %v3954_v55 = vmul.f32 %v3934_v61, %v9001_v49 }
 0x752   : > { %v5650_v39 = vpop.eup %5649  ;;  %v3970_v8 = vadd.f32 1e-06, %v3954_v55 }
 0x753   : > { %v4076_v30 = vmul.f32 %v5650_v39, %v3969_v20  ;;  %vm4082_vm14 = vweird.f32 %v5650_v39 }
 0x754   : > { %5651 = vrsqrt.f32 %v3970_v8  ;;  %vm4083_vm8 = vmor %vm4081_vm15, %vm4082_vm14  ;;  %vm4091_vm0 = vweird.f32 %v3970_v8 }
 0x755   : > { %v4077_v41 = vmul.f32 %v5650_v39, %v4076_v30 }
 0x756   : > { %v8696_v46 = vpop.f32.mrf.mxu0 }
 0x757   : > { %v4078_v38 = vmul.f32 0.5, %v4077_v41  ;;  %v4289_v7 = vmax.f32 %v8696_v46, 0.0 }
 0x759   : > { %v4079_v34 = vsub.f32 1.5, %v4078_v38 }
 0x75a   : > { %v5652_v52 = vpop.eup %5651 }
 0x75b   : > { %v4086_v13 = vmul.f32 %v5652_v52, %v3970_v8  ;;  %v4080_v19 = vmul.f32 %v5650_v39, %v4079_v34  ;;  %vm4092_vm1 = vweird.f32 %v5652_v52 }
 0x75c   : > { %vm4093_vm2 = vmor %vm4091_vm0, %vm4092_vm1 }
 0x75d   : > { %v4087_v28 = vmul.f32 %v5652_v52, %v4086_v13  ;;  %v4084_v29 = vsel %vm4083_vm8, %v5650_v39, %v4080_v19 }
 0x75e   : > { %v8698_v57 = vpop.f32.mrf.mxu0  ;;  %v4145_v56 = vmul.f32 %v4084_v29, %v8637_v53 }
 0x75f   : > { %v4088_v0 = vmul.f32 0.5, %v4087_v28  ;;  %v4290_v17 = vmax.f32 %v8698_v57, 0.0 }
 0x760   : > { %v4162_v27 = vmul.f32 %v8639_v10, %v4145_v56 }
 0x761   : > { %v4089_v59 = vsub.f32 1.5, %v4088_v0  ;;  %v4305_v44 = vpack.c.bf16 %v4290_v17, %v4289_v7 }
 0x763   : > { %v4090_v15 = vmul.f32 %v5652_v52, %v4089_v59  ;;  %4385 = vmatmul.bf16.vlgmr.msra.gmra.mxu1 %v4305_v44 }
 0x765   : > { %v4094_v50 = vsel %vm4093_vm2, %v5652_v52, %v4090_v15 }
 0x766   : > { %v8707_v45 = vpop.f32.mrf.mxu0  ;;  %v4146_v9 = vmul.f32 %v4094_v50, %v8648_v11 }
 0x767   : > { %v4291_v2 = vmax.f32 %v8707_v45, 0.0 }
 0x768   : > { %v4163_v47 = vmul.f32 %v8639_v10, %v4146_v9  ;;  %v3936_v23 = vpop.xlane.xlu1 %3935 }
 0x769   : > { %v3955_v63 = vmul.f32 %v3936_v23, %v9001_v49 }
 0x76a   : > { %v4173_v18 = vpack.c.bf16 %v4163_v47, %v4162_v27 }
 0x76b   : > { %v3971_v3 = vadd.f32 1e-06, %v3955_v63 }
 0x76c   : > { %4273 = vmatmul.bf16.gmra.mxu0 %v4173_v18 }
 0x76d   : > { %5653 = vrsqrt.f32 %v3971_v3  ;;  %vm4101_vm4 = vweird.f32 %v3971_v3 }
 0x76e   : > { %v8713_v43 = vpop.f32.mrf.mxu0 }
 0x76f   : > { %v4292_v42 = vmax.f32 %v8713_v43, 0.0 }
 0x770   : > { %v3938_v6 = vpop.xlane.xlu0 %3937 }
 0x771   : > { %v4306_v21 = vpack.c.bf16 %v4292_v42, %v4291_v2  ;;  %v3956_v24 = vmul.f32 %v3938_v6, %v9001_v49 }
 0x773   : > { %4390 = vmatmul.bf16.gmra.mxu1 %v4306_v21  ;;  %v5654_v16 = vpop.eup %5653  ;;  %v3972_v32 = vadd.f32 1e-06, %v3956_v24 }
 0x774   : > { %v4096_v12 = vmul.f32 %v5654_v16, %v3971_v3  ;;  %vm4102_vm3 = vweird.f32 %v5654_v16 }
 0x775   : > { %5655 = vrsqrt.f32 %v3972_v32  ;;  %vm4103_vm5 = vmor %vm4101_vm4, %vm4102_vm3  ;;  %vm4111_vm7 = vweird.f32 %v3972_v32 }
 0x776   : > { %v4097_v51 = vmul.f32 %v5654_v16, %v4096_v12  ;;  %v5186_v12 = vld [vmem:[#allocation14 + $0x38] sm:$0xff] }
 0x777   : > { %4514 = vmatpush.bf16.msrb.mxu2 %v5186_v12 }
 0x778   : > { %v4098_v1 = vmul.f32 0.5, %v4097_v51 }
 0x77a   : > { %v4099_v36 = vsub.f32 1.5, %v4098_v1  ;;  %v5185_v1 = vld [vmem:[#allocation14 + $0x30] sm:$0xff] }
 0x77b   : > { %v5656_v40 = vpop.eup %5655  ;;  %4515 = vmatpush.bf16.msrb.mxu2 %v5185_v1 }
 0x77c   : > { %v4106_v4 = vmul.f32 %v5656_v40, %v3972_v32  ;;  %v4100_v20 = vmul.f32 %v5654_v16, %v4099_v36  ;;  %vm4112_vm6 = vweird.f32 %v5656_v40 }
 0x77d   : > { %vm4113_vm9 = vmor %vm4111_vm7, %vm4112_vm6 }
 0x77e   : > { %v4107_v61 = vmul.f32 %v5656_v40, %v4106_v4  ;;  %v4104_v41 = vsel %vm4103_vm5, %v5654_v16, %v4100_v20 }
 0x77f   : > { %v4147_v13 = vmul.f32 %v4104_v41, %v8659_v54 }
 0x780   : > { %v3940_v55 = vpop.xlane.xlu2 %3939  ;;  %v8722_v39 = vpop.f32.mrf.mxu0  ;;  %v4108_v8 = vmul.f32 0.5, %v4107_v61  ;;  %v5184_v61 = vld [vmem:[#allocation14 + $0x28] sm:$0xff] }
 0x781   : > { %v3957_v30 = vmul.f32 %v3940_v55, %v9001_v49  ;;  %v4293_v59 = vmax.f32 %v8722_v39, 0.0  ;;  %v4164_v56 = vmul.f32 %v8639_v10, %v4147_v13  ;;  %4516 = vmatpush.bf16.msrb.mxu2 %v5184_v61 }
 0x782   : > { %v4109_v38 = vsub.f32 1.5, %v4108_v8 }
 0x783   : > { %v3973_v34 = vadd.f32 1e-06, %v3957_v30 }
 0x784   : > { %v4110_v52 = vmul.f32 %v5656_v40, %v4109_v38 }
 0x785   : > { %5657 = vrsqrt.f32 %v3973_v34  ;;  %vm4121_vm11 = vweird.f32 %v3973_v34 }
 0x786   : > { %v4114_v19 = vsel %vm4113_vm9, %v5656_v40, %v4110_v52  ;;  %v5183_v52 = vld [vmem:[#allocation14 + $0x20] sm:$0xff] }
 0x787   : > { %v4148_v29 = vmul.f32 %v4114_v19, %v8665_v48  ;;  %4517 = vmatpush.bf16.msrb.mxu2 %v5183_v52 }
 0x788   : > { %v8726_v28 = vpop.f32.mrf.mxu0  ;;  %v3942_v0 = vpop.xlane.xlu1 %3941 }
 0x789   : > { %v4294_v44 = vmax.f32 %v8726_v28, 0.0  ;;  %v3958_v15 = vmul.f32 %v3942_v0, %v9001_v49  ;;  %v4165_v50 = vmul.f32 %v8639_v10, %v4148_v29  ;;  %v5182_v29 = vld [vmem:[#allocation14 + $0x18] sm:$0xff] }
 0x78b   : > { %v5658_v9 = vpop.eup %5657  ;;  %v4307_v27 = vpack.c.bf16 %v4294_v44, %v4293_v59  ;;  %v3974_v47 = vadd.f32 1e-06, %v3958_v15  ;;  %v4174_v63 = vpack.c.bf16 %v4165_v50, %v4164_v56  ;;  %4518 = vmatpush.bf16.msrb.mxu2 %v5182_v29 }
 0x78c   : > { %v4116_v23 = vmul.f32 %v5658_v9, %v3973_v34  ;;  %vm4122_vm10 = vweird.f32 %v5658_v9 }
 0x78d   : > { %5659 = vrsqrt.f32 %v3974_v47  ;;  %4395 = vmatmul.bf16.gmra.mxu1 %v4307_v27  ;;  %4278 = vmatmul.bf16.gmra.mxu0 %v4174_v63  ;;  %vm4123_vm12 = vmor %vm4121_vm11, %vm4122_vm10  ;;  %vm4131_vm14 = vweird.f32 %v3974_v47  ;;  %v5179_v63 = vld [vmem:[#allocation14] sm:$0xff] }
 0x78e   : > { %v4117_v18 = vmul.f32 %v5658_v9, %v4116_v23  ;;  %v5180_v23 = vld [vmem:[#allocation14 + $0x8] sm:$0xff] }
 0x790   : > { %v4118_v3 = vmul.f32 0.5, %v4117_v18 }
 0x792   : > { %v4119_v21 = vsub.f32 1.5, %v4118_v3 }
 0x793   : > { %v5660_v49 = vpop.eup %5659  ;;  %v8738_v24 = vpop.f32.mrf.mxu0 }
 0x794   : > { %v4126_v6 = vmul.f32 %v5660_v49, %v3974_v47  ;;  %v4120_v16 = vmul.f32 %v5658_v9, %v4119_v21  ;;  %vm4132_vm13 = vweird.f32 %v5660_v49  ;;  %v4295_v55 = vmax.f32 %v8738_v24, 0.0  ;;  %v5181_v47 = vld [vmem:[#allocation14 + $0x10] sm:$0xff] }
 0x795   : > { %vm4133_vm15 = vmor %vm4131_vm14, %vm4132_vm13  ;;  %4519 = vmatpush.bf16.msrb.mxu2 %v5181_v47 }
 0x796   : > { %v4127_v32 = vmul.f32 %v5660_v49, %v4126_v6  ;;  %v4124_v36 = vsel %vm4123_vm12, %v5658_v9, %v4120_v16 }
 0x797   : > { %v4149_v30 = vmul.f32 %v4124_v36, %v8676_v5 }
 0x798   : > { %v4128_v51 = vmul.f32 0.5, %v4127_v32 }
 0x799   : > { %v4166_v13 = vmul.f32 %v8639_v10, %v4149_v30  ;;  %4520 = vmatpush.bf16.msrb.mxu2 %v5180_v23 }
 0x79a   : > { %v4129_v40 = vsub.f32 1.5, %v4128_v51 }
 0x79b   : > { %v8740_v20 = vpop.f32.mrf.mxu0 }
 0x79c   : > { %v4130_v4 = vmul.f32 %v5660_v49, %v4129_v40  ;;  %v4296_v8 = vmax.f32 %v8740_v20, 0.0 }
 0x79d   : > { %4521 = vmatpush.bf16.msrb.mxu2 %v5179_v63 }
 0x79e   : > { %v4134_v41 = vsel %vm4133_vm15, %v5660_v49, %v4130_v4  ;;  %v4308_v38 = vpack.c.bf16 %v4296_v8, %v4295_v55 }
 0x79f   : > { %v4150_v34 = vmul.f32 %v4134_v41, %v8683_v26 }
 0x7a0   : > { %4400 = vmatmul.bf16.gmra.mxu1 %v4308_v38 }
 0x7a1   : > { %v4167_v19 = vmul.f32 %v8639_v10, %v4150_v34 }
 0x7a3   : > { %v4175_v0 = vpack.c.bf16 %v4167_v19, %v4166_v13 }
 0x7a5   : > { %4283 = vmatmul.bf16.gmra.mxu0 %v4175_v0 }
 0x7aa   : > { %v4269_v15 = vpop.f32.mrf.mxu0 }
 0x7ab   : > { %v4297_v50 = vmax.f32 %v4269_v15, 0.0 }
 0x7b2   : > { %v4271_v56 = vpop.f32.mrf.mxu0 }
 0x7b3   : > { %v4298_v9 = vmax.f32 %v4271_v56, 0.0 }
 0x7b5   : > { %v4309_v27 = vpack.c.bf16 %v4298_v9, %v4297_v50 }
 0x7b7   : > { %4405 = vmatmul.bf16.gmra.mxu1 %v4309_v27 }
 0x7e0   : > { %v4386_v18 = vpop.f32.mrf.mxu1 }
 0x7e1   : > { %v4426_v10 = vmul.f32 %v4386_v18, %v4289_v7 }
 0x7e8   : > { %v4388_v3 = vpop.f32.mrf.mxu1 }
 0x7e9   : > { %v4427_v21 = vmul.f32 %v4388_v3, %v4290_v17  ;;  %v4274_v49 = vpop.f32.mrf.mxu0 }
 0x7ea   : > { %v4299_v32 = vmax.f32 %v4274_v49, 0.0 }
 0x7eb   : > { %v4442_v6 = vpack.c.bf16 %v4427_v21, %v4426_v10 }
 0x7ed   : > { %4522 = vmatmul.bf16.vlgmr.msrb.gmra.mxu2 %v4442_v6 }
 0x7f0   : > { %v4391_v24 = vpop.f32.mrf.mxu1 }
 0x7f1   : > { %v4276_v16 = vpop.f32.mrf.mxu0  ;;  %v4428_v36 = vmul.f32 %v4391_v24, %v4291_v2 }
 0x7f2   : > { %v4300_v12 = vmax.f32 %v4276_v16, 0.0 }
 0x7f4   : > { %v4310_v51 = vpack.c.bf16 %v4300_v12, %v4299_v32 }
 0x7f6   : > { %4410 = vmatmul.bf16.gmra.mxu1 %v4310_v51 }
 0x7f8   : > { %v4393_v1 = vpop.f32.mrf.mxu1 }
 0x7f9   : > { %v4429_v46 = vmul.f32 %v4393_v1, %v4292_v42 }
 0x7fb   : > { %v4443_v7 = vpack.c.bf16 %v4429_v46, %v4428_v36 }
 0x7fd   : > { %4527 = vmatmul.bf16.gmra.mxu2 %v4443_v7 }
 0x80a   : > { %v4396_v57 = vpop.f32.mrf.mxu1  ;;  %v4279_v17 = vpop.f32.mrf.mxu0 }
 0x80b   : > { %v4430_v4 = vmul.f32 %v4396_v57, %v4293_v59  ;;  %v4301_v30 = vmax.f32 %v4279_v17, 0.0 }
 0x812   : > { %v4398_v40 = vpop.f32.mrf.mxu1  ;;  %v4281_v20 = vpop.f32.mrf.mxu0 }
 0x813   : > { %v4431_v61 = vmul.f32 %v4398_v40, %v4294_v44  ;;  %v4302_v41 = vmax.f32 %v4281_v20, 0.0 }
 0x815   : > { %v4444_v38 = vpack.c.bf16 %v4431_v61, %v4430_v4  ;;  %v4311_v45 = vpack.c.bf16 %v4302_v41, %v4301_v30 }
 0x817   : > { %4532 = vmatmul.bf16.gmra.mxu2 %v4444_v38  ;;  %4415 = vmatmul.bf16.gmra.mxu1 %v4311_v45 }
 0x81d   : > { %v4401_v43 = vpop.f32.mrf.mxu1 }
 0x81e   : > { %v4432_v34 = vmul.f32 %v4401_v43, %v4295_v55 }
 0x822   : > { %v4284_v2 = vpop.f32.mrf.mxu0 }
 0x823   : > { %v4303_v39 = vmax.f32 %v4284_v2, 0.0 }
 0x825   : > { %v4403_v42 = vpop.f32.mrf.mxu1 }
 0x826   : > { %v4433_v52 = vmul.f32 %v4403_v42, %v4296_v8 }
 0x828   : > { %v4445_v13 = vpack.c.bf16 %v4433_v52, %v4432_v34 }
 0x82a   : > { %v4286_v19 = vpop.f32.mrf.mxu0  ;;  %4537 = vmatmul.bf16.gmra.mxu2 %v4445_v13 }
 0x82b   : > { %v4304_v59 = vmax.f32 %v4286_v19, 0.0 }
 0x82d   : > { %v4312_v0 = vpack.c.bf16 %v4304_v59, %v4303_v39 }
 0x82f   : > { %4420 = vmatmul.bf16.gmra.mxu1 %v4312_v0 }
 0x834   : > { %v4406_v28 = vpop.f32.mrf.mxu1 }
 0x835   : > { %v4434_v29 = vmul.f32 %v4406_v28, %v4297_v50 }
 0x83c   : > { %v4408_v44 = vpop.f32.mrf.mxu1 }
 0x83d   : > { %v4435_v15 = vmul.f32 %v4408_v44, %v4298_v9 }
 0x83f   : > { %v4446_v56 = vpack.c.bf16 %v4435_v15, %v4434_v29 }
 0x841   : > { %4542 = vmatmul.bf16.gmra.mxu2 %v4446_v56 }
 0x870   : > { %v4523_v27 = vpop.f32.mrf.mxu2 }
 0x871   : > { %v4563_v47 = vadd.f32 %v4523_v27, %v8570_v62 }
 0x873   : > { %4579 = vst [vmem:[%s8763_s17] sm:$0xff] %v4563_v47  ;;  %v4411_v55 = vpop.f32.mrf.mxu1 }
 0x874   : > { %v4436_v9 = vmul.f32 %v4411_v55, %v4299_v32 }
 0x878   : > { %v4525_v8 = vpop.f32.mrf.mxu2 }
 0x879   : > { %v4564_v23 = vadd.f32 %v4525_v8, %v8577_v35 }
 0x87b   : > { %4580 = vst [vmem:[%s8763_s17 + $0x8] sm:$0xff] %v4564_v23  ;;  %v4413_v50 = vpop.f32.mrf.mxu1 }
 0x87c   : > { %v4437_v63 = vmul.f32 %v4413_v50, %v4300_v12 }
 0x87e   : > { %v4447_v18 = vpack.c.bf16 %v4437_v63, %v4436_v9 }
 0x880   : > { %v4528_v3 = vpop.f32.mrf.mxu2  ;;  %4547 = vmatmul.bf16.gmra.mxu2 %v4447_v18 }
 0x881   : > { %v4565_v62 = vadd.f32 %v4528_v3, %v8584_v60 }
 0x883   : > { %4581 = vst [vmem:[%s8763_s17 + $0x10] sm:$0xff] %v4565_v62 }
 0x888   : > { %v4530_v10 = vpop.f32.mrf.mxu2 }
 0x889   : > { %v4566_v21 = vadd.f32 %v4530_v10, %v8590_v22 }
 0x88b   : > { %4582 = vst [vmem:[%s8763_s17 + $0x18] sm:$0xff] %v4566_v21 }
 0x894   : > { %v4416_v49 = vpop.f32.mrf.mxu1 }
 0x895   : > { %v4438_v16 = vmul.f32 %v4416_v49, %v4301_v30 }
 0x89a   : > { %v4533_v6 = vpop.f32.mrf.mxu2 }
 0x89b   : > { %v4567_v35 = vadd.f32 %v4533_v6, %v8598_v25 }
 0x89c   : > { %v4418_v24 = vpop.f32.mrf.mxu1 }
 0x89d   : > { %4583 = vst [vmem:[%s8763_s17 + $0x20] sm:$0xff] %v4567_v35  ;;  %v4439_v32 = vmul.f32 %v4418_v24, %v4302_v41 }
 0x89f   : > { %v4448_v12 = vpack.c.bf16 %v4439_v32, %v4438_v16 }
 0x8a1   : > { %4552 = vmatmul.bf16.gmra.mxu2 %v4448_v12 }
 0x8a2   : > { %v4535_v51 = vpop.f32.mrf.mxu2 }
 0x8a3   : > { %v4568_v60 = vadd.f32 %v4535_v51, %v8606_v31 }
 0x8a5   : > { %4584 = vst [vmem:[%s8763_s17 + $0x28] sm:$0xff] %v4568_v60 }
 0x8ac   : > { %v4421_v1 = vpop.f32.mrf.mxu1 }
 0x8ad   : > { %v4538_v22 = vpop.f32.mrf.mxu2  ;;  %v4440_v46 = vmul.f32 %v4421_v1, %v4303_v39 }
 0x8ae   : > { %v4569_v36 = vadd.f32 %v4538_v22, %v8612_v33 }
 0x8b0   : > { %4585 = vst [vmem:[%s8763_s17 + $0x30] sm:$0xff] %v4569_v36 }
 0x8b4   : > { %v4423_v25 = vpop.f32.mrf.mxu1 }
 0x8b5   : > { %v4441_v7 = vmul.f32 %v4423_v25, %v4304_v59  ;;  %v4540_v57 = vpop.f32.mrf.mxu2 }
 0x8b6   : > { %v4570_v40 = vadd.f32 %v4540_v57, %v8618_v58 }
 0x8b7   : > { %v4449_v17 = vpack.c.bf16 %v4441_v7, %v4440_v46 }
 0x8b8   : > { %4586 = vst [vmem:[%s8763_s17 + $0x38] sm:$0xff] %v4570_v40 }
 0x8b9   : > { %4557 = vmatmul.bf16.gmra.mxu2 %v4449_v17 }
 0x8c4   : > { %v4543_v31 = vpop.f32.mrf.mxu2 }
 0x8c5   : > { %v4571_v4 = vadd.f32 %v4543_v31, %v8623_v37 }
 0x8c7   : > { %4587 = vst [vmem:[%s8763_s17 + $0x40] sm:$0xff] %v4571_v4 }
 0x8cc   : > { %v4545_v20 = vpop.f32.mrf.mxu2 }
 0x8cd   : > { %v4572_v33 = vadd.f32 %v4545_v20, %v8628_v14 }
 0x8cf   : > { %4588 = vst [vmem:[%s8763_s17 + $0x48] sm:$0xff] %v4572_v33 }
 0x8d0   : > { %5914 = shalt.err (!%p5911_p9)
}
 0x8d1   : > { %s6015_s10 = smov 128   ;;  %s6016_s16 = smov 8  }
 0x8d2   : > { %5240 = dma.vmem_to_hbm [thread:$0]  (%p6171_p5), %s4631_s14, 8192, %s4633_s11, %s4601_s2, %s6015_s10, %s6015_s10, %s6016_s16  }
 0x8d3   : > { %s5187_s14 = sshll.u32 %s6086_s12, 7  ;;  %s4613_s2 = sshll.u32 %s8763_s17, 4  ;;  %s4614_s2 = int_to_ptr.vmem [resolvable:$true] %s4613_s2 }
 0x8d4   : > { %s4612_s11 = scalar_lea.hbm %s8859_s7, %s5187_s14  ;;  %s4596_s9 = scalar_lea.sflag [#allocation5], %s6202_s15 }
 0x8d5   : > { %s4615_s3 = sshll.u32 %s4612_s11, 4  ;;  %s5935_s20 = scalar_lea.hbm %s8859_s7, 256  ;;  %s4616_s3 = int_to_ptr.hbm [resolvable:$true] %s4615_s3 }
 0x8d6   : > { %s5929_s1 = sshra.s32 %s4616_s3, 4  ;;  %s5930_s1 = int_to_ptr.hbm [resolvable:$true] %s5929_s1 }
 0x8d7   : > { %s5931_s12 = scalar_lea.hbm %s5930_s1, 128  ;;  %p5936_p0 = scmp.lt.s32.totalorder %s5930_s1, %s8859_s7 }
 0x8d8   : > { %p5932_p10 = scmp.ne.s32.totalorder %s5930_s1, %s5931_s12  ;;  %p5937_p2 = scmp.lt.s32.totalorder %s5935_s20, %s5931_s12 }
 0x8da   : > { %p5933_p13 = pnand %p5932_p10, %p6171_p5  ;;  %p5938_p1 = por %p5937_p2, %p5936_p0 }
 0x8dc   : > { %p5934_p11 = pneg %p5933_p13 }
 0x8de   : > { %p5939_p3 = pnand %p5938_p1, %p5934_p11 }
 0x903   : > { %v4548_v58 = vpop.f32.mrf.mxu2 }
 0x904   : > { %v4573_v37 = vadd.f32 %v4548_v58, %v8637_v53 }
 0x906   : > { %4589 = vst [vmem:[%s8763_s17 + $0x50] sm:$0xff] %v4573_v37 }
 0x90b   : > { %v4550_v14 = vpop.f32.mrf.mxu2 }
 0x90c   : > { %v4574_v61 = vadd.f32 %v4550_v14, %v8648_v11 }
 0x90e   : > { %4590 = vst [vmem:[%s8763_s17 + $0x58] sm:$0xff] %v4574_v61 }
 0x924   : > { %v4553_v30 = vpop.f32.mrf.mxu2 }
 0x925   : > { %v4575_v41 = vadd.f32 %v4553_v30, %v8659_v54 }
 0x927   : > { %4591 = vst [vmem:[%s8763_s17 + $0x60] sm:$0xff] %v4575_v41 }
 0x92c   : > { %v4555_v38 = vpop.f32.mrf.mxu2 }
 0x92d   : > { %v4576_v45 = vadd.f32 %v4555_v38, %v8665_v48 }
 0x92f   : > { %4592 = vst [vmem:[%s8763_s17 + $0x68] sm:$0xff] %v4576_v45 }
 0x93c   : > { %v4558_v43 = vpop.f32.mrf.mxu2 }
 0x93d   : > { %v4577_v53 = vadd.f32 %v4558_v43, %v8676_v5 }
 0x93f   : > { %4593 = vst [vmem:[%s8763_s17 + $0x70] sm:$0xff] %v4577_v53 }
 0x944   : > { %v4560_v11 = vpop.f32.mrf.mxu2 }
 0x945   : > { %v4578_v54 = vadd.f32 %v4560_v11, %v8683_v26 }
 0x947   : > { %4594 = vst [vmem:[%s8763_s17 + $0x78] sm:$0xff] %v4578_v54 }
 0x948   : > { %5942 = shalt.err (!%p5939_p3)
}
 0x949   : > { %5239 = dma.vmem_to_hbm [thread:$0]  (%p6171_p5), %s4614_s2, 2048, %s4616_s3, %s4596_s9, %s6015_s10, %s6015_s10, %s6016_s16  }
 0x94a PF: > { %s4647_s15 = sand.u32 1, %s5985_s27   ;;  %p9002_p4 = scmp.ge.s32.totalorder %s5997_s30, 2 }
 0x94b   : > { %s4648_s17 = scalar_lea.sflag [#allocation5], %s4647_s15 }
 0x94c   : > { %p5267_p12 = pnand %p9002_p4, %p6175_p6 }
 0x94e   : > { %p5268_p7 = pneg %p5267_p12 }
 0x950   : > { %5976 = dma.done.wait (%p5268_p7), %s4648_s17, 2048  }
 0x951   : > { %5978 = vsyncadd (%p5268_p7), %s4648_s17, 4294965248  ;;  %s4658_s19 = scalar_lea.sflag [#allocation17], %s4647_s15 }
 0x952   : > { %5980 = dma.done.wait (%p5268_p7), %s4658_s19, 8192  }
 0x953   : > { %5982 = vsyncadd (%p5268_p7), %s4658_s19, 4294959104  ;;  %p28_p5 = scmp.ge.s32.totalorder %s6145_s18, 4   ;;  %s9003_s27 = smov %s5989_s28 }
 0x954   : > { %s9004_s28 = smov %s5993_s29  ;;  %s9005_s29 = smov %s6156_s24 }
 0x955   : > { %s9006_s30 = smov %s6145_s18  ;;  %30 = sbr.rel (!%p28_p5) target bundleno = 14 (0xe), region = 137 }
 0x95a   :  { %4664 = vsyncpa [#allocation4], 1 }
 0x95b   :  { %4666 = vsyncpa [#allocation4 + $0x1], 1 }
 0x95c   :  { %4667 = vsyncpa [#allocation7], 1 }
 0x95d   :  { %4668 = vsyncpa [#allocation10], 1 }
 0x95e   :  { %4669 = vsyncpa [#allocation13], 1 }
 0x95f   :  { %4670 = vsyncpa [#allocation5], 1 }
 0x960   :  { %4672 = vsyncpa [#allocation5 + $0x1], 1 }
 0x961   :  { %4673 = vsyncpa [#allocation17], 1 }
 0x962   :  { %4675 = vsyncpa [#allocation17 + $0x1], 1 }

</bundles_post_ra>
